<compile_context>
chip_gen: v7x
topology: tpu7x:2x2x1
jax: 0.10.0
libtpu: 0.0.40
codegen_flags: <defaults>
</compile_context>

<pallas_src>
import functools

import jax
import jax.numpy as jnp
from jax import lax
from jax.experimental import pallas as pl
from jax.experimental.pallas import tpu as pltpu


# ----------------------------------------------------------------------------
# Recurrent Pallas kernel: one GRU layer, input projection already hoisted.
# ----------------------------------------------------------------------------
def _gru_recurrent_kernel(gi_ref, whh_ref, bhh_n_ref, o_ref, h_ref, *, hid_pad, tt):
    """Grid axis 0 = time blocks (sequential, 'arbitrary').

    gi_ref:    (TT, B, 3*Hp)  precomputed x@W_ih^T + b_ih (+ b_hh for r,z gates)
    whh_ref:   (Hp, 3*Hp)     hidden-to-hidden weights, pre-transposed & padded
    bhh_n_ref: (1, Hp)        hidden bias of the n gate (cannot be folded)
    o_ref:     (TT, B, Hp)    per-timestep hidden states (time-major)
    h_ref:     (B, Hp)        VMEM scratch: recurrent state across grid steps
    """
    @pl.when(pl.program_id(0) == 0)
    def _():
        h_ref[...] = jnp.zeros_like(h_ref)

    Hp = hid_pad
    whh = whh_ref[...]        # load once per grid step (TT timesteps)
    bhh_n = bhh_n_ref[...]

    def step(t, h_prev):
        gi_t = gi_ref[t]                                              # (B, 3Hp)
        gh = jnp.dot(h_prev, whh, preferred_element_type=jnp.float32)  # (B, 3Hp)
        r = jax.nn.sigmoid(gi_t[:, 0 * Hp:1 * Hp] + gh[:, 0 * Hp:1 * Hp])
        z = jax.nn.sigmoid(gi_t[:, 1 * Hp:2 * Hp] + gh[:, 1 * Hp:2 * Hp])
        n = jnp.tanh(gi_t[:, 2 * Hp:3 * Hp] + r * (gh[:, 2 * Hp:3 * Hp] + bhh_n))
        h_new = (1.0 - z) * n + z * h_prev
        o_ref[t] = h_new.astype(o_ref.dtype)
        return h_new

    h_last = lax.fori_loop(0, tt, step, h_ref[...], unroll=True)
    h_ref[...] = h_last


def _gru_recurrence(gi, whh_t, bhh_n, *, tt):
    """Run the sequential part of one GRU layer. gi: (T_pad, B, 3*Hp) time-major."""
    T_pad, B, G = gi.shape
    Hp = G // 3
    kernel = functools.partial(_gru_recurrent_kernel, hid_pad=Hp, tt=tt)
    return pl.pallas_call(
        kernel,
        out_shape=jax.ShapeDtypeStruct((T_pad, B, Hp), jnp.float32),
        grid_spec=pltpu.PrefetchScalarGridSpec(
            num_scalar_prefetch=0,
            grid=(T_pad // tt,),
            in_specs=[
                pl.BlockSpec((tt, B, G), lambda i: (i, 0, 0)),   # gi block (TT steps)
                pl.BlockSpec((Hp, G), lambda i: (0, 0)),         # W_hh^T (constant)
                pl.BlockSpec((1, Hp), lambda i: (0, 0)),         # b_hh_n (constant)
            ],
            out_specs=pl.BlockSpec((tt, B, Hp), lambda i: (i, 0, 0)),
            scratch_shapes=[pltpu.VMEM((B, Hp), jnp.float32)],
        ),
        compiler_params=pltpu.CompilerParams(
            dimension_semantics=("arbitrary",),   # recurrence over time blocks
        ),
    )(gi, whh_t, bhh_n)


# ----------------------------------------------------------------------------
# Parameter preparation (done once, outside the forward pass).
# ----------------------------------------------------------------------------
def prepare_gru_params(params, hid_dim, lane=128):
    """Pre-transpose / lane-pad PyTorch-shaped GRU params; fold r,z biases."""
    H = hid_dim
    Hp = ((H + lane - 1) // lane) * lane
    prepared = []
    for layer_idx, (w_ih, w_hh, b_ih, b_hh) in enumerate(params):
        d_in = w_ih.shape[1]
        d_in_p = d_in if layer_idx == 0 else Hp   # later layers consume padded H
        wih_t = jnp.zeros((d_in_p, 3 * Hp), jnp.float32)
        whh_t = jnp.zeros((Hp, 3 * Hp), jnp.float32)
        bias = jnp.zeros((3 * Hp,), jnp.float32)
        bhh_n = jnp.zeros((1, Hp), jnp.float32)
        for g in range(3):
            wih_t = wih_t.at[:d_in, g * Hp:g * Hp + H].set(w_ih[g * H:(g + 1) * H, :].T)
            whh_t = whh_t.at[:H, g * Hp:g * Hp + H].set(w_hh[g * H:(g + 1) * H, :].T)
        # Fold b_hh into the hoisted projection for r and z; keep b_hh_n separate.
        bias = bias.at[0 * Hp:0 * Hp + H].set(b_ih[0 * H:1 * H] + b_hh[0 * H:1 * H])
        bias = bias.at[1 * Hp:1 * Hp + H].set(b_ih[1 * H:2 * H] + b_hh[1 * H:2 * H])
        bias = bias.at[2 * Hp:2 * Hp + H].set(b_ih[2 * H:3 * H])
        bhh_n = bhh_n.at[0, :H].set(b_hh[2 * H:3 * H])
        prepared.append((wih_t, whh_t, bias, bhh_n))
    return prepared


# ----------------------------------------------------------------------------
# Forward pass (== RNNDecoder.forward, eval mode).
# ----------------------------------------------------------------------------
@functools.partial(jax.jit, static_argnames=("hid_dim", "tt"))
def rnn_decoder_forward(x_btd, prepared, *, hid_dim, tt=8):
    """x_btd: (B, T, in_dim) batch-first.  Returns decoder_out: (B, T, hid_dim)."""
    B, T, _ = x_btd.shape
    T_pad = ((T + tt - 1) // tt) * tt

    y = None
    for layer_idx, (wih_t, whh_t, bias, bhh_n) in enumerate(prepared):
        if layer_idx == 0:
            # One big matmul over all timesteps; batch-first -> time-major is
            # fused into this contraction (no separate transpose pass).
            gi = jnp.einsum("btd,dg->tbg", x_btd, wih_t) + bias
        else:
            gi = jnp.einsum("tbh,hg->tbg", y, wih_t) + bias
        if gi.shape[0] != T_pad:
            # Tail guard: pad time dim; forward recurrence => real steps unaffected.
            gi = jnp.pad(gi, ((0, T_pad - gi.shape[0]), (0, 0), (0, 0)))
        y = _gru_recurrence(gi, whh_t, bhh_n, tt=tt)      # (T_pad, B, Hp)

    # Single final relayout + un-pad.
    return jnp.transpose(y, (1, 0, 2))[:, :T, :hid_dim]


# ----------------------------------------------------------------------------
# PyTorch-style initialization and pure-JAX reference.
# ----------------------------------------------------------------------------
def init_gru_params(key, in_dim, hid_dim, n_layers):
    """uniform(-1/sqrt(H), 1/sqrt(H)) init; gate order r|z|n (PyTorch layout)."""
    params = []
    bound = 1.0 / jnp.sqrt(jnp.float32(hid_dim))
    for layer in range(n_layers):
        d_in = in_dim if layer == 0 else hid_dim
        key, k1, k2, k3, k4 = jax.random.split(key, 5)
        w_ih = jax.random.uniform(k1, (3 * hid_dim, d_in), jnp.float32, -bound, bound)
        w_hh = jax.random.uniform(k2, (3 * hid_dim, hid_dim), jnp.float32, -bound, bound)
        b_ih = jax.random.uniform(k3, (3 * hid_dim,), jnp.float32, -bound, bound)
        b_hh = jax.random.uniform(k4, (3 * hid_dim,), jnp.float32, -bound, bound)
        params.append((w_ih, w_hh, b_ih, b_hh))
    return params


def _gru_reference(x_btd, params):
    """Pure-JAX reference (lax.scan) on the unpadded PyTorch-shaped params."""
    def layer(x_tbd, w_ih, w_hh, b_ih, b_hh):
        H = w_hh.shape[0] // 3
        wih_t, whh_t = w_ih.T, w_hh.T

        def step(h, x_t):
            gi = x_t @ wih_t + b_ih
            gh = h @ whh_t + b_hh
            r = jax.nn.sigmoid(gi[:, :H] + gh[:, :H])
            z = jax.nn.sigmoid(gi[:, H:2 * H] + gh[:, H:2 * H])
            n = jnp.tanh(gi[:, 2 * H:] + r * gh[:, 2 * H:])
            h_new = (1.0 - z) * n + z * h
            return h_new, h_new

        h0 = jnp.zeros((x_tbd.shape[1], H), x_tbd.dtype)
        _, ys = jax.lax.scan(step, h0, x_tbd)
        return ys

    h = jnp.transpose(x_btd, (1, 0, 2))
    for (w_ih, w_hh, b_ih, b_hh) in params:
        h = layer(h, w_ih, w_hh, b_ih, b_hh)
    return jnp.transpose(h, (1, 0, 2))


if __name__ == "__main__":
    # RNNDecoder(in_dim=16, hid_dim=32, n_layers=2, dropout=0.1) -- eval mode.
    B, T, IN_DIM, HID_DIM, N_LAYERS = 2, 8, 16, 32, 2

    key = jax.random.PRNGKey(0)
    key, xk = jax.random.split(key)
    x = jax.random.normal(xk, (B, T, IN_DIM), jnp.float32)

    params = init_gru_params(key, IN_DIM, HID_DIM, N_LAYERS)
    prepared = prepare_gru_params(params, HID_DIM)   # once, outside the forward

    out = rnn_decoder_forward(x, prepared, hid_dim=HID_DIM, tt=8)
    out = jax.block_until_ready(out)
    assert out.shape == (B, T, HID_DIM), out.shape

    ref = jax.block_until_ready(_gru_reference(x, params))
    err = float(jnp.max(jnp.abs(out - ref)))
    assert err < 1e-3, f"max abs error vs reference: {err}"

    print("KERNEL_OK")
</pallas_src>

<mosaic_0001>
module attributes {stable_mosaic.version = 11 : i64} {
  func.func @_gru_recurrent_kernel(%arg0: i32, %arg1: memref<8x2x384xf32, #tpu.memory_space<vmem>>, %arg2: memref<128x384xf32, #tpu.memory_space<vmem>>, %arg3: memref<1x128xf32, #tpu.memory_space<vmem>>, %arg4: memref<8x2x128xf32, #tpu.memory_space<vmem>>, %arg5: memref<2x128xf32, #tpu.memory_space<vmem>>) attributes {dimension_semantics = [#tpu.dimension_semantics<arbitrary>], iteration_bounds = array<i64: 1>, scalar_prefetch = 0 : i64, scratch_operands = 1 : i64, tpu.core_type = #tpu.core_type<tc>, window_params = [{transform_indices = @transform_0, window_bounds = array<i64: 8, 2, 384>}, {pipeline_mode = #tpu.pipeline_mode<synchronous>, transform_indices = @transform_1, window_bounds = array<i64: 128, 384>}, {pipeline_mode = #tpu.pipeline_mode<synchronous>, transform_indices = @transform_2, window_bounds = array<i64: 1, 128>}, {transform_indices = @transform_3, window_bounds = array<i64: 8, 2, 128>}]} {
    %c0_i32 = arith.constant 0 : i32
    %0 = arith.cmpi eq, %arg0, %c0_i32 : i32
    %1 = arith.extui %0 : i1 to i32
    %c0_i32_0 = arith.constant 0 : i32
    %2 = arith.cmpi ne, %1, %c0_i32_0 : i32
    scf.if %2 {
      %cst_72 = arith.constant 0.000000e+00 : f32
      %295 = vector.broadcast %cst_72 : f32 to vector<2x128xf32>
      %c0_73 = arith.constant 0 : index
      %c0_74 = arith.constant 0 : index
      %296 = vector.load %arg5[%c0_73, %c0_74] : memref<2x128xf32, #tpu.memory_space<vmem>>, vector<2x128xf32>
      tpu.vector_store %arg5[%c0_73, %c0_74], %295 {strides = array<i32>} : memref<2x128xf32, #tpu.memory_space<vmem>>, vector<2x128xf32>,
    } else {
    }
    %c0 = arith.constant 0 : index
    %c0_1 = arith.constant 0 : index
    %3 = vector.load %arg2[%c0, %c0_1] : memref<128x384xf32, #tpu.memory_space<vmem>>, vector<128x384xf32>
    %c0_2 = arith.constant 0 : index
    %c0_3 = arith.constant 0 : index
    %4 = vector.load %arg3[%c0_2, %c0_3] : memref<1x128xf32, #tpu.memory_space<vmem>>, vector<1x128xf32>
    %c0_4 = arith.constant 0 : index
    %c0_5 = arith.constant 0 : index
    %5 = vector.load %arg5[%c0_4, %c0_5] : memref<2x128xf32, #tpu.memory_space<vmem>>, vector<2x128xf32>
    %c0_i32_6 = arith.constant 0 : i32
    %6 = arith.index_cast %c0_i32_6 : i32 to index
    %c0_7 = arith.constant 0 : index
    %c0_8 = arith.constant 0 : index
    %7 = vector.load %arg1[%6, %c0_7, %c0_8] : memref<8x2x384xf32, #tpu.memory_space<vmem>>, vector<1x2x384xf32>
    %8 = vector.shape_cast %7 : vector<1x2x384xf32> to vector<2x384xf32>
    %cst = arith.constant dense<0.000000e+00> : vector<2x384xf32>
    %9 = tpu.matmul %5, %3, %cst {dimension_numbers = #tpu.dot_dimension_numbers<[1], [0], [0], [1], [0, 0, 1, 1], [], []>} : vector<2x128xf32>, vector<128x384xf32>, vector<2x384xf32> -> vector<2x384xf32>
    %10 = vector.extract_strided_slice %8 {offsets = [0, 0], sizes = [2, 128], strides = [1, 1]} : vector<2x384xf32> to vector<2x128xf32>
    %11 = vector.extract_strided_slice %9 {offsets = [0, 0], sizes = [2, 128], strides = [1, 1]} : vector<2x384xf32> to vector<2x128xf32>
    %12 = arith.addf %10, %11 : vector<2x128xf32>
    %13 = arith.negf %12 : vector<2x128xf32>
    %14 = math.exp %13 : vector<2x128xf32>
    %cst_9 = arith.constant 1.000000e+00 : f32
    %15 = vector.broadcast %cst_9 : f32 to vector<2x128xf32>
    %16 = arith.addf %15, %14 : vector<2x128xf32>
    %17 = arith.divf %15, %16 : vector<2x128xf32>
    %18 = vector.extract_strided_slice %8 {offsets = [0, 128], sizes = [2, 128], strides = [1, 1]} : vector<2x384xf32> to vector<2x128xf32>
    %19 = vector.extract_strided_slice %9 {offsets = [0, 128], sizes = [2, 128], strides = [1, 1]} : vector<2x384xf32> to vector<2x128xf32>
    %20 = arith.addf %18, %19 : vector<2x128xf32>
    %21 = arith.negf %20 : vector<2x128xf32>
    %22 = math.exp %21 : vector<2x128xf32>
    %cst_10 = arith.constant 1.000000e+00 : f32
    %23 = vector.broadcast %cst_10 : f32 to vector<2x128xf32>
    %24 = arith.addf %23, %22 : vector<2x128xf32>
    %25 = arith.divf %23, %24 : vector<2x128xf32>
    %26 = vector.extract_strided_slice %8 {offsets = [0, 256], sizes = [2, 128], strides = [1, 1]} : vector<2x384xf32> to vector<2x128xf32>
    %27 = vector.extract_strided_slice %9 {offsets = [0, 256], sizes = [2, 128], strides = [1, 1]} : vector<2x384xf32> to vector<2x128xf32>
    %28 = vector.broadcast %4 : vector<1x128xf32> to vector<2x128xf32>
    %29 = arith.addf %27, %28 : vector<2x128xf32>
    %30 = arith.mulf %17, %29 : vector<2x128xf32>
    %31 = arith.addf %26, %30 : vector<2x128xf32>
    %32 = math.tanh %31 : vector<2x128xf32>
    %cst_11 = arith.constant 1.000000e+00 : f32
    %33 = vector.broadcast %cst_11 : f32 to vector<2x128xf32>
    %34 = arith.subf %33, %25 : vector<2x128xf32>
    %35 = arith.mulf %34, %32 : vector<2x128xf32>
    %36 = arith.mulf %25, %5 : vector<2x128xf32>
    %37 = arith.addf %35, %36 : vector<2x128xf32>
    %38 = arith.index_cast %c0_i32_6 : i32 to index
    %c0_12 = arith.constant 0 : index
    %c0_13 = arith.constant 0 : index
    %39 = vector.load %arg4[%38, %c0_12, %c0_13] : memref<8x2x128xf32, #tpu.memory_space<vmem>>, vector<1x2x128xf32>
    %40 = vector.shape_cast %39 : vector<1x2x128xf32> to vector<2x128xf32>
    %41 = vector.shape_cast %37 : vector<2x128xf32> to vector<1x2x128xf32>
    tpu.vector_store %arg4[%38, %c0_12, %c0_13], %41 {strides = array<i32>} : memref<8x2x128xf32, #tpu.memory_space<vmem>>, vector<1x2x128xf32>,
    %c1_i32 = arith.constant 1 : i32
    %42 = arith.index_cast %c1_i32 : i32 to index
    %c0_14 = arith.constant 0 : index
    %c0_15 = arith.constant 0 : index
    %43 = vector.load %arg1[%42, %c0_14, %c0_15] : memref<8x2x384xf32, #tpu.memory_space<vmem>>, vector<1x2x384xf32>
    %44 = vector.shape_cast %43 : vector<1x2x384xf32> to vector<2x384xf32>
    %cst_16 = arith.constant dense<0.000000e+00> : vector<2x384xf32>
    %45 = tpu.matmul %37, %3, %cst_16 {dimension_numbers = #tpu.dot_dimension_numbers<[1], [0], [0], [1], [0, 0, 1, 1], [], []>} : vector<2x128xf32>, vector<128x384xf32>, vector<2x384xf32> -> vector<2x384xf32>
    %46 = vector.extract_strided_slice %44 {offsets = [0, 0], sizes = [2, 128], strides = [1, 1]} : vector<2x384xf32> to vector<2x128xf32>
    %47 = vector.extract_strided_slice %45 {offsets = [0, 0], sizes = [2, 128], strides = [1, 1]} : vector<2x384xf32> to vector<2x128xf32>
    %48 = arith.addf %46, %47 : vector<2x128xf32>
    %49 = arith.negf %48 : vector<2x128xf32>
    %50 = math.exp %49 : vector<2x128xf32>
    %cst_17 = arith.constant 1.000000e+00 : f32
    %51 = vector.broadcast %cst_17 : f32 to vector<2x128xf32>
    %52 = arith.addf %51, %50 : vector<2x128xf32>
    %53 = arith.divf %51, %52 : vector<2x128xf32>
    %54 = vector.extract_strided_slice %44 {offsets = [0, 128], sizes = [2, 128], strides = [1, 1]} : vector<2x384xf32> to vector<2x128xf32>
    %55 = vector.extract_strided_slice %45 {offsets = [0, 128], sizes = [2, 128], strides = [1, 1]} : vector<2x384xf32> to vector<2x128xf32>
    %56 = arith.addf %54, %55 : vector<2x128xf32>
    %57 = arith.negf %56 : vector<2x128xf32>
    %58 = math.exp %57 : vector<2x128xf32>
    %cst_18 = arith.constant 1.000000e+00 : f32
    %59 = vector.broadcast %cst_18 : f32 to vector<2x128xf32>
    %60 = arith.addf %59, %58 : vector<2x128xf32>
    %61 = arith.divf %59, %60 : vector<2x128xf32>
    %62 = vector.extract_strided_slice %44 {offsets = [0, 256], sizes = [2, 128], strides = [1, 1]} : vector<2x384xf32> to vector<2x128xf32>
    %63 = vector.extract_strided_slice %45 {offsets = [0, 256], sizes = [2, 128], strides = [1, 1]} : vector<2x384xf32> to vector<2x128xf32>
    %64 = vector.broadcast %4 : vector<1x128xf32> to vector<2x128xf32>
    %65 = arith.addf %63, %64 : vector<2x128xf32>
    %66 = arith.mulf %53, %65 : vector<2x128xf32>
    %67 = arith.addf %62, %66 : vector<2x128xf32>
    %68 = math.tanh %67 : vector<2x128xf32>
    %cst_19 = arith.constant 1.000000e+00 : f32
    %69 = vector.broadcast %cst_19 : f32 to vector<2x128xf32>
    %70 = arith.subf %69, %61 : vector<2x128xf32>
    %71 = arith.mulf %70, %68 : vector<2x128xf32>
    %72 = arith.mulf %61, %37 : vector<2x128xf32>
    %73 = arith.addf %71, %72 : vector<2x128xf32>
    %74 = arith.index_cast %c1_i32 : i32 to index
    %c0_20 = arith.constant 0 : index
    %c0_21 = arith.constant 0 : index
    %75 = vector.load %arg4[%74, %c0_20, %c0_21] : memref<8x2x128xf32, #tpu.memory_space<vmem>>, vector<1x2x128xf32>
    %76 = vector.shape_cast %75 : vector<1x2x128xf32> to vector<2x128xf32>
    %77 = vector.shape_cast %73 : vector<2x128xf32> to vector<1x2x128xf32>
    tpu.vector_store %arg4[%74, %c0_20, %c0_21], %77 {strides = array<i32>} : memref<8x2x128xf32, #tpu.memory_space<vmem>>, vector<1x2x128xf32>,
    %c2_i32 = arith.constant 2 : i32
    %78 = arith.index_cast %c2_i32 : i32 to index
    %c0_22 = arith.constant 0 : index
    %c0_23 = arith.constant 0 : index
    %79 = vector.load %arg1[%78, %c0_22, %c0_23] : memref<8x2x384xf32, #tpu.memory_space<vmem>>, vector<1x2x384xf32>
    %80 = vector.shape_cast %79 : vector<1x2x384xf32> to vector<2x384xf32>
    %cst_24 = arith.constant dense<0.000000e+00> : vector<2x384xf32>
    %81 = tpu.matmul %73, %3, %cst_24 {dimension_numbers = #tpu.dot_dimension_numbers<[1], [0], [0], [1], [0, 0, 1, 1], [], []>} : vector<2x128xf32>, vector<128x384xf32>, vector<2x384xf32> -> vector<2x384xf32>
    %82 = vector.extract_strided_slice %80 {offsets = [0, 0], sizes = [2, 128], strides = [1, 1]} : vector<2x384xf32> to vector<2x128xf32>
    %83 = vector.extract_strided_slice %81 {offsets = [0, 0], sizes = [2, 128], strides = [1, 1]} : vector<2x384xf32> to vector<2x128xf32>
    %84 = arith.addf %82, %83 : vector<2x128xf32>
    %85 = arith.negf %84 : vector<2x128xf32>
    %86 = math.exp %85 : vector<2x128xf32>
    %cst_25 = arith.constant 1.000000e+00 : f32
    %87 = vector.broadcast %cst_25 : f32 to vector<2x128xf32>
    %88 = arith.addf %87, %86 : vector<2x128xf32>
    %89 = arith.divf %87, %88 : vector<2x128xf32>
    %90 = vector.extract_strided_slice %80 {offsets = [0, 128], sizes = [2, 128], strides = [1, 1]} : vector<2x384xf32> to vector<2x128xf32>
    %91 = vector.extract_strided_slice %81 {offsets = [0, 128], sizes = [2, 128], strides = [1, 1]} : vector<2x384xf32> to vector<2x128xf32>
    %92 = arith.addf %90, %91 : vector<2x128xf32>
    %93 = arith.negf %92 : vector<2x128xf32>
    %94 = math.exp %93 : vector<2x128xf32>
    %cst_26 = arith.constant 1.000000e+00 : f32
    %95 = vector.broadcast %cst_26 : f32 to vector<2x128xf32>
    %96 = arith.addf %95, %94 : vector<2x128xf32>
    %97 = arith.divf %95, %96 : vector<2x128xf32>
    %98 = vector.extract_strided_slice %80 {offsets = [0, 256], sizes = [2, 128], strides = [1, 1]} : vector<2x384xf32> to vector<2x128xf32>
    %99 = vector.extract_strided_slice %81 {offsets = [0, 256], sizes = [2, 128], strides = [1, 1]} : vector<2x384xf32> to vector<2x128xf32>
    %100 = vector.broadcast %4 : vector<1x128xf32> to vector<2x128xf32>
    %101 = arith.addf %99, %100 : vector<2x128xf32>
    %102 = arith.mulf %89, %101 : vector<2x128xf32>
    %103 = arith.addf %98, %102 : vector<2x128xf32>
    %104 = math.tanh %103 : vector<2x128xf32>
    %cst_27 = arith.constant 1.000000e+00 : f32
    %105 = vector.broadcast %cst_27 : f32 to vector<2x128xf32>
    %106 = arith.subf %105, %97 : vector<2x128xf32>
    %107 = arith.mulf %106, %104 : vector<2x128xf32>
    %108 = arith.mulf %97, %73 : vector<2x128xf32>
    %109 = arith.addf %107, %108 : vector<2x128xf32>
    %110 = arith.index_cast %c2_i32 : i32 to index
    %c0_28 = arith.constant 0 : index
    %c0_29 = arith.constant 0 : index
    %111 = vector.load %arg4[%110, %c0_28, %c0_29] : memref<8x2x128xf32, #tpu.memory_space<vmem>>, vector<1x2x128xf32>
    %112 = vector.shape_cast %111 : vector<1x2x128xf32> to vector<2x128xf32>
    %113 = vector.shape_cast %109 : vector<2x128xf32> to vector<1x2x128xf32>
    tpu.vector_store %arg4[%110, %c0_28, %c0_29], %113 {strides = array<i32>} : memref<8x2x128xf32, #tpu.memory_space<vmem>>, vector<1x2x128xf32>,
    %c3_i32 = arith.constant 3 : i32
    %114 = arith.index_cast %c3_i32 : i32 to index
    %c0_30 = arith.constant 0 : index
    %c0_31 = arith.constant 0 : index
    %115 = vector.load %arg1[%114, %c0_30, %c0_31] : memref<8x2x384xf32, #tpu.memory_space<vmem>>, vector<1x2x384xf32>
    %116 = vector.shape_cast %115 : vector<1x2x384xf32> to vector<2x384xf32>
    %cst_32 = arith.constant dense<0.000000e+00> : vector<2x384xf32>
    %117 = tpu.matmul %109, %3, %cst_32 {dimension_numbers = #tpu.dot_dimension_numbers<[1], [0], [0], [1], [0, 0, 1, 1], [], []>} : vector<2x128xf32>, vector<128x384xf32>, vector<2x384xf32> -> vector<2x384xf32>
    %118 = vector.extract_strided_slice %116 {offsets = [0, 0], sizes = [2, 128], strides = [1, 1]} : vector<2x384xf32> to vector<2x128xf32>
    %119 = vector.extract_strided_slice %117 {offsets = [0, 0], sizes = [2, 128], strides = [1, 1]} : vector<2x384xf32> to vector<2x128xf32>
    %120 = arith.addf %118, %119 : vector<2x128xf32>
    %121 = arith.negf %120 : vector<2x128xf32>
    %122 = math.exp %121 : vector<2x128xf32>
    %cst_33 = arith.constant 1.000000e+00 : f32
    %123 = vector.broadcast %cst_33 : f32 to vector<2x128xf32>
    %124 = arith.addf %123, %122 : vector<2x128xf32>
    %125 = arith.divf %123, %124 : vector<2x128xf32>
    %126 = vector.extract_strided_slice %116 {offsets = [0, 128], sizes = [2, 128], strides = [1, 1]} : vector<2x384xf32> to vector<2x128xf32>
    %127 = vector.extract_strided_slice %117 {offsets = [0, 128], sizes = [2, 128], strides = [1, 1]} : vector<2x384xf32> to vector<2x128xf32>
    %128 = arith.addf %126, %127 : vector<2x128xf32>
    %129 = arith.negf %128 : vector<2x128xf32>
    %130 = math.exp %129 : vector<2x128xf32>
    %cst_34 = arith.constant 1.000000e+00 : f32
    %131 = vector.broadcast %cst_34 : f32 to vector<2x128xf32>
    %132 = arith.addf %131, %130 : vector<2x128xf32>
    %133 = arith.divf %131, %132 : vector<2x128xf32>
    %134 = vector.extract_strided_slice %116 {offsets = [0, 256], sizes = [2, 128], strides = [1, 1]} : vector<2x384xf32> to vector<2x128xf32>
    %135 = vector.extract_strided_slice %117 {offsets = [0, 256], sizes = [2, 128], strides = [1, 1]} : vector<2x384xf32> to vector<2x128xf32>
    %136 = vector.broadcast %4 : vector<1x128xf32> to vector<2x128xf32>
    %137 = arith.addf %135, %136 : vector<2x128xf32>
    %138 = arith.mulf %125, %137 : vector<2x128xf32>
    %139 = arith.addf %134, %138 : vector<2x128xf32>
    %140 = math.tanh %139 : vector<2x128xf32>
    %cst_35 = arith.constant 1.000000e+00 : f32
    %141 = vector.broadcast %cst_35 : f32 to vector<2x128xf32>
    %142 = arith.subf %141, %133 : vector<2x128xf32>
    %143 = arith.mulf %142, %140 : vector<2x128xf32>
    %144 = arith.mulf %133, %109 : vector<2x128xf32>
    %145 = arith.addf %143, %144 : vector<2x128xf32>
    %146 = arith.index_cast %c3_i32 : i32 to index
    %c0_36 = arith.constant 0 : index
    %c0_37 = arith.constant 0 : index
    %147 = vector.load %arg4[%146, %c0_36, %c0_37] : memref<8x2x128xf32, #tpu.memory_space<vmem>>, vector<1x2x128xf32>
    %148 = vector.shape_cast %147 : vector<1x2x128xf32> to vector<2x128xf32>
    %149 = vector.shape_cast %145 : vector<2x128xf32> to vector<1x2x128xf32>
    tpu.vector_store %arg4[%146, %c0_36, %c0_37], %149 {strides = array<i32>} : memref<8x2x128xf32, #tpu.memory_space<vmem>>, vector<1x2x128xf32>,
    %c4_i32 = arith.constant 4 : i32
    %150 = arith.index_cast %c4_i32 : i32 to index
    %c0_38 = arith.constant 0 : index
    %c0_39 = arith.constant 0 : index
    %151 = vector.load %arg1[%150, %c0_38, %c0_39] : memref<8x2x384xf32, #tpu.memory_space<vmem>>, vector<1x2x384xf32>
    %152 = vector.shape_cast %151 : vector<1x2x384xf32> to vector<2x384xf32>
    %cst_40 = arith.constant dense<0.000000e+00> : vector<2x384xf32>
    %153 = tpu.matmul %145, %3, %cst_40 {dimension_numbers = #tpu.dot_dimension_numbers<[1], [0], [0], [1], [0, 0, 1, 1], [], []>} : vector<2x128xf32>, vector<128x384xf32>, vector<2x384xf32> -> vector<2x384xf32>
    %154 = vector.extract_strided_slice %152 {offsets = [0, 0], sizes = [2, 128], strides = [1, 1]} : vector<2x384xf32> to vector<2x128xf32>
    %155 = vector.extract_strided_slice %153 {offsets = [0, 0], sizes = [2, 128], strides = [1, 1]} : vector<2x384xf32> to vector<2x128xf32>
    %156 = arith.addf %154, %155 : vector<2x128xf32>
    %157 = arith.negf %156 : vector<2x128xf32>
    %158 = math.exp %157 : vector<2x128xf32>
    %cst_41 = arith.constant 1.000000e+00 : f32
    %159 = vector.broadcast %cst_41 : f32 to vector<2x128xf32>
    %160 = arith.addf %159, %158 : vector<2x128xf32>
    %161 = arith.divf %159, %160 : vector<2x128xf32>
    %162 = vector.extract_strided_slice %152 {offsets = [0, 128], sizes = [2, 128], strides = [1, 1]} : vector<2x384xf32> to vector<2x128xf32>
    %163 = vector.extract_strided_slice %153 {offsets = [0, 128], sizes = [2, 128], strides = [1, 1]} : vector<2x384xf32> to vector<2x128xf32>
    %164 = arith.addf %162, %163 : vector<2x128xf32>
    %165 = arith.negf %164 : vector<2x128xf32>
    %166 = math.exp %165 : vector<2x128xf32>
    %cst_42 = arith.constant 1.000000e+00 : f32
    %167 = vector.broadcast %cst_42 : f32 to vector<2x128xf32>
    %168 = arith.addf %167, %166 : vector<2x128xf32>
    %169 = arith.divf %167, %168 : vector<2x128xf32>
    %170 = vector.extract_strided_slice %152 {offsets = [0, 256], sizes = [2, 128], strides = [1, 1]} : vector<2x384xf32> to vector<2x128xf32>
    %171 = vector.extract_strided_slice %153 {offsets = [0, 256], sizes = [2, 128], strides = [1, 1]} : vector<2x384xf32> to vector<2x128xf32>
    %172 = vector.broadcast %4 : vector<1x128xf32> to vector<2x128xf32>
    %173 = arith.addf %171, %172 : vector<2x128xf32>
    %174 = arith.mulf %161, %173 : vector<2x128xf32>
    %175 = arith.addf %170, %174 : vector<2x128xf32>
    %176 = math.tanh %175 : vector<2x128xf32>
    %cst_43 = arith.constant 1.000000e+00 : f32
    %177 = vector.broadcast %cst_43 : f32 to vector<2x128xf32>
    %178 = arith.subf %177, %169 : vector<2x128xf32>
    %179 = arith.mulf %178, %176 : vector<2x128xf32>
    %180 = arith.mulf %169, %145 : vector<2x128xf32>
    %181 = arith.addf %179, %180 : vector<2x128xf32>
    %182 = arith.index_cast %c4_i32 : i32 to index
    %c0_44 = arith.constant 0 : index
    %c0_45 = arith.constant 0 : index
    %183 = vector.load %arg4[%182, %c0_44, %c0_45] : memref<8x2x128xf32, #tpu.memory_space<vmem>>, vector<1x2x128xf32>
    %184 = vector.shape_cast %183 : vector<1x2x128xf32> to vector<2x128xf32>
    %185 = vector.shape_cast %181 : vector<2x128xf32> to vector<1x2x128xf32>
    tpu.vector_store %arg4[%182, %c0_44, %c0_45], %185 {strides = array<i32>} : memref<8x2x128xf32, #tpu.memory_space<vmem>>, vector<1x2x128xf32>,
    %c5_i32 = arith.constant 5 : i32
    %186 = arith.index_cast %c5_i32 : i32 to index
    %c0_46 = arith.constant 0 : index
    %c0_47 = arith.constant 0 : index
    %187 = vector.load %arg1[%186, %c0_46, %c0_47] : memref<8x2x384xf32, #tpu.memory_space<vmem>>, vector<1x2x384xf32>
    %188 = vector.shape_cast %187 : vector<1x2x384xf32> to vector<2x384xf32>
    %cst_48 = arith.constant dense<0.000000e+00> : vector<2x384xf32>
    %189 = tpu.matmul %181, %3, %cst_48 {dimension_numbers = #tpu.dot_dimension_numbers<[1], [0], [0], [1], [0, 0, 1, 1], [], []>} : vector<2x128xf32>, vector<128x384xf32>, vector<2x384xf32> -> vector<2x384xf32>
    %190 = vector.extract_strided_slice %188 {offsets = [0, 0], sizes = [2, 128], strides = [1, 1]} : vector<2x384xf32> to vector<2x128xf32>
    %191 = vector.extract_strided_slice %189 {offsets = [0, 0], sizes = [2, 128], strides = [1, 1]} : vector<2x384xf32> to vector<2x128xf32>
    %192 = arith.addf %190, %191 : vector<2x128xf32>
    %193 = arith.negf %192 : vector<2x128xf32>
    %194 = math.exp %193 : vector<2x128xf32>
    %cst_49 = arith.constant 1.000000e+00 : f32
    %195 = vector.broadcast %cst_49 : f32 to vector<2x128xf32>
    %196 = arith.addf %195, %194 : vector<2x128xf32>
    %197 = arith.divf %195, %196 : vector<2x128xf32>
    %198 = vector.extract_strided_slice %188 {offsets = [0, 128], sizes = [2, 128], strides = [1, 1]} : vector<2x384xf32> to vector<2x128xf32>
    %199 = vector.extract_strided_slice %189 {offsets = [0, 128], sizes = [2, 128], strides = [1, 1]} : vector<2x384xf32> to vector<2x128xf32>
    %200 = arith.addf %198, %199 : vector<2x128xf32>
    %201 = arith.negf %200 : vector<2x128xf32>
    %202 = math.exp %201 : vector<2x128xf32>
    %cst_50 = arith.constant 1.000000e+00 : f32
    %203 = vector.broadcast %cst_50 : f32 to vector<2x128xf32>
    %204 = arith.addf %203, %202 : vector<2x128xf32>
    %205 = arith.divf %203, %204 : vector<2x128xf32>
    %206 = vector.extract_strided_slice %188 {offsets = [0, 256], sizes = [2, 128], strides = [1, 1]} : vector<2x384xf32> to vector<2x128xf32>
    %207 = vector.extract_strided_slice %189 {offsets = [0, 256], sizes = [2, 128], strides = [1, 1]} : vector<2x384xf32> to vector<2x128xf32>
    %208 = vector.broadcast %4 : vector<1x128xf32> to vector<2x128xf32>
    %209 = arith.addf %207, %208 : vector<2x128xf32>
    %210 = arith.mulf %197, %209 : vector<2x128xf32>
    %211 = arith.addf %206, %210 : vector<2x128xf32>
    %212 = math.tanh %211 : vector<2x128xf32>
    %cst_51 = arith.constant 1.000000e+00 : f32
    %213 = vector.broadcast %cst_51 : f32 to vector<2x128xf32>
    %214 = arith.subf %213, %205 : vector<2x128xf32>
    %215 = arith.mulf %214, %212 : vector<2x128xf32>
    %216 = arith.mulf %205, %181 : vector<2x128xf32>
    %217 = arith.addf %215, %216 : vector<2x128xf32>
    %218 = arith.index_cast %c5_i32 : i32 to index
    %c0_52 = arith.constant 0 : index
    %c0_53 = arith.constant 0 : index
    %219 = vector.load %arg4[%218, %c0_52, %c0_53] : memref<8x2x128xf32, #tpu.memory_space<vmem>>, vector<1x2x128xf32>
    %220 = vector.shape_cast %219 : vector<1x2x128xf32> to vector<2x128xf32>
    %221 = vector.shape_cast %217 : vector<2x128xf32> to vector<1x2x128xf32>
    tpu.vector_store %arg4[%218, %c0_52, %c0_53], %221 {strides = array<i32>} : memref<8x2x128xf32, #tpu.memory_space<vmem>>, vector<1x2x128xf32>,
    %c6_i32 = arith.constant 6 : i32
    %222 = arith.index_cast %c6_i32 : i32 to index
    %c0_54 = arith.constant 0 : index
    %c0_55 = arith.constant 0 : index
    %223 = vector.load %arg1[%222, %c0_54, %c0_55] : memref<8x2x384xf32, #tpu.memory_space<vmem>>, vector<1x2x384xf32>
    %224 = vector.shape_cast %223 : vector<1x2x384xf32> to vector<2x384xf32>
    %cst_56 = arith.constant dense<0.000000e+00> : vector<2x384xf32>
    %225 = tpu.matmul %217, %3, %cst_56 {dimension_numbers = #tpu.dot_dimension_numbers<[1], [0], [0], [1], [0, 0, 1, 1], [], []>} : vector<2x128xf32>, vector<128x384xf32>, vector<2x384xf32> -> vector<2x384xf32>
    %226 = vector.extract_strided_slice %224 {offsets = [0, 0], sizes = [2, 128], strides = [1, 1]} : vector<2x384xf32> to vector<2x128xf32>
    %227 = vector.extract_strided_slice %225 {offsets = [0, 0], sizes = [2, 128], strides = [1, 1]} : vector<2x384xf32> to vector<2x128xf32>
    %228 = arith.addf %226, %227 : vector<2x128xf32>
    %229 = arith.negf %228 : vector<2x128xf32>
    %230 = math.exp %229 : vector<2x128xf32>
    %cst_57 = arith.constant 1.000000e+00 : f32
    %231 = vector.broadcast %cst_57 : f32 to vector<2x128xf32>
    %232 = arith.addf %231, %230 : vector<2x128xf32>
    %233 = arith.divf %231, %232 : vector<2x128xf32>
    %234 = vector.extract_strided_slice %224 {offsets = [0, 128], sizes = [2, 128], strides = [1, 1]} : vector<2x384xf32> to vector<2x128xf32>
    %235 = vector.extract_strided_slice %225 {offsets = [0, 128], sizes = [2, 128], strides = [1, 1]} : vector<2x384xf32> to vector<2x128xf32>
    %236 = arith.addf %234, %235 : vector<2x128xf32>
    %237 = arith.negf %236 : vector<2x128xf32>
    %238 = math.exp %237 : vector<2x128xf32>
    %cst_58 = arith.constant 1.000000e+00 : f32
    %239 = vector.broadcast %cst_58 : f32 to vector<2x128xf32>
    %240 = arith.addf %239, %238 : vector<2x128xf32>
    %241 = arith.divf %239, %240 : vector<2x128xf32>
    %242 = vector.extract_strided_slice %224 {offsets = [0, 256], sizes = [2, 128], strides = [1, 1]} : vector<2x384xf32> to vector<2x128xf32>
    %243 = vector.extract_strided_slice %225 {offsets = [0, 256], sizes = [2, 128], strides = [1, 1]} : vector<2x384xf32> to vector<2x128xf32>
    %244 = vector.broadcast %4 : vector<1x128xf32> to vector<2x128xf32>
    %245 = arith.addf %243, %244 : vector<2x128xf32>
    %246 = arith.mulf %233, %245 : vector<2x128xf32>
    %247 = arith.addf %242, %246 : vector<2x128xf32>
    %248 = math.tanh %247 : vector<2x128xf32>
    %cst_59 = arith.constant 1.000000e+00 : f32
    %249 = vector.broadcast %cst_59 : f32 to vector<2x128xf32>
    %250 = arith.subf %249, %241 : vector<2x128xf32>
    %251 = arith.mulf %250, %248 : vector<2x128xf32>
    %252 = arith.mulf %241, %217 : vector<2x128xf32>
    %253 = arith.addf %251, %252 : vector<2x128xf32>
    %254 = arith.index_cast %c6_i32 : i32 to index
    %c0_60 = arith.constant 0 : index
    %c0_61 = arith.constant 0 : index
    %255 = vector.load %arg4[%254, %c0_60, %c0_61] : memref<8x2x128xf32, #tpu.memory_space<vmem>>, vector<1x2x128xf32>
    %256 = vector.shape_cast %255 : vector<1x2x128xf32> to vector<2x128xf32>
    %257 = vector.shape_cast %253 : vector<2x128xf32> to vector<1x2x128xf32>
    tpu.vector_store %arg4[%254, %c0_60, %c0_61], %257 {strides = array<i32>} : memref<8x2x128xf32, #tpu.memory_space<vmem>>, vector<1x2x128xf32>,
    %c7_i32 = arith.constant 7 : i32
    %258 = arith.index_cast %c7_i32 : i32 to index
    %c0_62 = arith.constant 0 : index
    %c0_63 = arith.constant 0 : index
    %259 = vector.load %arg1[%258, %c0_62, %c0_63] : memref<8x2x384xf32, #tpu.memory_space<vmem>>, vector<1x2x384xf32>
    %260 = vector.shape_cast %259 : vector<1x2x384xf32> to vector<2x384xf32>
    %cst_64 = arith.constant dense<0.000000e+00> : vector<2x384xf32>
    %261 = tpu.matmul %253, %3, %cst_64 {dimension_numbers = #tpu.dot_dimension_numbers<[1], [0], [0], [1], [0, 0, 1, 1], [], []>} : vector<2x128xf32>, vector<128x384xf32>, vector<2x384xf32> -> vector<2x384xf32>
    %262 = vector.extract_strided_slice %260 {offsets = [0, 0], sizes = [2, 128], strides = [1, 1]} : vector<2x384xf32> to vector<2x128xf32>
    %263 = vector.extract_strided_slice %261 {offsets = [0, 0], sizes = [2, 128], strides = [1, 1]} : vector<2x384xf32> to vector<2x128xf32>
    %264 = arith.addf %262, %263 : vector<2x128xf32>
    %265 = arith.negf %264 : vector<2x128xf32>
    %266 = math.exp %265 : vector<2x128xf32>
    %cst_65 = arith.constant 1.000000e+00 : f32
    %267 = vector.broadcast %cst_65 : f32 to vector<2x128xf32>
    %268 = arith.addf %267, %266 : vector<2x128xf32>
    %269 = arith.divf %267, %268 : vector<2x128xf32>
    %270 = vector.extract_strided_slice %260 {offsets = [0, 128], sizes = [2, 128], strides = [1, 1]} : vector<2x384xf32> to vector<2x128xf32>
    %271 = vector.extract_strided_slice %261 {offsets = [0, 128], sizes = [2, 128], strides = [1, 1]} : vector<2x384xf32> to vector<2x128xf32>
    %272 = arith.addf %270, %271 : vector<2x128xf32>
    %273 = arith.negf %272 : vector<2x128xf32>
    %274 = math.exp %273 : vector<2x128xf32>
    %cst_66 = arith.constant 1.000000e+00 : f32
    %275 = vector.broadcast %cst_66 : f32 to vector<2x128xf32>
    %276 = arith.addf %275, %274 : vector<2x128xf32>
    %277 = arith.divf %275, %276 : vector<2x128xf32>
    %278 = vector.extract_strided_slice %260 {offsets = [0, 256], sizes = [2, 128], strides = [1, 1]} : vector<2x384xf32> to vector<2x128xf32>
    %279 = vector.extract_strided_slice %261 {offsets = [0, 256], sizes = [2, 128], strides = [1, 1]} : vector<2x384xf32> to vector<2x128xf32>
    %280 = vector.broadcast %4 : vector<1x128xf32> to vector<2x128xf32>
    %281 = arith.addf %279, %280 : vector<2x128xf32>
    %282 = arith.mulf %269, %281 : vector<2x128xf32>
    %283 = arith.addf %278, %282 : vector<2x128xf32>
    %284 = math.tanh %283 : vector<2x128xf32>
    %cst_67 = arith.constant 1.000000e+00 : f32
    %285 = vector.broadcast %cst_67 : f32 to vector<2x128xf32>
    %286 = arith.subf %285, %277 : vector<2x128xf32>
    %287 = arith.mulf %286, %284 : vector<2x128xf32>
    %288 = arith.mulf %277, %253 : vector<2x128xf32>
    %289 = arith.addf %287, %288 : vector<2x128xf32>
    %290 = arith.index_cast %c7_i32 : i32 to index
    %c0_68 = arith.constant 0 : index
    %c0_69 = arith.constant 0 : index
    %291 = vector.load %arg4[%290, %c0_68, %c0_69] : memref<8x2x128xf32, #tpu.memory_space<vmem>>, vector<1x2x128xf32>
    %292 = vector.shape_cast %291 : vector<1x2x128xf32> to vector<2x128xf32>
    %293 = vector.shape_cast %289 : vector<2x128xf32> to vector<1x2x128xf32>
    tpu.vector_store %arg4[%290, %c0_68, %c0_69], %293 {strides = array<i32>} : memref<8x2x128xf32, #tpu.memory_space<vmem>>, vector<1x2x128xf32>,
    %c8_i32 = arith.constant 8 : i32
    %c0_70 = arith.constant 0 : index
    %c0_71 = arith.constant 0 : index
    %294 = vector.load %arg5[%c0_70, %c0_71] : memref<2x128xf32, #tpu.memory_space<vmem>>, vector<2x128xf32>
    tpu.vector_store %arg5[%c0_70, %c0_71], %289 {strides = array<i32>} : memref<2x128xf32, #tpu.memory_space<vmem>>, vector<2x128xf32>,
    return
  }
  func.func @transform_0(%arg0: i32) -> (i32, i32, i32) {
    %c0_i32 = arith.constant 0 : i32
    %c0_i32_0 = arith.constant 0 : i32
    %c0_i32_1 = arith.constant 0 : i32
    return %arg0, %c0_i32, %c0_i32_0 : i32, i32, i32
  }
  func.func @transform_1(%arg0: i32) -> (i32, i32) {
    %c0_i32 = arith.constant 0 : i32
    %c0_i32_0 = arith.constant 0 : i32
    %c0_i32_1 = arith.constant 0 : i32
    return %c0_i32, %c0_i32_0 : i32, i32
  }
  func.func @transform_2(%arg0: i32) -> (i32, i32) {
    %c0_i32 = arith.constant 0 : i32
    %c0_i32_0 = arith.constant 0 : i32
    %c0_i32_1 = arith.constant 0 : i32
    return %c0_i32, %c0_i32_0 : i32, i32
  }
  func.func @transform_3(%arg0: i32) -> (i32, i32, i32) {
    %c0_i32 = arith.constant 0 : i32
    %c0_i32_0 = arith.constant 0 : i32
    %c0_i32_1 = arith.constant 0 : i32
    return %arg0, %c0_i32, %c0_i32_0 : i32, i32, i32
  }
}

module attributes {stable_mosaic.version = 11 : i64} {
  func.func @_gru_recurrent_kernel(%arg0: i32, %arg1: memref<8x2x384xf32, #tpu.memory_space<vmem>>, %arg2: memref<128x384xf32, #tpu.memory_space<vmem>>, %arg3: memref<1x128xf32, #tpu.memory_space<vmem>>, %arg4: memref<8x2x128xf32, #tpu.memory_space<vmem>>, %arg5: memref<2x128xf32, #tpu.memory_space<vmem>>) attributes {dimension_semantics = [#tpu.dimension_semantics<arbitrary>], iteration_bounds = array<i64: 1>, scalar_prefetch = 0 : i64, scratch_operands = 1 : i64, tpu.core_type = #tpu.core_type<tc>, window_params = [{transform_indices = @transform_0, window_bounds = array<i64: 8, 2, 384>}, {pipeline_mode = #tpu.pipeline_mode<synchronous>, transform_indices = @transform_1, window_bounds = array<i64: 128, 384>}, {pipeline_mode = #tpu.pipeline_mode<synchronous>, transform_indices = @transform_2, window_bounds = array<i64: 1, 128>}, {transform_indices = @transform_3, window_bounds = array<i64: 8, 2, 128>}]} {
    %c0_i32 = arith.constant 0 : i32
    %0 = arith.cmpi eq, %arg0, %c0_i32 : i32
    %1 = arith.extui %0 : i1 to i32
    %c0_i32_0 = arith.constant 0 : i32
    %2 = arith.cmpi ne, %1, %c0_i32_0 : i32
    scf.if %2 {
      %cst_72 = arith.constant 0.000000e+00 : f32
      %295 = vector.broadcast %cst_72 : f32 to vector<2x128xf32>
      %c0_73 = arith.constant 0 : index
      %c0_74 = arith.constant 0 : index
      %296 = vector.load %arg5[%c0_73, %c0_74] : memref<2x128xf32, #tpu.memory_space<vmem>>, vector<2x128xf32>
      tpu.vector_store %arg5[%c0_73, %c0_74], %295 {strides = array<i32>} : memref<2x128xf32, #tpu.memory_space<vmem>>, vector<2x128xf32>,
    } else {
    }
    %c0 = arith.constant 0 : index
    %c0_1 = arith.constant 0 : index
    %3 = vector.load %arg2[%c0, %c0_1] : memref<128x384xf32, #tpu.memory_space<vmem>>, vector<128x384xf32>
    %c0_2 = arith.constant 0 : index
    %c0_3 = arith.constant 0 : index
    %4 = vector.load %arg3[%c0_2, %c0_3] : memref<1x128xf32, #tpu.memory_space<vmem>>, vector<1x128xf32>
    %c0_4 = arith.constant 0 : index
    %c0_5 = arith.constant 0 : index
    %5 = vector.load %arg5[%c0_4, %c0_5] : memref<2x128xf32, #tpu.memory_space<vmem>>, vector<2x128xf32>
    %c0_i32_6 = arith.constant 0 : i32
    %6 = arith.index_cast %c0_i32_6 : i32 to index
    %c0_7 = arith.constant 0 : index
    %c0_8 = arith.constant 0 : index
    %7 = vector.load %arg1[%6, %c0_7, %c0_8] : memref<8x2x384xf32, #tpu.memory_space<vmem>>, vector<1x2x384xf32>
    %8 = vector.shape_cast %7 : vector<1x2x384xf32> to vector<2x384xf32>
    %cst = arith.constant dense<0.000000e+00> : vector<2x384xf32>
    %9 = tpu.matmul %5, %3, %cst {dimension_numbers = #tpu.dot_dimension_numbers<[1], [0], [0], [1], [0, 0, 1, 1], [], []>} : vector<2x128xf32>, vector<128x384xf32>, vector<2x384xf32> -> vector<2x384xf32>
    %10 = vector.extract_strided_slice %8 {offsets = [0, 0], sizes = [2, 128], strides = [1, 1]} : vector<2x384xf32> to vector<2x128xf32>
    %11 = vector.extract_strided_slice %9 {offsets = [0, 0], sizes = [2, 128], strides = [1, 1]} : vector<2x384xf32> to vector<2x128xf32>
    %12 = arith.addf %10, %11 : vector<2x128xf32>
    %13 = arith.negf %12 : vector<2x128xf32>
    %14 = math.exp %13 : vector<2x128xf32>
    %cst_9 = arith.constant 1.000000e+00 : f32
    %15 = vector.broadcast %cst_9 : f32 to vector<2x128xf32>
    %16 = arith.addf %15, %14 : vector<2x128xf32>
    %17 = arith.divf %15, %16 : vector<2x128xf32>
    %18 = vector.extract_strided_slice %8 {offsets = [0, 128], sizes = [2, 128], strides = [1, 1]} : vector<2x384xf32> to vector<2x128xf32>
    %19 = vector.extract_strided_slice %9 {offsets = [0, 128], sizes = [2, 128], strides = [1, 1]} : vector<2x384xf32> to vector<2x128xf32>
    %20 = arith.addf %18, %19 : vector<2x128xf32>
    %21 = arith.negf %20 : vector<2x128xf32>
    %22 = math.exp %21 : vector<2x128xf32>
    %cst_10 = arith.constant 1.000000e+00 : f32
    %23 = vector.broadcast %cst_10 : f32 to vector<2x128xf32>
    %24 = arith.addf %23, %22 : vector<2x128xf32>
    %25 = arith.divf %23, %24 : vector<2x128xf32>
    %26 = vector.extract_strided_slice %8 {offsets = [0, 256], sizes = [2, 128], strides = [1, 1]} : vector<2x384xf32> to vector<2x128xf32>
    %27 = vector.extract_strided_slice %9 {offsets = [0, 256], sizes = [2, 128], strides = [1, 1]} : vector<2x384xf32> to vector<2x128xf32>
    %28 = vector.broadcast %4 : vector<1x128xf32> to vector<2x128xf32>
    %29 = arith.addf %27, %28 : vector<2x128xf32>
    %30 = arith.mulf %17, %29 : vector<2x128xf32>
    %31 = arith.addf %26, %30 : vector<2x128xf32>
    %32 = math.tanh %31 : vector<2x128xf32>
    %cst_11 = arith.constant 1.000000e+00 : f32
    %33 = vector.broadcast %cst_11 : f32 to vector<2x128xf32>
    %34 = arith.subf %33, %25 : vector<2x128xf32>
    %35 = arith.mulf %34, %32 : vector<2x128xf32>
    %36 = arith.mulf %25, %5 : vector<2x128xf32>
    %37 = arith.addf %35, %36 : vector<2x128xf32>
    %38 = arith.index_cast %c0_i32_6 : i32 to index
    %c0_12 = arith.constant 0 : index
    %c0_13 = arith.constant 0 : index
    %39 = vector.load %arg4[%38, %c0_12, %c0_13] : memref<8x2x128xf32, #tpu.memory_space<vmem>>, vector<1x2x128xf32>
    %40 = vector.shape_cast %39 : vector<1x2x128xf32> to vector<2x128xf32>
    %41 = vector.shape_cast %37 : vector<2x128xf32> to vector<1x2x128xf32>
    tpu.vector_store %arg4[%38, %c0_12, %c0_13], %41 {strides = array<i32>} : memref<8x2x128xf32, #tpu.memory_space<vmem>>, vector<1x2x128xf32>,
    %c1_i32 = arith.constant 1 : i32
    %42 = arith.index_cast %c1_i32 : i32 to index
    %c0_14 = arith.constant 0 : index
    %c0_15 = arith.constant 0 : index
    %43 = vector.load %arg1[%42, %c0_14, %c0_15] : memref<8x2x384xf32, #tpu.memory_space<vmem>>, vector<1x2x384xf32>
    %44 = vector.shape_cast %43 : vector<1x2x384xf32> to vector<2x384xf32>
    %cst_16 = arith.constant dense<0.000000e+00> : vector<2x384xf32>
    %45 = tpu.matmul %37, %3, %cst_16 {dimension_numbers = #tpu.dot_dimension_numbers<[1], [0], [0], [1], [0, 0, 1, 1], [], []>} : vector<2x128xf32>, vector<128x384xf32>, vector<2x384xf32> -> vector<2x384xf32>
    %46 = vector.extract_strided_slice %44 {offsets = [0, 0], sizes = [2, 128], strides = [1, 1]} : vector<2x384xf32> to vector<2x128xf32>
    %47 = vector.extract_strided_slice %45 {offsets = [0, 0], sizes = [2, 128], strides = [1, 1]} : vector<2x384xf32> to vector<2x128xf32>
    %48 = arith.addf %46, %47 : vector<2x128xf32>
    %49 = arith.negf %48 : vector<2x128xf32>
    %50 = math.exp %49 : vector<2x128xf32>
    %cst_17 = arith.constant 1.000000e+00 : f32
    %51 = vector.broadcast %cst_17 : f32 to vector<2x128xf32>
    %52 = arith.addf %51, %50 : vector<2x128xf32>
    %53 = arith.divf %51, %52 : vector<2x128xf32>
    %54 = vector.extract_strided_slice %44 {offsets = [0, 128], sizes = [2, 128], strides = [1, 1]} : vector<2x384xf32> to vector<2x128xf32>
    %55 = vector.extract_strided_slice %45 {offsets = [0, 128], sizes = [2, 128], strides = [1, 1]} : vector<2x384xf32> to vector<2x128xf32>
    %56 = arith.addf %54, %55 : vector<2x128xf32>
    %57 = arith.negf %56 : vector<2x128xf32>
    %58 = math.exp %57 : vector<2x128xf32>
    %cst_18 = arith.constant 1.000000e+00 : f32
    %59 = vector.broadcast %cst_18 : f32 to vector<2x128xf32>
    %60 = arith.addf %59, %58 : vector<2x128xf32>
    %61 = arith.divf %59, %60 : vector<2x128xf32>
    %62 = vector.extract_strided_slice %44 {offsets = [0, 256], sizes = [2, 128], strides = [1, 1]} : vector<2x384xf32> to vector<2x128xf32>
    %63 = vector.extract_strided_slice %45 {offsets = [0, 256], sizes = [2, 128], strides = [1, 1]} : vector<2x384xf32> to vector<2x128xf32>
    %64 = vector.broadcast %4 : vector<1x128xf32> to vector<2x128xf32>
    %65 = arith.addf %63, %64 : vector<2x128xf32>
    %66 = arith.mulf %53, %65 : vector<2x128xf32>
    %67 = arith.addf %62, %66 : vector<2x128xf32>
    %68 = math.tanh %67 : vector<2x128xf32>
    %cst_19 = arith.constant 1.000000e+00 : f32
    %69 = vector.broadcast %cst_19 : f32 to vector<2x128xf32>
    %70 = arith.subf %69, %61 : vector<2x128xf32>
    %71 = arith.mulf %70, %68 : vector<2x128xf32>
    %72 = arith.mulf %61, %37 : vector<2x128xf32>
    %73 = arith.addf %71, %72 : vector<2x128xf32>
    %74 = arith.index_cast %c1_i32 : i32 to index
    %c0_20 = arith.constant 0 : index
    %c0_21 = arith.constant 0 : index
    %75 = vector.load %arg4[%74, %c0_20, %c0_21] : memref<8x2x128xf32, #tpu.memory_space<vmem>>, vector<1x2x128xf32>
    %76 = vector.shape_cast %75 : vector<1x2x128xf32> to vector<2x128xf32>
    %77 = vector.shape_cast %73 : vector<2x128xf32> to vector<1x2x128xf32>
    tpu.vector_store %arg4[%74, %c0_20, %c0_21], %77 {strides = array<i32>} : memref<8x2x128xf32, #tpu.memory_space<vmem>>, vector<1x2x128xf32>,
    %c2_i32 = arith.constant 2 : i32
    %78 = arith.index_cast %c2_i32 : i32 to index
    %c0_22 = arith.constant 0 : index
    %c0_23 = arith.constant 0 : index
    %79 = vector.load %arg1[%78, %c0_22, %c0_23] : memref<8x2x384xf32, #tpu.memory_space<vmem>>, vector<1x2x384xf32>
    %80 = vector.shape_cast %79 : vector<1x2x384xf32> to vector<2x384xf32>
    %cst_24 = arith.constant dense<0.000000e+00> : vector<2x384xf32>
    %81 = tpu.matmul %73, %3, %cst_24 {dimension_numbers = #tpu.dot_dimension_numbers<[1], [0], [0], [1], [0, 0, 1, 1], [], []>} : vector<2x128xf32>, vector<128x384xf32>, vector<2x384xf32> -> vector<2x384xf32>
    %82 = vector.extract_strided_slice %80 {offsets = [0, 0], sizes = [2, 128], strides = [1, 1]} : vector<2x384xf32> to vector<2x128xf32>
    %83 = vector.extract_strided_slice %81 {offsets = [0, 0], sizes = [2, 128], strides = [1, 1]} : vector<2x384xf32> to vector<2x128xf32>
    %84 = arith.addf %82, %83 : vector<2x128xf32>
    %85 = arith.negf %84 : vector<2x128xf32>
    %86 = math.exp %85 : vector<2x128xf32>
    %cst_25 = arith.constant 1.000000e+00 : f32
    %87 = vector.broadcast %cst_25 : f32 to vector<2x128xf32>
    %88 = arith.addf %87, %86 : vector<2x128xf32>
    %89 = arith.divf %87, %88 : vector<2x128xf32>
    %90 = vector.extract_strided_slice %80 {offsets = [0, 128], sizes = [2, 128], strides = [1, 1]} : vector<2x384xf32> to vector<2x128xf32>
    %91 = vector.extract_strided_slice %81 {offsets = [0, 128], sizes = [2, 128], strides = [1, 1]} : vector<2x384xf32> to vector<2x128xf32>
    %92 = arith.addf %90, %91 : vector<2x128xf32>
    %93 = arith.negf %92 : vector<2x128xf32>
    %94 = math.exp %93 : vector<2x128xf32>
    %cst_26 = arith.constant 1.000000e+00 : f32
    %95 = vector.broadcast %cst_26 : f32 to vector<2x128xf32>
    %96 = arith.addf %95, %94 : vector<2x128xf32>
    %97 = arith.divf %95, %96 : vector<2x128xf32>
    %98 = vector.extract_strided_slice %80 {offsets = [0, 256], sizes = [2, 128], strides = [1, 1]} : vector<2x384xf32> to vector<2x128xf32>
    %99 = vector.extract_strided_slice %81 {offsets = [0, 256], sizes = [2, 128], strides = [1, 1]} : vector<2x384xf32> to vector<2x128xf32>
    %100 = vector.broadcast %4 : vector<1x128xf32> to vector<2x128xf32>
    %101 = arith.addf %99, %100 : vector<2x128xf32>
    %102 = arith.mulf %89, %101 : vector<2x128xf32>
    %103 = arith.addf %98, %102 : vector<2x128xf32>
    %104 = math.tanh %103 : vector<2x128xf32>
    %cst_27 = arith.constant 1.000000e+00 : f32
    %105 = vector.broadcast %cst_27 : f32 to vector<2x128xf32>
    %106 = arith.subf %105, %97 : vector<2x128xf32>
    %107 = arith.mulf %106, %104 : vector<2x128xf32>
    %108 = arith.mulf %97, %73 : vector<2x128xf32>
    %109 = arith.addf %107, %108 : vector<2x128xf32>
    %110 = arith.index_cast %c2_i32 : i32 to index
    %c0_28 = arith.constant 0 : index
    %c0_29 = arith.constant 0 : index
    %111 = vector.load %arg4[%110, %c0_28, %c0_29] : memref<8x2x128xf32, #tpu.memory_space<vmem>>, vector<1x2x128xf32>
    %112 = vector.shape_cast %111 : vector<1x2x128xf32> to vector<2x128xf32>
    %113 = vector.shape_cast %109 : vector<2x128xf32> to vector<1x2x128xf32>
    tpu.vector_store %arg4[%110, %c0_28, %c0_29], %113 {strides = array<i32>} : memref<8x2x128xf32, #tpu.memory_space<vmem>>, vector<1x2x128xf32>,
    %c3_i32 = arith.constant 3 : i32
    %114 = arith.index_cast %c3_i32 : i32 to index
    %c0_30 = arith.constant 0 : index
    %c0_31 = arith.constant 0 : index
    %115 = vector.load %arg1[%114, %c0_30, %c0_31] : memref<8x2x384xf32, #tpu.memory_space<vmem>>, vector<1x2x384xf32>
    %116 = vector.shape_cast %115 : vector<1x2x384xf32> to vector<2x384xf32>
    %cst_32 = arith.constant dense<0.000000e+00> : vector<2x384xf32>
    %117 = tpu.matmul %109, %3, %cst_32 {dimension_numbers = #tpu.dot_dimension_numbers<[1], [0], [0], [1], [0, 0, 1, 1], [], []>} : vector<2x128xf32>, vector<128x384xf32>, vector<2x384xf32> -> vector<2x384xf32>
    %118 = vector.extract_strided_slice %116 {offsets = [0, 0], sizes = [2, 128], strides = [1, 1]} : vector<2x384xf32> to vector<2x128xf32>
    %119 = vector.extract_strided_slice %117 {offsets = [0, 0], sizes = [2, 128], strides = [1, 1]} : vector<2x384xf32> to vector<2x128xf32>
    %120 = arith.addf %118, %119 : vector<2x128xf32>
    %121 = arith.negf %120 : vector<2x128xf32>
    %122 = math.exp %121 : vector<2x128xf32>
    %cst_33 = arith.constant 1.000000e+00 : f32
    %123 = vector.broadcast %cst_33 : f32 to vector<2x128xf32>
    %124 = arith.addf %123, %122 : vector<2x128xf32>
    %125 = arith.divf %123, %124 : vector<2x128xf32>
    %126 = vector.extract_strided_slice %116 {offsets = [0, 128], sizes = [2, 128], strides = [1, 1]} : vector<2x384xf32> to vector<2x128xf32>
    %127 = vector.extract_strided_slice %117 {offsets = [0, 128], sizes = [2, 128], strides = [1, 1]} : vector<2x384xf32> to vector<2x128xf32>
    %128 = arith.addf %126, %127 : vector<2x128xf32>
    %129 = arith.negf %128 : vector<2x128xf32>
    %130 = math.exp %129 : vector<2x128xf32>
    %cst_34 = arith.constant 1.000000e+00 : f32
    %131 = vector.broadcast %cst_34 : f32 to vector<2x128xf32>
    %132 = arith.addf %131, %130 : vector<2x128xf32>
    %133 = arith.divf %131, %132 : vector<2x128xf32>
    %134 = vector.extract_strided_slice %116 {offsets = [0, 256], sizes = [2, 128], strides = [1, 1]} : vector<2x384xf32> to vector<2x128xf32>
    %135 = vector.extract_strided_slice %117 {offsets = [0, 256], sizes = [2, 128], strides = [1, 1]} : vector<2x384xf32> to vector<2x128xf32>
    %136 = vector.broadcast %4 : vector<1x128xf32> to vector<2x128xf32>
    %137 = arith.addf %135, %136 : vector<2x128xf32>
    %138 = arith.mulf %125, %137 : vector<2x128xf32>
    %139 = arith.addf %134, %138 : vector<2x128xf32>
    %140 = math.tanh %139 : vector<2x128xf32>
    %cst_35 = arith.constant 1.000000e+00 : f32
    %141 = vector.broadcast %cst_35 : f32 to vector<2x128xf32>
    %142 = arith.subf %141, %133 : vector<2x128xf32>
    %143 = arith.mulf %142, %140 : vector<2x128xf32>
    %144 = arith.mulf %133, %109 : vector<2x128xf32>
    %145 = arith.addf %143, %144 : vector<2x128xf32>
    %146 = arith.index_cast %c3_i32 : i32 to index
    %c0_36 = arith.constant 0 : index
    %c0_37 = arith.constant 0 : index
    %147 = vector.load %arg4[%146, %c0_36, %c0_37] : memref<8x2x128xf32, #tpu.memory_space<vmem>>, vector<1x2x128xf32>
    %148 = vector.shape_cast %147 : vector<1x2x128xf32> to vector<2x128xf32>
    %149 = vector.shape_cast %145 : vector<2x128xf32> to vector<1x2x128xf32>
    tpu.vector_store %arg4[%146, %c0_36, %c0_37], %149 {strides = array<i32>} : memref<8x2x128xf32, #tpu.memory_space<vmem>>, vector<1x2x128xf32>,
    %c4_i32 = arith.constant 4 : i32
    %150 = arith.index_cast %c4_i32 : i32 to index
    %c0_38 = arith.constant 0 : index
    %c0_39 = arith.constant 0 : index
    %151 = vector.load %arg1[%150, %c0_38, %c0_39] : memref<8x2x384xf32, #tpu.memory_space<vmem>>, vector<1x2x384xf32>
    %152 = vector.shape_cast %151 : vector<1x2x384xf32> to vector<2x384xf32>
    %cst_40 = arith.constant dense<0.000000e+00> : vector<2x384xf32>
    %153 = tpu.matmul %145, %3, %cst_40 {dimension_numbers = #tpu.dot_dimension_numbers<[1], [0], [0], [1], [0, 0, 1, 1], [], []>} : vector<2x128xf32>, vector<128x384xf32>, vector<2x384xf32> -> vector<2x384xf32>
    %154 = vector.extract_strided_slice %152 {offsets = [0, 0], sizes = [2, 128], strides = [1, 1]} : vector<2x384xf32> to vector<2x128xf32>
    %155 = vector.extract_strided_slice %153 {offsets = [0, 0], sizes = [2, 128], strides = [1, 1]} : vector<2x384xf32> to vector<2x128xf32>
    %156 = arith.addf %154, %155 : vector<2x128xf32>
    %157 = arith.negf %156 : vector<2x128xf32>
    %158 = math.exp %157 : vector<2x128xf32>
    %cst_41 = arith.constant 1.000000e+00 : f32
    %159 = vector.broadcast %cst_41 : f32 to vector<2x128xf32>
    %160 = arith.addf %159, %158 : vector<2x128xf32>
    %161 = arith.divf %159, %160 : vector<2x128xf32>
    %162 = vector.extract_strided_slice %152 {offsets = [0, 128], sizes = [2, 128], strides = [1, 1]} : vector<2x384xf32> to vector<2x128xf32>
    %163 = vector.extract_strided_slice %153 {offsets = [0, 128], sizes = [2, 128], strides = [1, 1]} : vector<2x384xf32> to vector<2x128xf32>
    %164 = arith.addf %162, %163 : vector<2x128xf32>
    %165 = arith.negf %164 : vector<2x128xf32>
    %166 = math.exp %165 : vector<2x128xf32>
    %cst_42 = arith.constant 1.000000e+00 : f32
    %167 = vector.broadcast %cst_42 : f32 to vector<2x128xf32>
    %168 = arith.addf %167, %166 : vector<2x128xf32>
    %169 = arith.divf %167, %168 : vector<2x128xf32>
    %170 = vector.extract_strided_slice %152 {offsets = [0, 256], sizes = [2, 128], strides = [1, 1]} : vector<2x384xf32> to vector<2x128xf32>
    %171 = vector.extract_strided_slice %153 {offsets = [0, 256], sizes = [2, 128], strides = [1, 1]} : vector<2x384xf32> to vector<2x128xf32>
    %172 = vector.broadcast %4 : vector<1x128xf32> to vector<2x128xf32>
    %173 = arith.addf %171, %172 : vector<2x128xf32>
    %174 = arith.mulf %161, %173 : vector<2x128xf32>
    %175 = arith.addf %170, %174 : vector<2x128xf32>
    %176 = math.tanh %175 : vector<2x128xf32>
    %cst_43 = arith.constant 1.000000e+00 : f32
    %177 = vector.broadcast %cst_43 : f32 to vector<2x128xf32>
    %178 = arith.subf %177, %169 : vector<2x128xf32>
    %179 = arith.mulf %178, %176 : vector<2x128xf32>
    %180 = arith.mulf %169, %145 : vector<2x128xf32>
    %181 = arith.addf %179, %180 : vector<2x128xf32>
    %182 = arith.index_cast %c4_i32 : i32 to index
    %c0_44 = arith.constant 0 : index
    %c0_45 = arith.constant 0 : index
    %183 = vector.load %arg4[%182, %c0_44, %c0_45] : memref<8x2x128xf32, #tpu.memory_space<vmem>>, vector<1x2x128xf32>
    %184 = vector.shape_cast %183 : vector<1x2x128xf32> to vector<2x128xf32>
    %185 = vector.shape_cast %181 : vector<2x128xf32> to vector<1x2x128xf32>
    tpu.vector_store %arg4[%182, %c0_44, %c0_45], %185 {strides = array<i32>} : memref<8x2x128xf32, #tpu.memory_space<vmem>>, vector<1x2x128xf32>,
    %c5_i32 = arith.constant 5 : i32
    %186 = arith.index_cast %c5_i32 : i32 to index
    %c0_46 = arith.constant 0 : index
    %c0_47 = arith.constant 0 : index
    %187 = vector.load %arg1[%186, %c0_46, %c0_47] : memref<8x2x384xf32, #tpu.memory_space<vmem>>, vector<1x2x384xf32>
    %188 = vector.shape_cast %187 : vector<1x2x384xf32> to vector<2x384xf32>
    %cst_48 = arith.constant dense<0.000000e+00> : vector<2x384xf32>
    %189 = tpu.matmul %181, %3, %cst_48 {dimension_numbers = #tpu.dot_dimension_numbers<[1], [0], [0], [1], [0, 0, 1, 1], [], []>} : vector<2x128xf32>, vector<128x384xf32>, vector<2x384xf32> -> vector<2x384xf32>
    %190 = vector.extract_strided_slice %188 {offsets = [0, 0], sizes = [2, 128], strides = [1, 1]} : vector<2x384xf32> to vector<2x128xf32>
    %191 = vector.extract_strided_slice %189 {offsets = [0, 0], sizes = [2, 128], strides = [1, 1]} : vector<2x384xf32> to vector<2x128xf32>
    %192 = arith.addf %190, %191 : vector<2x128xf32>
    %193 = arith.negf %192 : vector<2x128xf32>
    %194 = math.exp %193 : vector<2x128xf32>
    %cst_49 = arith.constant 1.000000e+00 : f32
    %195 = vector.broadcast %cst_49 : f32 to vector<2x128xf32>
    %196 = arith.addf %195, %194 : vector<2x128xf32>
    %197 = arith.divf %195, %196 : vector<2x128xf32>
    %198 = vector.extract_strided_slice %188 {offsets = [0, 128], sizes = [2, 128], strides = [1, 1]} : vector<2x384xf32> to vector<2x128xf32>
    %199 = vector.extract_strided_slice %189 {offsets = [0, 128], sizes = [2, 128], strides = [1, 1]} : vector<2x384xf32> to vector<2x128xf32>
    %200 = arith.addf %198, %199 : vector<2x128xf32>
    %201 = arith.negf %200 : vector<2x128xf32>
    %202 = math.exp %201 : vector<2x128xf32>
    %cst_50 = arith.constant 1.000000e+00 : f32
    %203 = vector.broadcast %cst_50 : f32 to vector<2x128xf32>
    %204 = arith.addf %203, %202 : vector<2x128xf32>
    %205 = arith.divf %203, %204 : vector<2x128xf32>
    %206 = vector.extract_strided_slice %188 {offsets = [0, 256], sizes = [2, 128], strides = [1, 1]} : vector<2x384xf32> to vector<2x128xf32>
    %207 = vector.extract_strided_slice %189 {offsets = [0, 256], sizes = [2, 128], strides = [1, 1]} : vector<2x384xf32> to vector<2x128xf32>
    %208 = vector.broadcast %4 : vector<1x128xf32> to vector<2x128xf32>
    %209 = arith.addf %207, %208 : vector<2x128xf32>
    %210 = arith.mulf %197, %209 : vector<2x128xf32>
    %211 = arith.addf %206, %210 : vector<2x128xf32>
    %212 = math.tanh %211 : vector<2x128xf32>
    %cst_51 = arith.constant 1.000000e+00 : f32
    %213 = vector.broadcast %cst_51 : f32 to vector<2x128xf32>
    %214 = arith.subf %213, %205 : vector<2x128xf32>
    %215 = arith.mulf %214, %212 : vector<2x128xf32>
    %216 = arith.mulf %205, %181 : vector<2x128xf32>
    %217 = arith.addf %215, %216 : vector<2x128xf32>
    %218 = arith.index_cast %c5_i32 : i32 to index
    %c0_52 = arith.constant 0 : index
    %c0_53 = arith.constant 0 : index
    %219 = vector.load %arg4[%218, %c0_52, %c0_53] : memref<8x2x128xf32, #tpu.memory_space<vmem>>, vector<1x2x128xf32>
    %220 = vector.shape_cast %219 : vector<1x2x128xf32> to vector<2x128xf32>
    %221 = vector.shape_cast %217 : vector<2x128xf32> to vector<1x2x128xf32>
    tpu.vector_store %arg4[%218, %c0_52, %c0_53], %221 {strides = array<i32>} : memref<8x2x128xf32, #tpu.memory_space<vmem>>, vector<1x2x128xf32>,
    %c6_i32 = arith.constant 6 : i32
    %222 = arith.index_cast %c6_i32 : i32 to index
    %c0_54 = arith.constant 0 : index
    %c0_55 = arith.constant 0 : index
    %223 = vector.load %arg1[%222, %c0_54, %c0_55] : memref<8x2x384xf32, #tpu.memory_space<vmem>>, vector<1x2x384xf32>
    %224 = vector.shape_cast %223 : vector<1x2x384xf32> to vector<2x384xf32>
    %cst_56 = arith.constant dense<0.000000e+00> : vector<2x384xf32>
    %225 = tpu.matmul %217, %3, %cst_56 {dimension_numbers = #tpu.dot_dimension_numbers<[1], [0], [0], [1], [0, 0, 1, 1], [], []>} : vector<2x128xf32>, vector<128x384xf32>, vector<2x384xf32> -> vector<2x384xf32>
    %226 = vector.extract_strided_slice %224 {offsets = [0, 0], sizes = [2, 128], strides = [1, 1]} : vector<2x384xf32> to vector<2x128xf32>
    %227 = vector.extract_strided_slice %225 {offsets = [0, 0], sizes = [2, 128], strides = [1, 1]} : vector<2x384xf32> to vector<2x128xf32>
    %228 = arith.addf %226, %227 : vector<2x128xf32>
    %229 = arith.negf %228 : vector<2x128xf32>
    %230 = math.exp %229 : vector<2x128xf32>
    %cst_57 = arith.constant 1.000000e+00 : f32
    %231 = vector.broadcast %cst_57 : f32 to vector<2x128xf32>
    %232 = arith.addf %231, %230 : vector<2x128xf32>
    %233 = arith.divf %231, %232 : vector<2x128xf32>
    %234 = vector.extract_strided_slice %224 {offsets = [0, 128], sizes = [2, 128], strides = [1, 1]} : vector<2x384xf32> to vector<2x128xf32>
    %235 = vector.extract_strided_slice %225 {offsets = [0, 128], sizes = [2, 128], strides = [1, 1]} : vector<2x384xf32> to vector<2x128xf32>
    %236 = arith.addf %234, %235 : vector<2x128xf32>
    %237 = arith.negf %236 : vector<2x128xf32>
    %238 = math.exp %237 : vector<2x128xf32>
    %cst_58 = arith.constant 1.000000e+00 : f32
    %239 = vector.broadcast %cst_58 : f32 to vector<2x128xf32>
    %240 = arith.addf %239, %238 : vector<2x128xf32>
    %241 = arith.divf %239, %240 : vector<2x128xf32>
    %242 = vector.extract_strided_slice %224 {offsets = [0, 256], sizes = [2, 128], strides = [1, 1]} : vector<2x384xf32> to vector<2x128xf32>
    %243 = vector.extract_strided_slice %225 {offsets = [0, 256], sizes = [2, 128], strides = [1, 1]} : vector<2x384xf32> to vector<2x128xf32>
    %244 = vector.broadcast %4 : vector<1x128xf32> to vector<2x128xf32>
    %245 = arith.addf %243, %244 : vector<2x128xf32>
    %246 = arith.mulf %233, %245 : vector<2x128xf32>
    %247 = arith.addf %242, %246 : vector<2x128xf32>
    %248 = math.tanh %247 : vector<2x128xf32>
    %cst_59 = arith.constant 1.000000e+00 : f32
    %249 = vector.broadcast %cst_59 : f32 to vector<2x128xf32>
    %250 = arith.subf %249, %241 : vector<2x128xf32>
    %251 = arith.mulf %250, %248 : vector<2x128xf32>
    %252 = arith.mulf %241, %217 : vector<2x128xf32>
    %253 = arith.addf %251, %252 : vector<2x128xf32>
    %254 = arith.index_cast %c6_i32 : i32 to index
    %c0_60 = arith.constant 0 : index
    %c0_61 = arith.constant 0 : index
    %255 = vector.load %arg4[%254, %c0_60, %c0_61] : memref<8x2x128xf32, #tpu.memory_space<vmem>>, vector<1x2x128xf32>
    %256 = vector.shape_cast %255 : vector<1x2x128xf32> to vector<2x128xf32>
    %257 = vector.shape_cast %253 : vector<2x128xf32> to vector<1x2x128xf32>
    tpu.vector_store %arg4[%254, %c0_60, %c0_61], %257 {strides = array<i32>} : memref<8x2x128xf32, #tpu.memory_space<vmem>>, vector<1x2x128xf32>,
    %c7_i32 = arith.constant 7 : i32
    %258 = arith.index_cast %c7_i32 : i32 to index
    %c0_62 = arith.constant 0 : index
    %c0_63 = arith.constant 0 : index
    %259 = vector.load %arg1[%258, %c0_62, %c0_63] : memref<8x2x384xf32, #tpu.memory_space<vmem>>, vector<1x2x384xf32>
    %260 = vector.shape_cast %259 : vector<1x2x384xf32> to vector<2x384xf32>
    %cst_64 = arith.constant dense<0.000000e+00> : vector<2x384xf32>
    %261 = tpu.matmul %253, %3, %cst_64 {dimension_numbers = #tpu.dot_dimension_numbers<[1], [0], [0], [1], [0, 0, 1, 1], [], []>} : vector<2x128xf32>, vector<128x384xf32>, vector<2x384xf32> -> vector<2x384xf32>
    %262 = vector.extract_strided_slice %260 {offsets = [0, 0], sizes = [2, 128], strides = [1, 1]} : vector<2x384xf32> to vector<2x128xf32>
    %263 = vector.extract_strided_slice %261 {offsets = [0, 0], sizes = [2, 128], strides = [1, 1]} : vector<2x384xf32> to vector<2x128xf32>
    %264 = arith.addf %262, %263 : vector<2x128xf32>
    %265 = arith.negf %264 : vector<2x128xf32>
    %266 = math.exp %265 : vector<2x128xf32>
    %cst_65 = arith.constant 1.000000e+00 : f32
    %267 = vector.broadcast %cst_65 : f32 to vector<2x128xf32>
    %268 = arith.addf %267, %266 : vector<2x128xf32>
    %269 = arith.divf %267, %268 : vector<2x128xf32>
    %270 = vector.extract_strided_slice %260 {offsets = [0, 128], sizes = [2, 128], strides = [1, 1]} : vector<2x384xf32> to vector<2x128xf32>
    %271 = vector.extract_strided_slice %261 {offsets = [0, 128], sizes = [2, 128], strides = [1, 1]} : vector<2x384xf32> to vector<2x128xf32>
    %272 = arith.addf %270, %271 : vector<2x128xf32>
    %273 = arith.negf %272 : vector<2x128xf32>
    %274 = math.exp %273 : vector<2x128xf32>
    %cst_66 = arith.constant 1.000000e+00 : f32
    %275 = vector.broadcast %cst_66 : f32 to vector<2x128xf32>
    %276 = arith.addf %275, %274 : vector<2x128xf32>
    %277 = arith.divf %275, %276 : vector<2x128xf32>
    %278 = vector.extract_strided_slice %260 {offsets = [0, 256], sizes = [2, 128], strides = [1, 1]} : vector<2x384xf32> to vector<2x128xf32>
    %279 = vector.extract_strided_slice %261 {offsets = [0, 256], sizes = [2, 128], strides = [1, 1]} : vector<2x384xf32> to vector<2x128xf32>
    %280 = vector.broadcast %4 : vector<1x128xf32> to vector<2x128xf32>
    %281 = arith.addf %279, %280 : vector<2x128xf32>
    %282 = arith.mulf %269, %281 : vector<2x128xf32>
    %283 = arith.addf %278, %282 : vector<2x128xf32>
    %284 = math.tanh %283 : vector<2x128xf32>
    %cst_67 = arith.constant 1.000000e+00 : f32
    %285 = vector.broadcast %cst_67 : f32 to vector<2x128xf32>
    %286 = arith.subf %285, %277 : vector<2x128xf32>
    %287 = arith.mulf %286, %284 : vector<2x128xf32>
    %288 = arith.mulf %277, %253 : vector<2x128xf32>
    %289 = arith.addf %287, %288 : vector<2x128xf32>
    %290 = arith.index_cast %c7_i32 : i32 to index
    %c0_68 = arith.constant 0 : index
    %c0_69 = arith.constant 0 : index
    %291 = vector.load %arg4[%290, %c0_68, %c0_69] : memref<8x2x128xf32, #tpu.memory_space<vmem>>, vector<1x2x128xf32>
    %292 = vector.shape_cast %291 : vector<1x2x128xf32> to vector<2x128xf32>
    %293 = vector.shape_cast %289 : vector<2x128xf32> to vector<1x2x128xf32>
    tpu.vector_store %arg4[%290, %c0_68, %c0_69], %293 {strides = array<i32>} : memref<8x2x128xf32, #tpu.memory_space<vmem>>, vector<1x2x128xf32>,
    %c8_i32 = arith.constant 8 : i32
    %c0_70 = arith.constant 0 : index
    %c0_71 = arith.constant 0 : index
    %294 = vector.load %arg5[%c0_70, %c0_71] : memref<2x128xf32, #tpu.memory_space<vmem>>, vector<2x128xf32>
    tpu.vector_store %arg5[%c0_70, %c0_71], %289 {strides = array<i32>} : memref<2x128xf32, #tpu.memory_space<vmem>>, vector<2x128xf32>,
    return
  }
  func.func @transform_0(%arg0: i32) -> (i32, i32, i32) {
    %c0_i32 = arith.constant 0 : i32
    %c0_i32_0 = arith.constant 0 : i32
    %c0_i32_1 = arith.constant 0 : i32
    return %arg0, %c0_i32, %c0_i32_0 : i32, i32, i32
  }
  func.func @transform_1(%arg0: i32) -> (i32, i32) {
    %c0_i32 = arith.constant 0 : i32
    %c0_i32_0 = arith.constant 0 : i32
    %c0_i32_1 = arith.constant 0 : i32
    return %c0_i32, %c0_i32_0 : i32, i32
  }
  func.func @transform_2(%arg0: i32) -> (i32, i32) {
    %c0_i32 = arith.constant 0 : i32
    %c0_i32_0 = arith.constant 0 : i32
    %c0_i32_1 = arith.constant 0 : i32
    return %c0_i32, %c0_i32_0 : i32, i32
  }
  func.func @transform_3(%arg0: i32) -> (i32, i32, i32) {
    %c0_i32 = arith.constant 0 : i32
    %c0_i32_0 = arith.constant 0 : i32
    %c0_i32_1 = arith.constant 0 : i32
    return %arg0, %c0_i32, %c0_i32_0 : i32, i32, i32
  }
}

</mosaic_0001>

<bundles_post_ra>
// kernel: rnn_decoder_forward.3
= control target key start
LH: loop header
LB: loop body
LE: loop exit
PB: predicated region body
PF: predicated region fallthrough
CT: control target
= control target key end

     0   :  { %v2432_v3 = vmov 0.0|0.0   ;;  %v2433_v4 = vmov 0.0   ;;  %vm2434_vm0 = vmmov 0   ;;  %s3030_s1 = inlined_call_operand.vmem [shape: f32[128,384], index: 1, kind: input, shape index: {}]   ;;  %s3031_s0 = inlined_call_operand.vmem [shape: f32[8,2,384], index: 0, kind: input, shape index: {}]   ;;  %s3032_s2 = inlined_call_operand.vmem [shape: f32[1,128], index: 2, kind: input, shape index: {}]   ;;  %s3033_s3 = inlined_call_operand.vmem [shape: f32[8,2,128], index: 3, kind: output, shape index: {}]  }
   0x1   :  { %v20_v0 = vld [vmem:[%s3030_s1 + $0x8] sm:$0xff]  ;;  %v23_v1 = vld [vmem:[%s3030_s1 + $0x20] sm:$0xff]  ;;  %1933 = vmatprep.subr.bf16.mxu1 %v2432_v3  ;;  %134 = vmatprep.mubr.f32.mxu0 %v2433_v4  ;;  %18 = vst [vmem:[#allocation2] sm:$0x3] %v2433_v4  ;;  %v22_v6 = vld [vmem:[%s3030_s1 + $0x18] sm:$0xff] }
   0x2   :  { %v19_v2 = vld [vmem:[%s3030_s1] sm:$0xff]  ;;  %v2467_v5 = vpack.c.bf16 %v23_v1, %v20_v0  ;;  %v26_v7 = vld [vmem:[%s3030_s1 + $0x38] sm:$0xff]  ;;  %v29_v8 = vld [vmem:[%s3030_s1 + $0x50] sm:$0xff]  ;;  %1653 = vmatprep.mubr.msk.f32.mxu1 %vm2434_vm0, %v2433_v4 }
   0x3   :  { %v2480_v9 = vpack.c.bf16 %v22_v6, %v19_v2  ;;  %v2482_v10 = vpack.c.bf16 %v29_v8, %v26_v7  ;;  %v25_v11 = vld [vmem:[%s3030_s1 + $0x30] sm:$0xff]  ;;  %v28_v12 = vld [vmem:[%s3030_s1 + $0x48] sm:$0xff]  ;;  %v35_v14 = vld [vmem:[%s3030_s1 + $0x80] sm:$0xff] }
   0x4   :  { %v32_v13 = vld [vmem:[%s3030_s1 + $0x68] sm:$0xff]  ;;  %1902 = vmatprep.subr.bf16.mxu0 %v2467_v5  ;;  %v2498_v15 = vpack.c.bf16 %v28_v12, %v25_v11  ;;  %v31_v17 = vld [vmem:[%s3030_s1 + $0x60] sm:$0xff]  ;;  %v34_v18 = vld [vmem:[%s3030_s1 + $0x78] sm:$0xff] }
   0x5   :  { %1904 = vmatpush1.bf16.msra.mxu0 %v2480_v9  ;;  %v2501_v16 = vpack.c.bf16 %v35_v14, %v32_v13  ;;  %v38_v19 = vld [vmem:[%s3030_s1 + $0x98] sm:$0xff]  ;;  %v41_v20 = vld [vmem:[%s3030_s1 + $0xb0] sm:$0xff]  ;;  %v2516_v21 = vpack.c.bf16 %v34_v18, %v31_v17  ;;  %v40_v24 = vld [vmem:[%s3030_s1 + $0xa8] sm:$0xff] }
   0x6   :  { %1906 = vmatprep.subr.bf16.mxu0 %v2482_v10  ;;  %v37_v22 = vld [vmem:[%s3030_s1 + $0x90] sm:$0xff]  ;;  %v2522_v23 = vpack.c.bf16 %v41_v20, %v38_v19  ;;  %v24_v26 = vld [vmem:[%s3030_s1 + $0x28] sm:$0xff]  ;;  %v47_v28 = vld [vmem:[%s3030_s1 + $0xe0] sm:$0xff] }
   0x7   :  { %v21_v25 = vld [vmem:[%s3030_s1 + $0x10] sm:$0xff]  ;;  %v44_v27 = vld [vmem:[%s3030_s1 + $0xc8] sm:$0xff]  ;;  %v27_v30 = vld [vmem:[%s3030_s1 + $0x40] sm:$0xff]  ;;  %v2548_v32 = vpack.c.bf16 %v40_v24, %v37_v22 }
   0x8   :  { %v2539_v29 = vpack.c.bf16 %v24_v26, %v21_v25  ;;  %v30_v31 = vld [vmem:[%s3030_s1 + $0x58] sm:$0xff]  ;;  %v43_v33 = vld [vmem:[%s3030_s1 + $0xc0] sm:$0xff]  ;;  %v2557_v35 = vpack.c.bf16 %v47_v28, %v44_v27  ;;  %v33_v37 = vld [vmem:[%s3030_s1 + $0x70] sm:$0xff] }
   0x9   :  { %1908 = vmatpush1.bf16.msra.mxu0 %v2498_v15  ;;  %v2554_v34 = vpack.c.bf16 %v30_v31, %v27_v30  ;;  %v46_v36 = vld [vmem:[%s3030_s1 + $0xd8] sm:$0xff]  ;;  %v36_v38 = vld [vmem:[%s3030_s1 + $0x88] sm:$0xff]  ;;  %v53_v40 = vld [vmem:[%s3030_s1 + $0x110] sm:$0xff] }
   0xa   :  { %1910 = vmatprep.subr.bf16.mxu0 %v2501_v16  ;;  %1935 = vmatpush3.bf16.msra.mxu1 %v2539_v29  ;;  %v50_v39 = vld [vmem:[%s3030_s1 + $0xf8] sm:$0xff]  ;;  %v2576_v41 = vpack.c.bf16 %v46_v36, %v43_v33  ;;  %v49_v42 = vld [vmem:[%s3030_s1 + $0xf0] sm:$0xff]  ;;  %v2582_v43 = vpack.c.bf16 %v36_v38, %v33_v37  ;;  %v52_v45 = vld [vmem:[%s3030_s1 + $0x108] sm:$0xff] }
   0xb   :  { %1936 = vmatprep.subr.bf16.mxu1 %v2432_v3  ;;  %v2585_v44 = vpack.c.bf16 %v53_v40, %v50_v39  ;;  %v39_v46 = vld [vmem:[%s3030_s1 + $0xa0] sm:$0xff]  ;;  %v42_v47 = vld [vmem:[%s3030_s1 + $0xb8] sm:$0xff]  ;;  %v56_v48 = vld [vmem:[%s3030_s1 + $0x128] sm:$0xff]  ;;  %v2604_v50 = vpack.c.bf16 %v52_v45, %v49_v42 }
   0xc   :  { %v59_v49 = vld [vmem:[%s3030_s1 + $0x140] sm:$0xff]  ;;  %v2610_v52 = vpack.c.bf16 %v42_v47, %v39_v46  ;;  %v58_v54 = vld [vmem:[%s3030_s1 + $0x138] sm:$0xff]  ;;  %v45_v55 = vld [vmem:[%s3030_s1 + $0xd0] sm:$0xff] }
   0xd   :  { %1912 = vmatpush1.bf16.msra.mxu0 %v2516_v21  ;;  %v55_v51 = vld [vmem:[%s3030_s1 + $0x120] sm:$0xff]  ;;  %v2613_v53 = vpack.c.bf16 %v59_v49, %v56_v48  ;;  %v48_v56 = vld [vmem:[%s3030_s1 + $0xe8] sm:$0xff]  ;;  %v62_v57 = vld [vmem:[%s3030_s1 + $0x158] sm:$0xff] }
   0xe   :  { %1914 = vmatprep.subr.bf16.mxu0 %v2522_v23  ;;  %1938 = vmatpush3.bf16.msra.mxu1 %v2554_v34  ;;  %v65_v58 = vld [vmem:[%s3030_s1 + $0x170] sm:$0xff]  ;;  %v2632_v59 = vpack.c.bf16 %v58_v54, %v55_v51  ;;  %v2638_v61 = vpack.c.bf16 %v48_v56, %v45_v55  ;;  %v64_v63 = vld [vmem:[%s3030_s1 + $0x168] sm:$0xff]  ;;  %v51_v0 = vld [vmem:[%s3030_s1 + $0x100] sm:$0xff] }
   0xf   :  { %1939 = vmatprep.subr.bf16.mxu1 %v2432_v3  ;;  %v61_v60 = vld [vmem:[%s3030_s1 + $0x150] sm:$0xff]  ;;  %v2641_v62 = vpack.c.bf16 %v65_v58, %v62_v57  ;;  %v54_v1 = vld [vmem:[%s3030_s1 + $0x118] sm:$0xff]  ;;  %v60_v8 = vld [vmem:[%s3030_s1 + $0x148] sm:$0xff] }
  0x10   :  { %v2654_v2 = vpack.c.bf16 %v64_v63, %v61_v60  ;;  %v2657_v6 = vpack.c.bf16 %v54_v1, %v51_v0  ;;  %v57_v7 = vld [vmem:[%s3030_s1 + $0x130] sm:$0xff]  ;;  %v2668_v11 = vld [vmem:[#allocation2] sm:$0x3]  ;;  %v66_v14 = vld [vmem:[%s3030_s1 + $0x178] sm:$0xff] }
  0x11   :  { %1916 = vmatpush1.bf16.msra.mxu0 %v2548_v32  ;;  %v2671_v12 = vpack.c.bf16 %v60_v8, %v57_v7  ;;  %v63_v13 = vld [vmem:[%s3030_s1 + $0x160] sm:$0xff] }
  0x12   :  { %1918 = vmatprep.subr.bf16.mxu0 %v2557_v35  ;;  %1941 = vmatpush3.bf16.msra.mxu1 %v2582_v43  ;;  %v2683_v17 = vpack.c.bf16 %v66_v14, %v63_v13  ;;  %v69_v18 = vld [vmem:[%s3031_s0] sm:$0x3f]  ;;  %v1457_v56 = vld [vmem:[%s3031_s0 + $0x6] sm:$0x3f] }
  0x13   :  { %1942 = vmatprep.subr.bf16.mxu1 %v2432_v3  ;;  %v219_v20 = vrot.slane %v69_v18, 2  ;;  %v2730_v37 = vld [vmem:[%s3032_s2] ss:$0 sm:$0xff]  ;;  %v236_v40 = vrot.slane %v69_v18, 4  ;;  %v396_v60 = vrot.slane %v1457_v56, 2 }
  0x15   :  { %1920 = vmatpush1.bf16.msra.mxu0 %v2576_v41 }
  0x16   :  { %1922 = vmatprep.subr.bf16.mxu0 %v2585_v44  ;;  %1944 = vmatpush3.bf16.msra.mxu1 %v2610_v52 }
  0x17   :  { %1945 = vmatprep.subr.bf16.mxu1 %v2432_v3 }
  0x19   :  { %1924 = vmatpush1.bf16.msra.mxu0 %v2604_v50 }
  0x1a   :  { %1926 = vmatprep.subr.bf16.mxu0 %v2613_v53  ;;  %1947 = vmatpush3.bf16.msra.mxu1 %v2638_v61 }
  0x1b   :  { %1948 = vmatprep.subr.bf16.mxu1 %v2432_v3 }
  0x1d   :  { %1928 = vmatpush1.bf16.msra.mxu0 %v2632_v59 }
  0x1e   :  { %1930 = vmatprep.subr.bf16.mxu0 %v2641_v62  ;;  %1950 = vmatpush3.bf16.msra.mxu1 %v2657_v6 }
  0x1f   :  { %1951 = vmatprep.subr.bf16.mxu1 %v2432_v3 }
  0x21   :  { %1932 = vmatpush1.bf16.msra.mxu0 %v2654_v2 }
  0x22   :  { %1958 = vmatprep.subr.bf16.mxu0 %v2467_v5  ;;  %1953 = vmatpush3.bf16.msra.mxu1 %v2671_v12 }
  0x23   :  { %1954 = vmatprep.subr.bf16.mxu1 %v2432_v3 }
  0x24   :  { %135 = vmatmul.mubr.f32.vlgmr.msra.gmra.mrb[0].mxu0 %v2668_v11 }
  0x25   :  { %1960 = vmatpush1.bf16.msra.mxu0 %v2480_v9  ;;  %311 = vmatprep.mubr.f32.mxu0 %v2433_v4 }
  0x26   :  { %1962 = vmatprep.subr.bf16.mxu0 %v2482_v10  ;;  %1956 = vmatpush3.bf16.msra.mxu1 %v2683_v17 }
  0x27   :  { %1989 = vmatprep.subr.bf16.mxu1 %v2432_v3 }
  0x29   :  { %1964 = vmatpush1.bf16.msra.mxu0 %v2498_v15  ;;  %1654 = vmatmul.mubr.f32.vlgmr.msra.gmra.mrb[0].mxu1 %v2668_v11 }
  0x2a   :  { %1966 = vmatprep.subr.bf16.mxu0 %v2501_v16  ;;  %1991 = vmatpush3.bf16.msra.mxu1 %v2539_v29 }
  0x2b   :  { %1992 = vmatprep.subr.bf16.mxu1 %v2432_v3  ;;  %1688 = vmatprep.mubr.msk.f32.mxu1 %vm2434_vm0, %v2433_v4 }
  0x2d   :  { %1968 = vmatpush1.bf16.msra.mxu0 %v2516_v21 }
  0x2e   :  { %1970 = vmatprep.subr.bf16.mxu0 %v2522_v23  ;;  %1994 = vmatpush3.bf16.msra.mxu1 %v2554_v34 }
  0x2f   :  { %1995 = vmatprep.subr.bf16.mxu1 %v2432_v3 }
  0x31   :  { %1972 = vmatpush1.bf16.msra.mxu0 %v2548_v32 }
  0x32   :  { %1974 = vmatprep.subr.bf16.mxu0 %v2557_v35  ;;  %1997 = vmatpush3.bf16.msra.mxu1 %v2582_v43 }
  0x33   :  { %1998 = vmatprep.subr.bf16.mxu1 %v2432_v3 }
  0x35   :  { %1976 = vmatpush1.bf16.msra.mxu0 %v2576_v41 }
  0x36   :  { %1978 = vmatprep.subr.bf16.mxu0 %v2585_v44  ;;  %2000 = vmatpush3.bf16.msra.mxu1 %v2610_v52 }
  0x37   :  { %2001 = vmatprep.subr.bf16.mxu1 %v2432_v3 }
  0x39   :  { %1980 = vmatpush1.bf16.msra.mxu0 %v2604_v50 }
  0x3a   :  { %1982 = vmatprep.subr.bf16.mxu0 %v2613_v53  ;;  %2003 = vmatpush3.bf16.msra.mxu1 %v2638_v61 }
  0x3b   :  { %2004 = vmatprep.subr.bf16.mxu1 %v2432_v3 }
  0x3d   :  { %1984 = vmatpush1.bf16.msra.mxu0 %v2632_v59 }
  0x3e   :  { %1986 = vmatprep.subr.bf16.mxu0 %v2641_v62  ;;  %2006 = vmatpush3.bf16.msra.mxu1 %v2657_v6 }
  0x3f   :  { %2007 = vmatprep.subr.bf16.mxu1 %v2432_v3 }
  0x41   :  { %1988 = vmatpush1.bf16.msra.mxu0 %v2654_v2 }
  0x42   :  { %2014 = vmatprep.subr.bf16.mxu0 %v2467_v5  ;;  %2009 = vmatpush3.bf16.msra.mxu1 %v2671_v12 }
  0x43   :  { %2010 = vmatprep.subr.bf16.mxu1 %v2432_v3 }
  0x46   :  { %2012 = vmatpush3.bf16.msra.mxu1 %v2683_v17 }
  0x47   :  { %2045 = vmatprep.subr.bf16.mxu1 %v2432_v3 }
  0xf7   :  { %v136_v19 = vpop.f32.mrb[0].mxu0 }
  0xf8   :  { %v211_v22 = vadd.f32 %v136_v19, %v69_v18  ;;  %v138_v24 = vpop.f32.mrb[1].mxu0 }
  0xf9   :  { %v221_v26 = vadd.f32 %v219_v20, %v138_v24  ;;  %v407_v20 = vrot.slane %v1457_v56, 4 }
  0xfa   :  { %v1454_v25 = vmul.f32 -1.442695, %v211_v22 }
  0xfb   :  { %v1455_v27 = vmul.f32 -1.442695, %v221_v26 }
  0xfc   :  { %2352 = vpow2.f32 %v1454_v25  ;;  %v207_v28 = vpop.f32.mrb[0].mxu1 }
  0xfd   :  { %v1655_v30 = vpop.f32.mrb[1].mxu1  ;;  %2354 = vpow2.f32 %v1455_v27  ;;  %v234_v39 = vadd.f32 %v2730_v37, %v207_v28 }
 0x106   :  { %v2353_v31 = vpop.eup %2352 }
 0x107   :  { %v215_v33 = vadd.f32 1.0, %v2353_v31  ;;  %v2355_v36 = vpop.eup %2354 }
 0x108   :  { %v225_v38 = vadd.f32 1.0, %v2355_v36 }
 0x109   :  { %2356 = vrcp.f32 %v215_v33 }
 0x10a   :  { %2358 = vrcp.f32 %v225_v38  ;;  %v1461_v38 = vld [vmem:[%s3031_s0 + $0xc] sm:$0x3f] }
 0x113   :  { %v2357_v42 = vpop.eup %2356 }
 0x114   :  { %v235_v45 = vmul.f32 %v2357_v42, %v234_v39  ;;  %v2359_v47 = vpop.eup %2358  ;;  %v568_v42 = vrot.slane %v1461_v38, 2 }
 0x115   :  { %v240_v48 = vsub.f32 1.0, %v2359_v47  ;;  %v242_v54 = vmul.f32 %v2359_v47, %v2668_v11 }
 0x116   :  { %v238_v46 = vadd.f32 %v236_v40, %v235_v45 }
 0x118   :  { %2360 = vtanh.f32 %v238_v46 }
 0x122   :  { %v2361_v49 = vpop.eup %2360 }
 0x123   :  { %v241_v51 = vmul.f32 %v2361_v49, %v240_v48 }
 0x125   :  { %v2734_v55 = vadd.f32 %v242_v54, %v241_v51 }
 0x127   :  { %244 = vst [vmem:[%s3033_s3] sm:$0x3] %v2734_v55  ;;  %312 = vmatmul.mubr.f32.vlgmr.msra.gmra.mrb[2].mxu0 %v2734_v55  ;;  %1689 = vmatmul.mubr.f32.vlgmr.msra.gmra.mrb[2].mxu1 %v2734_v55 }
 0x128   :  { %2016 = vmatpush1.bf16.msra.mxu0 %v2480_v9  ;;  %2047 = vmatpush3.bf16.msra.mxu1 %v2539_v29 }
 0x129   :  { %2018 = vmatprep.subr.bf16.mxu0 %v2482_v10  ;;  %2048 = vmatprep.subr.bf16.mxu1 %v2432_v3 }
 0x12a   :  { %483 = vmatprep.mubr.f32.mxu0 %v2433_v4  ;;  %1723 = vmatprep.mubr.msk.f32.mxu1 %vm2434_vm0, %v2433_v4 }
 0x12c   :  { %2020 = vmatpush1.bf16.msra.mxu0 %v2498_v15  ;;  %2050 = vmatpush3.bf16.msra.mxu1 %v2554_v34 }
 0x12d   :  { %2022 = vmatprep.subr.bf16.mxu0 %v2501_v16  ;;  %2051 = vmatprep.subr.bf16.mxu1 %v2432_v3 }
 0x130   :  { %2024 = vmatpush1.bf16.msra.mxu0 %v2516_v21  ;;  %2053 = vmatpush3.bf16.msra.mxu1 %v2582_v43 }
 0x131   :  { %2026 = vmatprep.subr.bf16.mxu0 %v2522_v23  ;;  %2054 = vmatprep.subr.bf16.mxu1 %v2432_v3 }
 0x134   :  { %2028 = vmatpush1.bf16.msra.mxu0 %v2548_v32  ;;  %2056 = vmatpush3.bf16.msra.mxu1 %v2610_v52 }
 0x135   :  { %2030 = vmatprep.subr.bf16.mxu0 %v2557_v35  ;;  %2057 = vmatprep.subr.bf16.mxu1 %v2432_v3 }
 0x138   :  { %2032 = vmatpush1.bf16.msra.mxu0 %v2576_v41  ;;  %2059 = vmatpush3.bf16.msra.mxu1 %v2638_v61 }
 0x139   :  { %2034 = vmatprep.subr.bf16.mxu0 %v2585_v44  ;;  %2060 = vmatprep.subr.bf16.mxu1 %v2432_v3 }
 0x13c   :  { %2036 = vmatpush1.bf16.msra.mxu0 %v2604_v50  ;;  %2062 = vmatpush3.bf16.msra.mxu1 %v2657_v6 }
 0x13d   :  { %2038 = vmatprep.subr.bf16.mxu0 %v2613_v53  ;;  %2063 = vmatprep.subr.bf16.mxu1 %v2432_v3 }
 0x140   :  { %2040 = vmatpush1.bf16.msra.mxu0 %v2632_v59  ;;  %2065 = vmatpush3.bf16.msra.mxu1 %v2671_v12 }
 0x141   :  { %2042 = vmatprep.subr.bf16.mxu0 %v2641_v62  ;;  %2066 = vmatprep.subr.bf16.mxu1 %v2432_v3 }
 0x144   :  { %2044 = vmatpush1.bf16.msra.mxu0 %v2654_v2  ;;  %2068 = vmatpush3.bf16.msra.mxu1 %v2683_v17 }
 0x145   :  { %2070 = vmatprep.subr.bf16.mxu0 %v2467_v5  ;;  %2101 = vmatprep.subr.bf16.mxu1 %v2432_v3 }
 0x1fa   :  { %v313_v57 = vpop.f32.mrb[2].mxu0  ;;  %v384_v58 = vpop.f32.mrb[2].mxu1 }
 0x1fb   :  { %v388_v63 = vadd.f32 %v1457_v56, %v313_v57  ;;  %v315_v0 = vpop.f32.mrb[3].mxu0  ;;  %v1690_v1 = vpop.f32.mrb[3].mxu1  ;;  %v405_v22 = vadd.f32 %v2730_v37, %v384_v58  ;;  %v579_v58 = vrot.slane %v1461_v38, 4 }
 0x1fc   :  { %v398_v8 = vadd.f32 %v396_v60, %v315_v0 }
 0x1fd   :  { %v1458_v7 = vmul.f32 -1.442695, %v388_v63 }
 0x1fe   :  { %v1459_v11 = vmul.f32 -1.442695, %v398_v8 }
 0x1ff   :  { %2362 = vpow2.f32 %v1458_v7 }
 0x200   :  { %2364 = vpow2.f32 %v1459_v11 }
 0x209   :  { %v2363_v13 = vpop.eup %2362 }
 0x20a   :  { %v392_v14 = vadd.f32 1.0, %v2363_v13  ;;  %v2365_v18 = vpop.eup %2364 }
 0x20b   :  { %v402_v19 = vadd.f32 1.0, %v2365_v18 }
 0x20c   :  { %2366 = vrcp.f32 %v392_v14 }
 0x20d   :  { %2368 = vrcp.f32 %v402_v19  ;;  %v1465_v19 = vld [vmem:[%s3031_s0 + $0x12] sm:$0x3f] }
 0x216   :  { %v2367_v24 = vpop.eup %2366 }
 0x217   :  { %v406_v25 = vmul.f32 %v2367_v24, %v405_v22  ;;  %v2369_v27 = vpop.eup %2368  ;;  %v740_v24 = vrot.slane %v1465_v19, 2 }
 0x218   :  { %v411_v28 = vsub.f32 1.0, %v2369_v27  ;;  %v413_v33 = vmul.f32 %v2369_v27, %v2734_v55 }
 0x219   :  { %v409_v26 = vadd.f32 %v407_v20, %v406_v25 }
 0x21b   :  { %2370 = vtanh.f32 %v409_v26 }
 0x225   :  { %v2371_v30 = vpop.eup %2370 }
 0x226   :  { %v412_v31 = vmul.f32 %v2371_v30, %v411_v28 }
 0x228   :  { %v2782_v36 = vadd.f32 %v413_v33, %v412_v31 }
 0x22a   :  { %1460 = vst [vmem:[%s3033_s3 + $0x2] sm:$0x3] %v2782_v36  ;;  %484 = vmatmul.mubr.f32.vlgmr.msra.gmra.mrb[4].mxu0 %v2782_v36  ;;  %1724 = vmatmul.mubr.f32.vlgmr.msra.gmra.mrb[4].mxu1 %v2782_v36 }
 0x22b   :  { %2072 = vmatpush1.bf16.msra.mxu0 %v2480_v9  ;;  %2103 = vmatpush3.bf16.msra.mxu1 %v2539_v29 }
 0x22c   :  { %2074 = vmatprep.subr.bf16.mxu0 %v2482_v10  ;;  %2104 = vmatprep.subr.bf16.mxu1 %v2432_v3 }
 0x22d   :  { %655 = vmatprep.mubr.f32.mxu0 %v2433_v4  ;;  %1758 = vmatprep.mubr.msk.f32.mxu1 %vm2434_vm0, %v2433_v4 }
 0x22f   :  { %2076 = vmatpush1.bf16.msra.mxu0 %v2498_v15  ;;  %2106 = vmatpush3.bf16.msra.mxu1 %v2554_v34 }
 0x230   :  { %2078 = vmatprep.subr.bf16.mxu0 %v2501_v16  ;;  %2107 = vmatprep.subr.bf16.mxu1 %v2432_v3 }
 0x233   :  { %2080 = vmatpush1.bf16.msra.mxu0 %v2516_v21  ;;  %2109 = vmatpush3.bf16.msra.mxu1 %v2582_v43 }
 0x234   :  { %2082 = vmatprep.subr.bf16.mxu0 %v2522_v23  ;;  %2110 = vmatprep.subr.bf16.mxu1 %v2432_v3 }
 0x237   :  { %2084 = vmatpush1.bf16.msra.mxu0 %v2548_v32  ;;  %2112 = vmatpush3.bf16.msra.mxu1 %v2610_v52 }
 0x238   :  { %2086 = vmatprep.subr.bf16.mxu0 %v2557_v35  ;;  %2113 = vmatprep.subr.bf16.mxu1 %v2432_v3 }
 0x23b   :  { %2088 = vmatpush1.bf16.msra.mxu0 %v2576_v41  ;;  %2115 = vmatpush3.bf16.msra.mxu1 %v2638_v61 }
 0x23c   :  { %2090 = vmatprep.subr.bf16.mxu0 %v2585_v44  ;;  %2116 = vmatprep.subr.bf16.mxu1 %v2432_v3 }
 0x23f   :  { %2092 = vmatpush1.bf16.msra.mxu0 %v2604_v50  ;;  %2118 = vmatpush3.bf16.msra.mxu1 %v2657_v6 }
 0x240   :  { %2094 = vmatprep.subr.bf16.mxu0 %v2613_v53  ;;  %2119 = vmatprep.subr.bf16.mxu1 %v2432_v3 }
 0x243   :  { %2096 = vmatpush1.bf16.msra.mxu0 %v2632_v59  ;;  %2121 = vmatpush3.bf16.msra.mxu1 %v2671_v12 }
 0x244   :  { %2098 = vmatprep.subr.bf16.mxu0 %v2641_v62  ;;  %2122 = vmatprep.subr.bf16.mxu1 %v2432_v3 }
 0x247   :  { %2100 = vmatpush1.bf16.msra.mxu0 %v2654_v2  ;;  %2124 = vmatpush3.bf16.msra.mxu1 %v2683_v17 }
 0x248   :  { %2126 = vmatprep.subr.bf16.mxu0 %v2467_v5  ;;  %2157 = vmatprep.subr.bf16.mxu1 %v2432_v3 }
 0x2fd   :  { %v485_v39 = vpop.f32.mrb[4].mxu0  ;;  %v556_v40 = vpop.f32.mrb[4].mxu1 }
 0x2fe   :  { %v560_v45 = vadd.f32 %v1461_v38, %v485_v39  ;;  %v487_v46 = vpop.f32.mrb[5].mxu0  ;;  %v1725_v47 = vpop.f32.mrb[5].mxu1  ;;  %v577_v60 = vadd.f32 %v2730_v37, %v556_v40  ;;  %v751_v40 = vrot.slane %v1465_v19, 4 }
 0x2ff   :  { %v570_v49 = vadd.f32 %v568_v42, %v487_v46 }
 0x300   :  { %v1462_v48 = vmul.f32 -1.442695, %v560_v45 }
 0x301   :  { %v1463_v51 = vmul.f32 -1.442695, %v570_v49 }
 0x302   :  { %2372 = vpow2.f32 %v1462_v48 }
 0x303   :  { %2374 = vpow2.f32 %v1463_v51 }
 0x30c   :  { %v2373_v54 = vpop.eup %2372 }
 0x30d   :  { %v564_v55 = vadd.f32 1.0, %v2373_v54  ;;  %v2375_v56 = vpop.eup %2374 }
 0x30e   :  { %v574_v57 = vadd.f32 1.0, %v2375_v56 }
 0x30f   :  { %2376 = vrcp.f32 %v564_v55 }
 0x310   :  { %2378 = vrcp.f32 %v574_v57  ;;  %v1469_v57 = vld [vmem:[%s3031_s0 + $0x18] sm:$0x3f] }
 0x319   :  { %v2377_v63 = vpop.eup %2376 }
 0x31a   :  { %v578_v0 = vmul.f32 %v2377_v63, %v577_v60  ;;  %v2379_v7 = vpop.eup %2378  ;;  %v912_v63 = vrot.slane %v1469_v57, 2 }
 0x31b   :  { %v583_v8 = vsub.f32 1.0, %v2379_v7  ;;  %v585_v14 = vmul.f32 %v2379_v7, %v2782_v36 }
 0x31c   :  { %v581_v1 = vadd.f32 %v579_v58, %v578_v0 }
 0x31e   :  { %2380 = vtanh.f32 %v581_v1 }
 0x328   :  { %v2381_v11 = vpop.eup %2380 }
 0x329   :  { %v584_v13 = vmul.f32 %v2381_v11, %v583_v8 }
 0x32b   :  { %v2830_v18 = vadd.f32 %v585_v14, %v584_v13 }
 0x32d   :  { %1464 = vst [vmem:[%s3033_s3 + $0x4] sm:$0x3] %v2830_v18  ;;  %656 = vmatmul.mubr.f32.vlgmr.msra.gmra.mrb[6].mxu0 %v2830_v18  ;;  %1759 = vmatmul.mubr.f32.vlgmr.msra.gmra.mrb[6].mxu1 %v2830_v18 }
 0x32e   :  { %2128 = vmatpush1.bf16.msra.mxu0 %v2480_v9  ;;  %2159 = vmatpush3.bf16.msra.mxu1 %v2539_v29 }
 0x32f   :  { %2130 = vmatprep.subr.bf16.mxu0 %v2482_v10  ;;  %2160 = vmatprep.subr.bf16.mxu1 %v2432_v3 }
 0x330   :  { %827 = vmatprep.mubr.f32.mxu0 %v2433_v4  ;;  %1793 = vmatprep.mubr.msk.f32.mxu1 %vm2434_vm0, %v2433_v4 }
 0x332   :  { %2132 = vmatpush1.bf16.msra.mxu0 %v2498_v15  ;;  %2162 = vmatpush3.bf16.msra.mxu1 %v2554_v34 }
 0x333   :  { %2134 = vmatprep.subr.bf16.mxu0 %v2501_v16  ;;  %2163 = vmatprep.subr.bf16.mxu1 %v2432_v3 }
 0x336   :  { %2136 = vmatpush1.bf16.msra.mxu0 %v2516_v21  ;;  %2165 = vmatpush3.bf16.msra.mxu1 %v2582_v43 }
 0x337   :  { %2138 = vmatprep.subr.bf16.mxu0 %v2522_v23  ;;  %2166 = vmatprep.subr.bf16.mxu1 %v2432_v3 }
 0x33a   :  { %2140 = vmatpush1.bf16.msra.mxu0 %v2548_v32  ;;  %2168 = vmatpush3.bf16.msra.mxu1 %v2610_v52 }
 0x33b   :  { %2142 = vmatprep.subr.bf16.mxu0 %v2557_v35  ;;  %2169 = vmatprep.subr.bf16.mxu1 %v2432_v3 }
 0x33e   :  { %2144 = vmatpush1.bf16.msra.mxu0 %v2576_v41  ;;  %2171 = vmatpush3.bf16.msra.mxu1 %v2638_v61 }
 0x33f   :  { %2146 = vmatprep.subr.bf16.mxu0 %v2585_v44  ;;  %2172 = vmatprep.subr.bf16.mxu1 %v2432_v3 }
 0x342   :  { %2148 = vmatpush1.bf16.msra.mxu0 %v2604_v50  ;;  %2174 = vmatpush3.bf16.msra.mxu1 %v2657_v6 }
 0x343   :  { %2150 = vmatprep.subr.bf16.mxu0 %v2613_v53  ;;  %2175 = vmatprep.subr.bf16.mxu1 %v2432_v3 }
 0x346   :  { %2152 = vmatpush1.bf16.msra.mxu0 %v2632_v59  ;;  %2177 = vmatpush3.bf16.msra.mxu1 %v2671_v12 }
 0x347   :  { %2154 = vmatprep.subr.bf16.mxu0 %v2641_v62  ;;  %2178 = vmatprep.subr.bf16.mxu1 %v2432_v3 }
 0x34a   :  { %2156 = vmatpush1.bf16.msra.mxu0 %v2654_v2  ;;  %2180 = vmatpush3.bf16.msra.mxu1 %v2683_v17 }
 0x34b   :  { %2182 = vmatprep.subr.bf16.mxu0 %v2467_v5  ;;  %2213 = vmatprep.subr.bf16.mxu1 %v2432_v3 }
 0x400   :  { %v657_v20 = vpop.f32.mrb[6].mxu0  ;;  %v728_v22 = vpop.f32.mrb[6].mxu1 }
 0x401   :  { %v732_v25 = vadd.f32 %v1465_v19, %v657_v20  ;;  %v659_v26 = vpop.f32.mrb[7].mxu0  ;;  %v1760_v27 = vpop.f32.mrb[7].mxu1  ;;  %v749_v42 = vadd.f32 %v2730_v37, %v728_v22  ;;  %v923_v22 = vrot.slane %v1469_v57, 4 }
 0x402   :  { %v742_v30 = vadd.f32 %v740_v24, %v659_v26 }
 0x403   :  { %v1466_v28 = vmul.f32 -1.442695, %v732_v25 }
 0x404   :  { %v1467_v31 = vmul.f32 -1.442695, %v742_v30 }
 0x405   :  { %2382 = vpow2.f32 %v1466_v28 }
 0x406   :  { %2384 = vpow2.f32 %v1467_v31 }
 0x40f   :  { %v2383_v33 = vpop.eup %2382 }
 0x410   :  { %v736_v36 = vadd.f32 1.0, %v2383_v33  ;;  %v2385_v38 = vpop.eup %2384 }
 0x411   :  { %v746_v39 = vadd.f32 1.0, %v2385_v38 }
 0x412   :  { %2386 = vrcp.f32 %v736_v36 }
 0x413   :  { %2388 = vrcp.f32 %v746_v39  ;;  %v1473_v39 = vld [vmem:[%s3031_s0 + $0x1e] sm:$0x3f] }
 0x41c   :  { %v2387_v45 = vpop.eup %2386 }
 0x41d   :  { %v750_v46 = vmul.f32 %v2387_v45, %v749_v42  ;;  %v2389_v48 = vpop.eup %2388  ;;  %v1084_v45 = vrot.slane %v1473_v39, 2 }
 0x41e   :  { %v755_v49 = vsub.f32 1.0, %v2389_v48  ;;  %v757_v55 = vmul.f32 %v2389_v48, %v2830_v18 }
 0x41f   :  { %v753_v47 = vadd.f32 %v751_v40, %v750_v46 }
 0x421   :  { %2390 = vtanh.f32 %v753_v47 }
 0x42b   :  { %v2391_v51 = vpop.eup %2390 }
 0x42c   :  { %v756_v54 = vmul.f32 %v2391_v51, %v755_v49 }
 0x42e   :  { %v2878_v56 = vadd.f32 %v757_v55, %v756_v54 }
 0x430   :  { %1468 = vst [vmem:[%s3033_s3 + $0x6] sm:$0x3] %v2878_v56  ;;  %828 = vmatmul.mubr.f32.vlgmr.msra.gmra.mrb[8].mxu0 %v2878_v56  ;;  %1794 = vmatmul.mubr.f32.vlgmr.msra.gmra.mrb[8].mxu1 %v2878_v56 }
 0x431   :  { %2184 = vmatpush1.bf16.msra.mxu0 %v2480_v9  ;;  %2215 = vmatpush3.bf16.msra.mxu1 %v2539_v29 }
 0x432   :  { %2186 = vmatprep.subr.bf16.mxu0 %v2482_v10  ;;  %2216 = vmatprep.subr.bf16.mxu1 %v2432_v3 }
 0x433   :  { %999 = vmatprep.mubr.f32.mxu0 %v2433_v4  ;;  %1828 = vmatprep.mubr.msk.f32.mxu1 %vm2434_vm0, %v2433_v4 }
 0x435   :  { %2188 = vmatpush1.bf16.msra.mxu0 %v2498_v15  ;;  %2218 = vmatpush3.bf16.msra.mxu1 %v2554_v34 }
 0x436   :  { %2190 = vmatprep.subr.bf16.mxu0 %v2501_v16  ;;  %2219 = vmatprep.subr.bf16.mxu1 %v2432_v3 }
 0x439   :  { %2192 = vmatpush1.bf16.msra.mxu0 %v2516_v21  ;;  %2221 = vmatpush3.bf16.msra.mxu1 %v2582_v43 }
 0x43a   :  { %2194 = vmatprep.subr.bf16.mxu0 %v2522_v23  ;;  %2222 = vmatprep.subr.bf16.mxu1 %v2432_v3 }
 0x43d   :  { %2196 = vmatpush1.bf16.msra.mxu0 %v2548_v32  ;;  %2224 = vmatpush3.bf16.msra.mxu1 %v2610_v52 }
 0x43e   :  { %2198 = vmatprep.subr.bf16.mxu0 %v2557_v35  ;;  %2225 = vmatprep.subr.bf16.mxu1 %v2432_v3 }
 0x441   :  { %2200 = vmatpush1.bf16.msra.mxu0 %v2576_v41  ;;  %2227 = vmatpush3.bf16.msra.mxu1 %v2638_v61 }
 0x442   :  { %2202 = vmatprep.subr.bf16.mxu0 %v2585_v44  ;;  %2228 = vmatprep.subr.bf16.mxu1 %v2432_v3 }
 0x445   :  { %2204 = vmatpush1.bf16.msra.mxu0 %v2604_v50  ;;  %2230 = vmatpush3.bf16.msra.mxu1 %v2657_v6 }
 0x446   :  { %2206 = vmatprep.subr.bf16.mxu0 %v2613_v53  ;;  %2231 = vmatprep.subr.bf16.mxu1 %v2432_v3 }
 0x449   :  { %2208 = vmatpush1.bf16.msra.mxu0 %v2632_v59  ;;  %2233 = vmatpush3.bf16.msra.mxu1 %v2671_v12 }
 0x44a   :  { %2210 = vmatprep.subr.bf16.mxu0 %v2641_v62  ;;  %2234 = vmatprep.subr.bf16.mxu1 %v2432_v3 }
 0x44d   :  { %2212 = vmatpush1.bf16.msra.mxu0 %v2654_v2  ;;  %2236 = vmatpush3.bf16.msra.mxu1 %v2683_v17 }
 0x44e   :  { %2238 = vmatprep.subr.bf16.mxu0 %v2467_v5  ;;  %2269 = vmatprep.subr.bf16.mxu1 %v2432_v3 }
 0x503   :  { %v829_v58 = vpop.f32.mrb[8].mxu0  ;;  %v900_v60 = vpop.f32.mrb[8].mxu1 }
 0x504   :  { %v904_v0 = vadd.f32 %v1469_v57, %v829_v58  ;;  %v831_v1 = vpop.f32.mrb[9].mxu0  ;;  %v1795_v7 = vpop.f32.mrb[9].mxu1  ;;  %v921_v24 = vadd.f32 %v2730_v37, %v900_v60  ;;  %v1095_v58 = vrot.slane %v1473_v39, 4 }
 0x505   :  { %v914_v11 = vadd.f32 %v912_v63, %v831_v1 }
 0x506   :  { %v1470_v8 = vmul.f32 -1.442695, %v904_v0 }
 0x507   :  { %v1471_v13 = vmul.f32 -1.442695, %v914_v11 }
 0x508   :  { %2392 = vpow2.f32 %v1470_v8 }
 0x509   :  { %2394 = vpow2.f32 %v1471_v13 }
 0x512   :  { %v2393_v14 = vpop.eup %2392 }
 0x513   :  { %v908_v18 = vadd.f32 1.0, %v2393_v14  ;;  %v2395_v19 = vpop.eup %2394 }
 0x514   :  { %v918_v20 = vadd.f32 1.0, %v2395_v19  ;;  %v1481_v19 = vld [vmem:[%s3031_s0 + $0x2a] sm:$0x3f] }
 0x515   :  { %2396 = vrcp.f32 %v908_v18 }
 0x516   :  { %2398 = vrcp.f32 %v918_v20 }
 0x51f   :  { %v2397_v25 = vpop.eup %2396 }
 0x520   :  { %v922_v26 = vmul.f32 %v2397_v25, %v921_v24  ;;  %v2399_v28 = vpop.eup %2398  ;;  %v1428_v24 = vrot.slane %v1481_v19, 2 }
 0x521   :  { %v927_v30 = vsub.f32 1.0, %v2399_v28  ;;  %v929_v36 = vmul.f32 %v2399_v28, %v2878_v56 }
 0x522   :  { %v925_v27 = vadd.f32 %v923_v22, %v922_v26 }
 0x524   :  { %2400 = vtanh.f32 %v925_v27 }
 0x52e   :  { %v2401_v31 = vpop.eup %2400 }
 0x52f   :  { %v928_v33 = vmul.f32 %v2401_v31, %v927_v30 }
 0x531   :  { %v2926_v38 = vadd.f32 %v929_v36, %v928_v33 }
 0x533   :  { %1472 = vst [vmem:[%s3033_s3 + $0x8] sm:$0x3] %v2926_v38  ;;  %1000 = vmatmul.mubr.f32.vlgmr.msra.gmra.mrb[10].mxu0 %v2926_v38  ;;  %1829 = vmatmul.mubr.f32.vlgmr.msra.gmra.mrb[10].mxu1 %v2926_v38 }
 0x534   :  { %2240 = vmatpush1.bf16.msra.mxu0 %v2480_v9  ;;  %2271 = vmatpush3.bf16.msra.mxu1 %v2539_v29 }
 0x535   :  { %2242 = vmatprep.subr.bf16.mxu0 %v2482_v10  ;;  %2272 = vmatprep.subr.bf16.mxu1 %v2432_v3 }
 0x536   :  { %1171 = vmatprep.mubr.f32.mxu0 %v2433_v4  ;;  %1863 = vmatprep.mubr.msk.f32.mxu1 %vm2434_vm0, %v2433_v4 }
 0x538   :  { %2244 = vmatpush1.bf16.msra.mxu0 %v2498_v15  ;;  %2274 = vmatpush3.bf16.msra.mxu1 %v2554_v34 }
 0x539   :  { %2246 = vmatprep.subr.bf16.mxu0 %v2501_v16  ;;  %2275 = vmatprep.subr.bf16.mxu1 %v2432_v3 }
 0x53c   :  { %2248 = vmatpush1.bf16.msra.mxu0 %v2516_v21  ;;  %2277 = vmatpush3.bf16.msra.mxu1 %v2582_v43 }
 0x53d   :  { %2250 = vmatprep.subr.bf16.mxu0 %v2522_v23  ;;  %2278 = vmatprep.subr.bf16.mxu1 %v2432_v3 }
 0x540   :  { %2252 = vmatpush1.bf16.msra.mxu0 %v2548_v32  ;;  %2280 = vmatpush3.bf16.msra.mxu1 %v2610_v52 }
 0x541   :  { %2254 = vmatprep.subr.bf16.mxu0 %v2557_v35  ;;  %2281 = vmatprep.subr.bf16.mxu1 %v2432_v3 }
 0x544   :  { %2256 = vmatpush1.bf16.msra.mxu0 %v2576_v41  ;;  %2283 = vmatpush3.bf16.msra.mxu1 %v2638_v61 }
 0x545   :  { %2258 = vmatprep.subr.bf16.mxu0 %v2585_v44  ;;  %2284 = vmatprep.subr.bf16.mxu1 %v2432_v3 }
 0x548   :  { %2260 = vmatpush1.bf16.msra.mxu0 %v2604_v50  ;;  %2286 = vmatpush3.bf16.msra.mxu1 %v2657_v6 }
 0x549   :  { %2262 = vmatprep.subr.bf16.mxu0 %v2613_v53  ;;  %2287 = vmatprep.subr.bf16.mxu1 %v2432_v3 }
 0x54c   :  { %2264 = vmatpush1.bf16.msra.mxu0 %v2632_v59  ;;  %2289 = vmatpush3.bf16.msra.mxu1 %v2671_v12 }
 0x54d   :  { %2266 = vmatprep.subr.bf16.mxu0 %v2641_v62  ;;  %2290 = vmatprep.subr.bf16.mxu1 %v2432_v3 }
 0x550   :  { %2268 = vmatpush1.bf16.msra.mxu0 %v2654_v2  ;;  %2292 = vmatpush3.bf16.msra.mxu1 %v2683_v17 }
 0x551   :  { %2294 = vmatprep.subr.bf16.mxu0 %v2467_v5  ;;  %2325 = vmatprep.subr.bf16.mxu1 %v2432_v3 }
 0x606   :  { %v1001_v40 = vpop.f32.mrb[10].mxu0  ;;  %v1072_v42 = vpop.f32.mrb[10].mxu1 }
 0x607   :  { %v1076_v46 = vadd.f32 %v1473_v39, %v1001_v40  ;;  %v1003_v47 = vpop.f32.mrb[11].mxu0  ;;  %v1830_v48 = vpop.f32.mrb[11].mxu1  ;;  %v1093_v60 = vadd.f32 %v2730_v37, %v1072_v42  ;;  %v1439_v40 = vrot.slane %v1481_v19, 4 }
 0x608   :  { %v1086_v51 = vadd.f32 %v1084_v45, %v1003_v47 }
 0x609   :  { %v1474_v49 = vmul.f32 -1.442695, %v1076_v46 }
 0x60a   :  { %v1475_v54 = vmul.f32 -1.442695, %v1086_v51 }
 0x60b   :  { %2402 = vpow2.f32 %v1474_v49 }
 0x60c   :  { %2404 = vpow2.f32 %v1475_v54 }
 0x615   :  { %v2403_v55 = vpop.eup %2402 }
 0x616   :  { %v1080_v56 = vadd.f32 1.0, %v2403_v55  ;;  %v2405_v5 = vpop.eup %2404 }
 0x617   :  { %v1090_v57 = vadd.f32 1.0, %v2405_v5 }
 0x618   :  { %2406 = vrcp.f32 %v1080_v56 }
 0x619   :  { %2408 = vrcp.f32 %v1090_v57 }
 0x622   :  { %v2407_v63 = vpop.eup %2406 }
 0x623   :  { %v1094_v0 = vmul.f32 %v2407_v63, %v1093_v60  ;;  %v2409_v7 = vpop.eup %2408 }
 0x624   :  { %v1099_v8 = vsub.f32 1.0, %v2409_v7  ;;  %v1101_v14 = vmul.f32 %v2409_v7, %v2926_v38 }
 0x625   :  { %v1097_v1 = vadd.f32 %v1095_v58, %v1094_v0 }
 0x627   :  { %2410 = vtanh.f32 %v1097_v1 }
 0x631   :  { %v2411_v11 = vpop.eup %2410 }
 0x632   :  { %v1100_v13 = vmul.f32 %v2411_v11, %v1099_v8 }
 0x634   :  { %v2974_v18 = vadd.f32 %v1101_v14, %v1100_v13 }
 0x636   :  { %1476 = vst [vmem:[%s3033_s3 + $0xa] sm:$0x3] %v2974_v18  ;;  %1172 = vmatmul.mubr.f32.vlgmr.msra.gmra.mrb[12].mxu0 %v2974_v18  ;;  %1864 = vmatmul.mubr.f32.vlgmr.msra.gmra.mrb[12].mxu1 %v2974_v18 }
 0x637   :  { %2296 = vmatpush1.bf16.msra.mxu0 %v2480_v9  ;;  %2327 = vmatpush3.bf16.msra.mxu1 %v2539_v29 }
 0x638   :  { %2298 = vmatprep.subr.bf16.mxu0 %v2482_v10  ;;  %2328 = vmatprep.subr.bf16.mxu1 %v2432_v3 }
 0x639   :  { %1343 = vmatprep.mubr.f32.mxu0 %v2433_v4  ;;  %1898 = vmatprep.mubr.msk.f32.mxu1 %vm2434_vm0, %v2433_v4  ;;  %v1477_v4 = vld [vmem:[%s3031_s0 + $0x24] sm:$0x3f] }
 0x63b   :  { %2300 = vmatpush1.bf16.msra.mxu0 %v2498_v15  ;;  %2330 = vmatpush3.bf16.msra.mxu1 %v2554_v34  ;;  %v1256_v15 = vrot.slane %v1477_v4, 2 }
 0x63c   :  { %2302 = vmatprep.subr.bf16.mxu0 %v2501_v16  ;;  %2331 = vmatprep.subr.bf16.mxu1 %v2432_v3 }
 0x63f   :  { %2304 = vmatpush1.bf16.msra.mxu0 %v2516_v21  ;;  %2333 = vmatpush3.bf16.msra.mxu1 %v2582_v43 }
 0x640   :  { %2306 = vmatprep.subr.bf16.mxu0 %v2522_v23  ;;  %2334 = vmatprep.subr.bf16.mxu1 %v2432_v3 }
 0x643   :  { %2308 = vmatpush1.bf16.msra.mxu0 %v2548_v32  ;;  %2336 = vmatpush3.bf16.msra.mxu1 %v2610_v52 }
 0x644   :  { %2310 = vmatprep.subr.bf16.mxu0 %v2557_v35  ;;  %2337 = vmatprep.subr.bf16.mxu1 %v2432_v3 }
 0x647   :  { %2312 = vmatpush1.bf16.msra.mxu0 %v2576_v41  ;;  %2339 = vmatpush3.bf16.msra.mxu1 %v2638_v61 }
 0x648   :  { %2314 = vmatprep.subr.bf16.mxu0 %v2585_v44  ;;  %2340 = vmatprep.subr.bf16.mxu1 %v2432_v3  ;;  %v1267_v44 = vrot.slane %v1477_v4, 4 }
 0x64b   :  { %2316 = vmatpush1.bf16.msra.mxu0 %v2604_v50  ;;  %2342 = vmatpush3.bf16.msra.mxu1 %v2657_v6 }
 0x64c   :  { %2318 = vmatprep.subr.bf16.mxu0 %v2613_v53  ;;  %2343 = vmatprep.subr.bf16.mxu1 %v2432_v3 }
 0x64f   :  { %2320 = vmatpush1.bf16.msra.mxu0 %v2632_v59  ;;  %2345 = vmatpush3.bf16.msra.mxu1 %v2671_v12 }
 0x650   :  { %2322 = vmatprep.subr.bf16.mxu0 %v2641_v62  ;;  %2346 = vmatprep.subr.bf16.mxu1 %v2432_v3 }
 0x653   :  { %2324 = vmatpush1.bf16.msra.mxu0 %v2654_v2  ;;  %2348 = vmatpush3.bf16.msra.mxu1 %v2683_v17 }
 0x709   :  { %v1173_v9 = vpop.f32.mrb[12].mxu0  ;;  %v1244_v10 = vpop.f32.mrb[12].mxu1 }
 0x70a   :  { %v1248_v16 = vadd.f32 %v1477_v4, %v1173_v9  ;;  %v1175_v21 = vpop.f32.mrb[13].mxu0  ;;  %v1865_v23 = vpop.f32.mrb[13].mxu1  ;;  %v1265_v50 = vadd.f32 %v2730_v37, %v1244_v10 }
 0x70b   :  { %v1258_v32 = vadd.f32 %v1256_v15, %v1175_v21 }
 0x70c   :  { %v1478_v29 = vmul.f32 -1.442695, %v1248_v16 }
 0x70d   :  { %v1479_v34 = vmul.f32 -1.442695, %v1258_v32 }
 0x70e   :  { %2412 = vpow2.f32 %v1478_v29 }
 0x70f   :  { %2414 = vpow2.f32 %v1479_v34 }
 0x718   :  { %v2413_v3 = vpop.eup %2412 }
 0x719   :  { %v1252_v35 = vadd.f32 1.0, %v2413_v3  ;;  %v2415_v41 = vpop.eup %2414 }
 0x71a   :  { %v1262_v43 = vadd.f32 1.0, %v2415_v41 }
 0x71b   :  { %2416 = vrcp.f32 %v1252_v35 }
 0x71c   :  { %2418 = vrcp.f32 %v1262_v43 }
 0x725   :  { %v2417_v52 = vpop.eup %2416 }
 0x726   :  { %v1266_v53 = vmul.f32 %v2417_v52, %v1265_v50  ;;  %v2419_v61 = vpop.eup %2418 }
 0x727   :  { %v1271_v62 = vsub.f32 1.0, %v2419_v61  ;;  %v1273_v12 = vmul.f32 %v2419_v61, %v2974_v18 }
 0x728   :  { %v1269_v59 = vadd.f32 %v1267_v44, %v1266_v53 }
 0x72a   :  { %2420 = vtanh.f32 %v1269_v59 }
 0x734   :  { %v2421_v2 = vpop.eup %2420 }
 0x735   :  { %v1272_v6 = vmul.f32 %v2421_v2, %v1271_v62 }
 0x737   :  { %v1274_v17 = vadd.f32 %v1273_v12, %v1272_v6 }
 0x739   :  { %1480 = vst [vmem:[%s3033_s3 + $0xc] sm:$0x3] %v1274_v17  ;;  %1344 = vmatmul.mubr.f32.vlgmr.msra.gmra.mrb[14].mxu0 %v1274_v17  ;;  %1899 = vmatmul.mubr.f32.vlgmr.msra.gmra.mrb[14].mxu1 %v1274_v17 }
 0x80c   :  { %v1345_v20 = vpop.f32.mrb[14].mxu0  ;;  %v1416_v22 = vpop.f32.mrb[14].mxu1 }
 0x80d   :  { %v1420_v25 = vadd.f32 %v1481_v19, %v1345_v20  ;;  %v1347_v26 = vpop.f32.mrb[15].mxu0  ;;  %v1900_v27 = vpop.f32.mrb[15].mxu1  ;;  %v1437_v42 = vadd.f32 %v2730_v37, %v1416_v22 }
 0x80e   :  { %v1430_v30 = vadd.f32 %v1428_v24, %v1347_v26 }
 0x80f   :  { %v1482_v28 = vmul.f32 -1.442695, %v1420_v25 }
 0x810   :  { %v1483_v31 = vmul.f32 -1.442695, %v1430_v30 }
 0x811   :  { %2422 = vpow2.f32 %v1482_v28 }
 0x812   :  { %2424 = vpow2.f32 %v1483_v31 }
 0x81b   :  { %v2423_v33 = vpop.eup %2422 }
 0x81c   :  { %v1424_v36 = vadd.f32 1.0, %v2423_v33  ;;  %v2425_v38 = vpop.eup %2424 }
 0x81d   :  { %v1434_v39 = vadd.f32 1.0, %v2425_v38 }
 0x81e   :  { %2426 = vrcp.f32 %v1424_v36 }
 0x81f   :  { %2428 = vrcp.f32 %v1434_v39 }
 0x828   :  { %v2427_v45 = vpop.eup %2426 }
 0x829   :  { %v1438_v46 = vmul.f32 %v2427_v45, %v1437_v42  ;;  %v2429_v48 = vpop.eup %2428 }
 0x82a   :  { %v1443_v49 = vsub.f32 1.0, %v2429_v48  ;;  %v1445_v55 = vmul.f32 %v2429_v48, %v1274_v17 }
 0x82b   :  { %v1441_v47 = vadd.f32 %v1439_v40, %v1438_v46 }
 0x82d   :  { %2430 = vtanh.f32 %v1441_v47 }
 0x837   :  { %v2431_v51 = vpop.eup %2430 }
 0x838   :  { %v1444_v54 = vmul.f32 %v2431_v51, %v1443_v49 }
 0x83a   :  { %v1446_v56 = vadd.f32 %v1445_v55, %v1444_v54 }
 0x83c   :  { %1484 = vst [vmem:[%s3033_s3 + $0xe] sm:$0x3] %v1446_v56  ;;  %1449 = vst [vmem:[#allocation2] sm:$0x3] %v1446_v56 }

// kernel: rnn_decoder_forward.2
= control target key start
LH: loop header
LB: loop body
LE: loop exit
PB: predicated region body
PF: predicated region fallthrough
CT: control target
= control target key end

     0   :  { %8 = vsyncpa [#allocation4], 0  ;;  %s2474_s12 = smov [#allocation3]   ;;  %s2943_s0 = inlined_call_operand.vmem [shape: f32[8,2,384], index: 0, kind: input, shape index: {}]   ;;  %s2944_s1 = inlined_call_operand.hbm [shape: f32[128,384], index: 1, kind: input, shape index: {}]   ;;  %s2945_s2 = inlined_call_operand.vmem [shape: f32[1,128], index: 2, kind: input, shape index: {}]   ;;  %s2946_s3 = inlined_call_operand.vmem [shape: f32[8,2,128], index: 3, kind: output, shape index: {}]  }
   0x1   :  { %s16_s13 = sshll.u32 %s2474_s12, 4  ;;  %s2450_s16 = scalar_lea.hbm %s2944_s1, 6144  ;;  %s17_s13 = int_to_ptr.vmem [resolvable:$true] %s16_s13 }
   0x2   :  { %p2451_p0 = scmp.ne.s32.totalorder %s2944_s1, %s2450_s16  ;;  %p2454_p1 = scmp.lt.u32.totalorder %s2450_s16, %s2944_s1 }
   0x4   :  { %p2456_p2 = pnand %p2454_p1, %p2451_p0 }
   0x6   :  { %2459 = shalt.err (!%p2456_p2)
}
   0x7   :  { %s2460_s21 = scalar_lea.vmem %s17_s13, 6144  ;;  %p2465_p4 = scmp.lt.s32.totalorder %s17_s13, %s17_s13 }
   0x8   :  { %p2461_p3 = scmp.ne.s32.totalorder %s17_s13, %s2460_s21  ;;  %p2466_p5 = scmp.lt.s32.totalorder %s2460_s21, %s2460_s21 }
   0xa   :  { %p2467_p6 = por %p2466_p5, %p2465_p4 }
   0xc   :  { %p2468_p7 = pnand %p2467_p6, %p2461_p3 }
   0xe   :  { %2471 = shalt.err (!%p2468_p7)
}
   0xf   :  { %s2475_s22 = smov 384   ;;  %s2476_s23 = smov 24  }
  0x10   :  { %22 = dma.hbm_to_vmem [thread:$0]  %s2944_s1, 6144, %s17_s13, [#allocation4], %s2475_s22, %s2475_s22, %s2476_s23  }
  0x11   :  { %2472 = dma.done.wait [#allocation4], 6144  }
  0x12   :  { %2473 = vsyncadd [#allocation4], 4294961152  ;;  %v2477_v0 = vmov 0.0|0.0   ;;  %v2478_v1 = vmov 0.0   ;;  %vm2479_vm0 = vmmov 0   ;;  %v34_v2 = vld [vmem:[#allocation3 + $0x8] sm:$0xff] }
  0x13   :  { %1948 = vmatprep.subr.bf16.mxu1 %v2477_v0  ;;  %148 = vmatprep.mubr.f32.mxu0 %v2478_v1  ;;  %32 = vst [vmem:[#allocation2] sm:$0x3] %v2478_v1  ;;  %v37_v3 = vld [vmem:[#allocation3 + $0x20] sm:$0xff]  ;;  %v36_v6 = vld [vmem:[#allocation3 + $0x18] sm:$0xff]  ;;  %v43_v8 = vld [vmem:[#allocation3 + $0x50] sm:$0xff] }
  0x14   :  { %1668 = vmatprep.mubr.msk.f32.mxu1 %vm2479_vm0, %v2478_v1  ;;  %v33_v4 = vld [vmem:[#allocation3] sm:$0xff]  ;;  %v2517_v5 = vpack.c.bf16 %v37_v3, %v34_v2  ;;  %v40_v7 = vld [vmem:[#allocation3 + $0x38] sm:$0xff]  ;;  %v39_v11 = vld [vmem:[#allocation3 + $0x30] sm:$0xff] }
  0x15   :  { %v2519_v9 = vpack.c.bf16 %v36_v6, %v33_v4  ;;  %v2521_v10 = vpack.c.bf16 %v43_v8, %v40_v7  ;;  %v42_v12 = vld [vmem:[#allocation3 + $0x48] sm:$0xff]  ;;  %v49_v14 = vld [vmem:[#allocation3 + $0x80] sm:$0xff]  ;;  %v48_v18 = vld [vmem:[#allocation3 + $0x78] sm:$0xff] }
  0x16   :  { %v46_v13 = vld [vmem:[#allocation3 + $0x68] sm:$0xff]  ;;  %1917 = vmatprep.subr.bf16.mxu0 %v2517_v5  ;;  %v2525_v15 = vpack.c.bf16 %v42_v12, %v39_v11  ;;  %v45_v17 = vld [vmem:[#allocation3 + $0x60] sm:$0xff]  ;;  %v52_v19 = vld [vmem:[#allocation3 + $0x98] sm:$0xff] }
  0x17   :  { %1919 = vmatpush1.bf16.msra.mxu0 %v2519_v9  ;;  %v2528_v16 = vpack.c.bf16 %v49_v14, %v46_v13  ;;  %v55_v20 = vld [vmem:[#allocation3 + $0xb0] sm:$0xff]  ;;  %v2531_v21 = vpack.c.bf16 %v48_v18, %v45_v17  ;;  %v54_v24 = vld [vmem:[#allocation3 + $0xa8] sm:$0xff]  ;;  %v61_v28 = vld [vmem:[#allocation3 + $0xe0] sm:$0xff] }
  0x18   :  { %1921 = vmatprep.subr.bf16.mxu0 %v2521_v10  ;;  %v51_v22 = vld [vmem:[#allocation3 + $0x90] sm:$0xff]  ;;  %v2534_v23 = vpack.c.bf16 %v55_v20, %v52_v19  ;;  %v38_v26 = vld [vmem:[#allocation3 + $0x28] sm:$0xff]  ;;  %v41_v30 = vld [vmem:[#allocation3 + $0x40] sm:$0xff] }
  0x19   :  { %v35_v25 = vld [vmem:[#allocation3 + $0x10] sm:$0xff]  ;;  %v58_v27 = vld [vmem:[#allocation3 + $0xc8] sm:$0xff]  ;;  %v44_v31 = vld [vmem:[#allocation3 + $0x58] sm:$0xff]  ;;  %v2539_v32 = vpack.c.bf16 %v54_v24, %v51_v22 }
  0x1a   :  { %v2536_v29 = vpack.c.bf16 %v38_v26, %v35_v25  ;;  %v57_v33 = vld [vmem:[#allocation3 + $0xc0] sm:$0xff]  ;;  %v2542_v34 = vpack.c.bf16 %v44_v31, %v41_v30  ;;  %v2545_v35 = vpack.c.bf16 %v61_v28, %v58_v27  ;;  %v60_v36 = vld [vmem:[#allocation3 + $0xd8] sm:$0xff]  ;;  %v47_v37 = vld [vmem:[#allocation3 + $0x70] sm:$0xff] }
  0x1b   :  { %1923 = vmatpush1.bf16.msra.mxu0 %v2525_v15  ;;  %v50_v38 = vld [vmem:[#allocation3 + $0x88] sm:$0xff]  ;;  %v64_v39 = vld [vmem:[#allocation3 + $0xf8] sm:$0xff]  ;;  %v67_v40 = vld [vmem:[#allocation3 + $0x110] sm:$0xff]  ;;  %v2549_v41 = vpack.c.bf16 %v60_v36, %v57_v33 }
  0x1c   :  { %1925 = vmatprep.subr.bf16.mxu0 %v2528_v16  ;;  %1950 = vmatpush3.bf16.msra.mxu1 %v2536_v29  ;;  %v63_v42 = vld [vmem:[#allocation3 + $0xf0] sm:$0xff]  ;;  %v2552_v43 = vpack.c.bf16 %v50_v38, %v47_v37  ;;  %v2555_v44 = vpack.c.bf16 %v67_v40, %v64_v39  ;;  %v66_v45 = vld [vmem:[#allocation3 + $0x108] sm:$0xff]  ;;  %v53_v46 = vld [vmem:[#allocation3 + $0xa0] sm:$0xff] }
  0x1d   :  { %1951 = vmatprep.subr.bf16.mxu1 %v2477_v0  ;;  %v56_v47 = vld [vmem:[#allocation3 + $0xb8] sm:$0xff]  ;;  %v70_v48 = vld [vmem:[#allocation3 + $0x128] sm:$0xff]  ;;  %v73_v49 = vld [vmem:[#allocation3 + $0x140] sm:$0xff]  ;;  %v2559_v50 = vpack.c.bf16 %v66_v45, %v63_v42 }
  0x1e   :  { %v69_v51 = vld [vmem:[#allocation3 + $0x120] sm:$0xff]  ;;  %v2562_v52 = vpack.c.bf16 %v56_v47, %v53_v46  ;;  %v2565_v53 = vpack.c.bf16 %v73_v49, %v70_v48  ;;  %v72_v54 = vld [vmem:[#allocation3 + $0x138] sm:$0xff]  ;;  %v59_v55 = vld [vmem:[#allocation3 + $0xd0] sm:$0xff] }
  0x1f   :  { %1927 = vmatpush1.bf16.msra.mxu0 %v2531_v21  ;;  %v62_v56 = vld [vmem:[#allocation3 + $0xe8] sm:$0xff]  ;;  %v76_v57 = vld [vmem:[#allocation3 + $0x158] sm:$0xff]  ;;  %v79_v58 = vld [vmem:[#allocation3 + $0x170] sm:$0xff]  ;;  %v2569_v59 = vpack.c.bf16 %v72_v54, %v69_v51 }
  0x20   :  { %1929 = vmatprep.subr.bf16.mxu0 %v2534_v23  ;;  %1953 = vmatpush3.bf16.msra.mxu1 %v2542_v34  ;;  %v75_v60 = vld [vmem:[#allocation3 + $0x150] sm:$0xff]  ;;  %v2572_v61 = vpack.c.bf16 %v62_v56, %v59_v55  ;;  %v2575_v62 = vpack.c.bf16 %v79_v58, %v76_v57  ;;  %v78_v63 = vld [vmem:[#allocation3 + $0x168] sm:$0xff]  ;;  %v65_v2 = vld [vmem:[#allocation3 + $0x100] sm:$0xff] }
  0x21   :  { %1954 = vmatprep.subr.bf16.mxu1 %v2477_v0  ;;  %v68_v3 = vld [vmem:[#allocation3 + $0x118] sm:$0xff]  ;;  %v2579_v4 = vpack.c.bf16 %v78_v63, %v75_v60  ;;  %v71_v7 = vld [vmem:[#allocation3 + $0x130] sm:$0xff]  ;;  %v74_v8 = vld [vmem:[#allocation3 + $0x148] sm:$0xff] }
  0x22   :  { %v2582_v6 = vpack.c.bf16 %v68_v3, %v65_v2  ;;  %v2587_v11 = vld [vmem:[#allocation2] sm:$0x3]  ;;  %v2590_v12 = vpack.c.bf16 %v74_v8, %v71_v7  ;;  %v77_v13 = vld [vmem:[#allocation3 + $0x160] sm:$0xff] }
  0x23   :  { %1931 = vmatpush1.bf16.msra.mxu0 %v2539_v32  ;;  %v80_v14 = vld [vmem:[#allocation3 + $0x178] sm:$0xff]  ;;  %v1472_v56 = vld [vmem:[%s2943_s0 + $0x6] sm:$0x3f] }
  0x24   :  { %1933 = vmatprep.subr.bf16.mxu0 %v2545_v35  ;;  %1956 = vmatpush3.bf16.msra.mxu1 %v2552_v43  ;;  %v2596_v17 = vpack.c.bf16 %v80_v14, %v77_v13  ;;  %v83_v18 = vld [vmem:[%s2943_s0] sm:$0x3f]  ;;  %v410_v60 = vrot.slane %v1472_v56, 2 }
  0x25   :  { %1957 = vmatprep.subr.bf16.mxu1 %v2477_v0  ;;  %v233_v20 = vrot.slane %v83_v18, 2  ;;  %v2643_v37 = vld [vmem:[%s2945_s2] ss:$0 sm:$0xff]  ;;  %v250_v40 = vrot.slane %v83_v18, 4 }
  0x27   :  { %1935 = vmatpush1.bf16.msra.mxu0 %v2549_v41 }
  0x28   :  { %1937 = vmatprep.subr.bf16.mxu0 %v2555_v44  ;;  %1959 = vmatpush3.bf16.msra.mxu1 %v2562_v52 }
  0x29   :  { %1960 = vmatprep.subr.bf16.mxu1 %v2477_v0 }
  0x2b   :  { %1939 = vmatpush1.bf16.msra.mxu0 %v2559_v50 }
  0x2c   :  { %1941 = vmatprep.subr.bf16.mxu0 %v2565_v53  ;;  %1962 = vmatpush3.bf16.msra.mxu1 %v2572_v61 }
  0x2d   :  { %1963 = vmatprep.subr.bf16.mxu1 %v2477_v0 }
  0x2f   :  { %1943 = vmatpush1.bf16.msra.mxu0 %v2569_v59 }
  0x30   :  { %1945 = vmatprep.subr.bf16.mxu0 %v2575_v62  ;;  %1965 = vmatpush3.bf16.msra.mxu1 %v2582_v6 }
  0x31   :  { %1966 = vmatprep.subr.bf16.mxu1 %v2477_v0 }
  0x33   :  { %1947 = vmatpush1.bf16.msra.mxu0 %v2579_v4 }
  0x34   :  { %1973 = vmatprep.subr.bf16.mxu0 %v2517_v5  ;;  %1968 = vmatpush3.bf16.msra.mxu1 %v2590_v12 }
  0x35   :  { %1969 = vmatprep.subr.bf16.mxu1 %v2477_v0 }
  0x36   :  { %149 = vmatmul.mubr.f32.vlgmr.msra.gmra.mrb[0].mxu0 %v2587_v11 }
  0x37   :  { %1975 = vmatpush1.bf16.msra.mxu0 %v2519_v9  ;;  %325 = vmatprep.mubr.f32.mxu0 %v2478_v1 }
  0x38   :  { %1977 = vmatprep.subr.bf16.mxu0 %v2521_v10  ;;  %1971 = vmatpush3.bf16.msra.mxu1 %v2596_v17 }
  0x39   :  { %2004 = vmatprep.subr.bf16.mxu1 %v2477_v0 }
  0x3b   :  { %1979 = vmatpush1.bf16.msra.mxu0 %v2525_v15  ;;  %1669 = vmatmul.mubr.f32.vlgmr.msra.gmra.mrb[0].mxu1 %v2587_v11 }
  0x3c   :  { %1981 = vmatprep.subr.bf16.mxu0 %v2528_v16  ;;  %2006 = vmatpush3.bf16.msra.mxu1 %v2536_v29 }
  0x3d   :  { %2007 = vmatprep.subr.bf16.mxu1 %v2477_v0  ;;  %1703 = vmatprep.mubr.msk.f32.mxu1 %vm2479_vm0, %v2478_v1 }
  0x3f   :  { %1983 = vmatpush1.bf16.msra.mxu0 %v2531_v21 }
  0x40   :  { %1985 = vmatprep.subr.bf16.mxu0 %v2534_v23  ;;  %2009 = vmatpush3.bf16.msra.mxu1 %v2542_v34 }
  0x41   :  { %2010 = vmatprep.subr.bf16.mxu1 %v2477_v0 }
  0x43   :  { %1987 = vmatpush1.bf16.msra.mxu0 %v2539_v32 }
  0x44   :  { %1989 = vmatprep.subr.bf16.mxu0 %v2545_v35  ;;  %2012 = vmatpush3.bf16.msra.mxu1 %v2552_v43 }
  0x45   :  { %2013 = vmatprep.subr.bf16.mxu1 %v2477_v0 }
  0x47   :  { %1991 = vmatpush1.bf16.msra.mxu0 %v2549_v41 }
  0x48   :  { %1993 = vmatprep.subr.bf16.mxu0 %v2555_v44  ;;  %2015 = vmatpush3.bf16.msra.mxu1 %v2562_v52 }
  0x49   :  { %2016 = vmatprep.subr.bf16.mxu1 %v2477_v0 }
  0x4b   :  { %1995 = vmatpush1.bf16.msra.mxu0 %v2559_v50 }
  0x4c   :  { %1997 = vmatprep.subr.bf16.mxu0 %v2565_v53  ;;  %2018 = vmatpush3.bf16.msra.mxu1 %v2572_v61 }
  0x4d   :  { %2019 = vmatprep.subr.bf16.mxu1 %v2477_v0 }
  0x4f   :  { %1999 = vmatpush1.bf16.msra.mxu0 %v2569_v59 }
  0x50   :  { %2001 = vmatprep.subr.bf16.mxu0 %v2575_v62  ;;  %2021 = vmatpush3.bf16.msra.mxu1 %v2582_v6 }
  0x51   :  { %2022 = vmatprep.subr.bf16.mxu1 %v2477_v0 }
  0x53   :  { %2003 = vmatpush1.bf16.msra.mxu0 %v2579_v4 }
  0x54   :  { %2029 = vmatprep.subr.bf16.mxu0 %v2517_v5  ;;  %2024 = vmatpush3.bf16.msra.mxu1 %v2590_v12 }
  0x55   :  { %2025 = vmatprep.subr.bf16.mxu1 %v2477_v0 }
  0x58   :  { %2027 = vmatpush3.bf16.msra.mxu1 %v2596_v17 }
  0x59   :  { %2060 = vmatprep.subr.bf16.mxu1 %v2477_v0 }
 0x109   :  { %v150_v19 = vpop.f32.mrb[0].mxu0 }
 0x10a   :  { %v225_v22 = vadd.f32 %v150_v19, %v83_v18  ;;  %v152_v24 = vpop.f32.mrb[1].mxu0 }
 0x10b   :  { %v235_v26 = vadd.f32 %v233_v20, %v152_v24  ;;  %v421_v20 = vrot.slane %v1472_v56, 4 }
 0x10c   :  { %v1469_v25 = vmul.f32 -1.442695, %v225_v22 }
 0x10d   :  { %v1470_v27 = vmul.f32 -1.442695, %v235_v26 }
 0x10e   :  { %2370 = vpow2.f32 %v1469_v25  ;;  %v221_v28 = vpop.f32.mrb[0].mxu1 }
 0x10f   :  { %v1670_v30 = vpop.f32.mrb[1].mxu1  ;;  %2372 = vpow2.f32 %v1470_v27  ;;  %v248_v39 = vadd.f32 %v2643_v37, %v221_v28 }
 0x118   :  { %v2371_v31 = vpop.eup %2370 }
 0x119   :  { %v229_v33 = vadd.f32 1.0, %v2371_v31  ;;  %v2373_v36 = vpop.eup %2372 }
 0x11a   :  { %v239_v38 = vadd.f32 1.0, %v2373_v36 }
 0x11b   :  { %2374 = vrcp.f32 %v229_v33 }
 0x11c   :  { %2376 = vrcp.f32 %v239_v38  ;;  %v1476_v38 = vld [vmem:[%s2943_s0 + $0xc] sm:$0x3f] }
 0x125   :  { %v2375_v42 = vpop.eup %2374 }
 0x126   :  { %v249_v45 = vmul.f32 %v2375_v42, %v248_v39  ;;  %v2377_v47 = vpop.eup %2376  ;;  %v582_v42 = vrot.slane %v1476_v38, 2 }
 0x127   :  { %v254_v48 = vsub.f32 1.0, %v2377_v47  ;;  %v256_v54 = vmul.f32 %v2377_v47, %v2587_v11 }
 0x128   :  { %v252_v46 = vadd.f32 %v250_v40, %v249_v45 }
 0x12a   :  { %2378 = vtanh.f32 %v252_v46 }
 0x134   :  { %v2379_v49 = vpop.eup %2378 }
 0x135   :  { %v255_v51 = vmul.f32 %v2379_v49, %v254_v48 }
 0x137   :  { %v2647_v55 = vadd.f32 %v256_v54, %v255_v51 }
 0x139   :  { %258 = vst [vmem:[%s2946_s3] sm:$0x3] %v2647_v55  ;;  %326 = vmatmul.mubr.f32.vlgmr.msra.gmra.mrb[2].mxu0 %v2647_v55  ;;  %1704 = vmatmul.mubr.f32.vlgmr.msra.gmra.mrb[2].mxu1 %v2647_v55 }
 0x13a   :  { %2031 = vmatpush1.bf16.msra.mxu0 %v2519_v9  ;;  %2062 = vmatpush3.bf16.msra.mxu1 %v2536_v29 }
 0x13b   :  { %2033 = vmatprep.subr.bf16.mxu0 %v2521_v10  ;;  %2063 = vmatprep.subr.bf16.mxu1 %v2477_v0 }
 0x13c   :  { %497 = vmatprep.mubr.f32.mxu0 %v2478_v1  ;;  %1738 = vmatprep.mubr.msk.f32.mxu1 %vm2479_vm0, %v2478_v1 }
 0x13e   :  { %2035 = vmatpush1.bf16.msra.mxu0 %v2525_v15  ;;  %2065 = vmatpush3.bf16.msra.mxu1 %v2542_v34 }
 0x13f   :  { %2037 = vmatprep.subr.bf16.mxu0 %v2528_v16  ;;  %2066 = vmatprep.subr.bf16.mxu1 %v2477_v0 }
 0x142   :  { %2039 = vmatpush1.bf16.msra.mxu0 %v2531_v21  ;;  %2068 = vmatpush3.bf16.msra.mxu1 %v2552_v43 }
 0x143   :  { %2041 = vmatprep.subr.bf16.mxu0 %v2534_v23  ;;  %2069 = vmatprep.subr.bf16.mxu1 %v2477_v0 }
 0x146   :  { %2043 = vmatpush1.bf16.msra.mxu0 %v2539_v32  ;;  %2071 = vmatpush3.bf16.msra.mxu1 %v2562_v52 }
 0x147   :  { %2045 = vmatprep.subr.bf16.mxu0 %v2545_v35  ;;  %2072 = vmatprep.subr.bf16.mxu1 %v2477_v0 }
 0x14a   :  { %2047 = vmatpush1.bf16.msra.mxu0 %v2549_v41  ;;  %2074 = vmatpush3.bf16.msra.mxu1 %v2572_v61 }
 0x14b   :  { %2049 = vmatprep.subr.bf16.mxu0 %v2555_v44  ;;  %2075 = vmatprep.subr.bf16.mxu1 %v2477_v0 }
 0x14e   :  { %2051 = vmatpush1.bf16.msra.mxu0 %v2559_v50  ;;  %2077 = vmatpush3.bf16.msra.mxu1 %v2582_v6 }
 0x14f   :  { %2053 = vmatprep.subr.bf16.mxu0 %v2565_v53  ;;  %2078 = vmatprep.subr.bf16.mxu1 %v2477_v0 }
 0x152   :  { %2055 = vmatpush1.bf16.msra.mxu0 %v2569_v59  ;;  %2080 = vmatpush3.bf16.msra.mxu1 %v2590_v12 }
 0x153   :  { %2057 = vmatprep.subr.bf16.mxu0 %v2575_v62  ;;  %2081 = vmatprep.subr.bf16.mxu1 %v2477_v0 }
 0x156   :  { %2059 = vmatpush1.bf16.msra.mxu0 %v2579_v4  ;;  %2083 = vmatpush3.bf16.msra.mxu1 %v2596_v17 }
 0x157   :  { %2085 = vmatprep.subr.bf16.mxu0 %v2517_v5  ;;  %2116 = vmatprep.subr.bf16.mxu1 %v2477_v0 }
 0x20c   :  { %v327_v57 = vpop.f32.mrb[2].mxu0  ;;  %v398_v58 = vpop.f32.mrb[2].mxu1 }
 0x20d   :  { %v402_v63 = vadd.f32 %v1472_v56, %v327_v57  ;;  %v329_v2 = vpop.f32.mrb[3].mxu0  ;;  %v1705_v3 = vpop.f32.mrb[3].mxu1  ;;  %v419_v22 = vadd.f32 %v2643_v37, %v398_v58  ;;  %v593_v58 = vrot.slane %v1476_v38, 4 }
 0x20e   :  { %v412_v8 = vadd.f32 %v410_v60, %v329_v2 }
 0x20f   :  { %v1473_v7 = vmul.f32 -1.442695, %v402_v63 }
 0x210   :  { %v1474_v11 = vmul.f32 -1.442695, %v412_v8 }
 0x211   :  { %2380 = vpow2.f32 %v1473_v7 }
 0x212   :  { %2382 = vpow2.f32 %v1474_v11 }
 0x21b   :  { %v2381_v13 = vpop.eup %2380 }
 0x21c   :  { %v406_v14 = vadd.f32 1.0, %v2381_v13  ;;  %v2383_v18 = vpop.eup %2382 }
 0x21d   :  { %v416_v19 = vadd.f32 1.0, %v2383_v18 }
 0x21e   :  { %2384 = vrcp.f32 %v406_v14 }
 0x21f   :  { %2386 = vrcp.f32 %v416_v19  ;;  %v1480_v19 = vld [vmem:[%s2943_s0 + $0x12] sm:$0x3f] }
 0x228   :  { %v2385_v24 = vpop.eup %2384 }
 0x229   :  { %v420_v25 = vmul.f32 %v2385_v24, %v419_v22  ;;  %v2387_v27 = vpop.eup %2386  ;;  %v754_v24 = vrot.slane %v1480_v19, 2 }
 0x22a   :  { %v425_v28 = vsub.f32 1.0, %v2387_v27  ;;  %v427_v33 = vmul.f32 %v2387_v27, %v2647_v55 }
 0x22b   :  { %v423_v26 = vadd.f32 %v421_v20, %v420_v25 }
 0x22d   :  { %2388 = vtanh.f32 %v423_v26 }
 0x237   :  { %v2389_v30 = vpop.eup %2388 }
 0x238   :  { %v426_v31 = vmul.f32 %v2389_v30, %v425_v28 }
 0x23a   :  { %v2695_v36 = vadd.f32 %v427_v33, %v426_v31 }
 0x23c   :  { %1475 = vst [vmem:[%s2946_s3 + $0x2] sm:$0x3] %v2695_v36  ;;  %498 = vmatmul.mubr.f32.vlgmr.msra.gmra.mrb[4].mxu0 %v2695_v36  ;;  %1739 = vmatmul.mubr.f32.vlgmr.msra.gmra.mrb[4].mxu1 %v2695_v36 }
 0x23d   :  { %2087 = vmatpush1.bf16.msra.mxu0 %v2519_v9  ;;  %2118 = vmatpush3.bf16.msra.mxu1 %v2536_v29 }
 0x23e   :  { %2089 = vmatprep.subr.bf16.mxu0 %v2521_v10  ;;  %2119 = vmatprep.subr.bf16.mxu1 %v2477_v0 }
 0x23f   :  { %669 = vmatprep.mubr.f32.mxu0 %v2478_v1  ;;  %1773 = vmatprep.mubr.msk.f32.mxu1 %vm2479_vm0, %v2478_v1 }
 0x241   :  { %2091 = vmatpush1.bf16.msra.mxu0 %v2525_v15  ;;  %2121 = vmatpush3.bf16.msra.mxu1 %v2542_v34 }
 0x242   :  { %2093 = vmatprep.subr.bf16.mxu0 %v2528_v16  ;;  %2122 = vmatprep.subr.bf16.mxu1 %v2477_v0 }
 0x245   :  { %2095 = vmatpush1.bf16.msra.mxu0 %v2531_v21  ;;  %2124 = vmatpush3.bf16.msra.mxu1 %v2552_v43 }
 0x246   :  { %2097 = vmatprep.subr.bf16.mxu0 %v2534_v23  ;;  %2125 = vmatprep.subr.bf16.mxu1 %v2477_v0 }
 0x249   :  { %2099 = vmatpush1.bf16.msra.mxu0 %v2539_v32  ;;  %2127 = vmatpush3.bf16.msra.mxu1 %v2562_v52 }
 0x24a   :  { %2101 = vmatprep.subr.bf16.mxu0 %v2545_v35  ;;  %2128 = vmatprep.subr.bf16.mxu1 %v2477_v0 }
 0x24d   :  { %2103 = vmatpush1.bf16.msra.mxu0 %v2549_v41  ;;  %2130 = vmatpush3.bf16.msra.mxu1 %v2572_v61 }
 0x24e   :  { %2105 = vmatprep.subr.bf16.mxu0 %v2555_v44  ;;  %2131 = vmatprep.subr.bf16.mxu1 %v2477_v0 }
 0x251   :  { %2107 = vmatpush1.bf16.msra.mxu0 %v2559_v50  ;;  %2133 = vmatpush3.bf16.msra.mxu1 %v2582_v6 }
 0x252   :  { %2109 = vmatprep.subr.bf16.mxu0 %v2565_v53  ;;  %2134 = vmatprep.subr.bf16.mxu1 %v2477_v0 }
 0x255   :  { %2111 = vmatpush1.bf16.msra.mxu0 %v2569_v59  ;;  %2136 = vmatpush3.bf16.msra.mxu1 %v2590_v12 }
 0x256   :  { %2113 = vmatprep.subr.bf16.mxu0 %v2575_v62  ;;  %2137 = vmatprep.subr.bf16.mxu1 %v2477_v0 }
 0x259   :  { %2115 = vmatpush1.bf16.msra.mxu0 %v2579_v4  ;;  %2139 = vmatpush3.bf16.msra.mxu1 %v2596_v17 }
 0x25a   :  { %2141 = vmatprep.subr.bf16.mxu0 %v2517_v5  ;;  %2172 = vmatprep.subr.bf16.mxu1 %v2477_v0 }
 0x30f   :  { %v499_v39 = vpop.f32.mrb[4].mxu0  ;;  %v570_v40 = vpop.f32.mrb[4].mxu1 }
 0x310   :  { %v574_v45 = vadd.f32 %v1476_v38, %v499_v39  ;;  %v501_v46 = vpop.f32.mrb[5].mxu0  ;;  %v1740_v47 = vpop.f32.mrb[5].mxu1  ;;  %v591_v60 = vadd.f32 %v2643_v37, %v570_v40  ;;  %v765_v40 = vrot.slane %v1480_v19, 4 }
 0x311   :  { %v584_v49 = vadd.f32 %v582_v42, %v501_v46 }
 0x312   :  { %v1477_v48 = vmul.f32 -1.442695, %v574_v45 }
 0x313   :  { %v1478_v51 = vmul.f32 -1.442695, %v584_v49 }
 0x314   :  { %2390 = vpow2.f32 %v1477_v48 }
 0x315   :  { %2392 = vpow2.f32 %v1478_v51 }
 0x31e   :  { %v2391_v54 = vpop.eup %2390 }
 0x31f   :  { %v578_v55 = vadd.f32 1.0, %v2391_v54  ;;  %v2393_v56 = vpop.eup %2392 }
 0x320   :  { %v588_v57 = vadd.f32 1.0, %v2393_v56 }
 0x321   :  { %2394 = vrcp.f32 %v578_v55 }
 0x322   :  { %2396 = vrcp.f32 %v588_v57  ;;  %v1484_v57 = vld [vmem:[%s2943_s0 + $0x18] sm:$0x3f] }
 0x32b   :  { %v2395_v63 = vpop.eup %2394 }
 0x32c   :  { %v592_v2 = vmul.f32 %v2395_v63, %v591_v60  ;;  %v2397_v7 = vpop.eup %2396  ;;  %v926_v63 = vrot.slane %v1484_v57, 2 }
 0x32d   :  { %v597_v8 = vsub.f32 1.0, %v2397_v7  ;;  %v599_v14 = vmul.f32 %v2397_v7, %v2695_v36 }
 0x32e   :  { %v595_v3 = vadd.f32 %v593_v58, %v592_v2 }
 0x330   :  { %2398 = vtanh.f32 %v595_v3 }
 0x33a   :  { %v2399_v11 = vpop.eup %2398 }
 0x33b   :  { %v598_v13 = vmul.f32 %v2399_v11, %v597_v8 }
 0x33d   :  { %v2743_v18 = vadd.f32 %v599_v14, %v598_v13 }
 0x33f   :  { %1479 = vst [vmem:[%s2946_s3 + $0x4] sm:$0x3] %v2743_v18  ;;  %670 = vmatmul.mubr.f32.vlgmr.msra.gmra.mrb[6].mxu0 %v2743_v18  ;;  %1774 = vmatmul.mubr.f32.vlgmr.msra.gmra.mrb[6].mxu1 %v2743_v18 }
 0x340   :  { %2143 = vmatpush1.bf16.msra.mxu0 %v2519_v9  ;;  %2174 = vmatpush3.bf16.msra.mxu1 %v2536_v29 }
 0x341   :  { %2145 = vmatprep.subr.bf16.mxu0 %v2521_v10  ;;  %2175 = vmatprep.subr.bf16.mxu1 %v2477_v0 }
 0x342   :  { %841 = vmatprep.mubr.f32.mxu0 %v2478_v1  ;;  %1808 = vmatprep.mubr.msk.f32.mxu1 %vm2479_vm0, %v2478_v1 }
 0x344   :  { %2147 = vmatpush1.bf16.msra.mxu0 %v2525_v15  ;;  %2177 = vmatpush3.bf16.msra.mxu1 %v2542_v34 }
 0x345   :  { %2149 = vmatprep.subr.bf16.mxu0 %v2528_v16  ;;  %2178 = vmatprep.subr.bf16.mxu1 %v2477_v0 }
 0x348   :  { %2151 = vmatpush1.bf16.msra.mxu0 %v2531_v21  ;;  %2180 = vmatpush3.bf16.msra.mxu1 %v2552_v43 }
 0x349   :  { %2153 = vmatprep.subr.bf16.mxu0 %v2534_v23  ;;  %2181 = vmatprep.subr.bf16.mxu1 %v2477_v0 }
 0x34c   :  { %2155 = vmatpush1.bf16.msra.mxu0 %v2539_v32  ;;  %2183 = vmatpush3.bf16.msra.mxu1 %v2562_v52 }
 0x34d   :  { %2157 = vmatprep.subr.bf16.mxu0 %v2545_v35  ;;  %2184 = vmatprep.subr.bf16.mxu1 %v2477_v0 }
 0x350   :  { %2159 = vmatpush1.bf16.msra.mxu0 %v2549_v41  ;;  %2186 = vmatpush3.bf16.msra.mxu1 %v2572_v61 }
 0x351   :  { %2161 = vmatprep.subr.bf16.mxu0 %v2555_v44  ;;  %2187 = vmatprep.subr.bf16.mxu1 %v2477_v0 }
 0x354   :  { %2163 = vmatpush1.bf16.msra.mxu0 %v2559_v50  ;;  %2189 = vmatpush3.bf16.msra.mxu1 %v2582_v6 }
 0x355   :  { %2165 = vmatprep.subr.bf16.mxu0 %v2565_v53  ;;  %2190 = vmatprep.subr.bf16.mxu1 %v2477_v0 }
 0x358   :  { %2167 = vmatpush1.bf16.msra.mxu0 %v2569_v59  ;;  %2192 = vmatpush3.bf16.msra.mxu1 %v2590_v12 }
 0x359   :  { %2169 = vmatprep.subr.bf16.mxu0 %v2575_v62  ;;  %2193 = vmatprep.subr.bf16.mxu1 %v2477_v0 }
 0x35c   :  { %2171 = vmatpush1.bf16.msra.mxu0 %v2579_v4  ;;  %2195 = vmatpush3.bf16.msra.mxu1 %v2596_v17 }
 0x35d   :  { %2197 = vmatprep.subr.bf16.mxu0 %v2517_v5  ;;  %2228 = vmatprep.subr.bf16.mxu1 %v2477_v0 }
 0x412   :  { %v671_v20 = vpop.f32.mrb[6].mxu0  ;;  %v742_v22 = vpop.f32.mrb[6].mxu1 }
 0x413   :  { %v746_v25 = vadd.f32 %v1480_v19, %v671_v20  ;;  %v673_v26 = vpop.f32.mrb[7].mxu0  ;;  %v1775_v27 = vpop.f32.mrb[7].mxu1  ;;  %v763_v42 = vadd.f32 %v2643_v37, %v742_v22  ;;  %v937_v22 = vrot.slane %v1484_v57, 4 }
 0x414   :  { %v756_v30 = vadd.f32 %v754_v24, %v673_v26 }
 0x415   :  { %v1481_v28 = vmul.f32 -1.442695, %v746_v25 }
 0x416   :  { %v1482_v31 = vmul.f32 -1.442695, %v756_v30 }
 0x417   :  { %2400 = vpow2.f32 %v1481_v28 }
 0x418   :  { %2402 = vpow2.f32 %v1482_v31 }
 0x421   :  { %v2401_v33 = vpop.eup %2400 }
 0x422   :  { %v750_v36 = vadd.f32 1.0, %v2401_v33  ;;  %v2403_v38 = vpop.eup %2402 }
 0x423   :  { %v760_v39 = vadd.f32 1.0, %v2403_v38 }
 0x424   :  { %2404 = vrcp.f32 %v750_v36 }
 0x425   :  { %2406 = vrcp.f32 %v760_v39  ;;  %v1488_v39 = vld [vmem:[%s2943_s0 + $0x1e] sm:$0x3f] }
 0x42e   :  { %v2405_v45 = vpop.eup %2404 }
 0x42f   :  { %v764_v46 = vmul.f32 %v2405_v45, %v763_v42  ;;  %v2407_v48 = vpop.eup %2406  ;;  %v1098_v45 = vrot.slane %v1488_v39, 2 }
 0x430   :  { %v769_v49 = vsub.f32 1.0, %v2407_v48  ;;  %v771_v55 = vmul.f32 %v2407_v48, %v2743_v18 }
 0x431   :  { %v767_v47 = vadd.f32 %v765_v40, %v764_v46 }
 0x433   :  { %2408 = vtanh.f32 %v767_v47 }
 0x43d   :  { %v2409_v51 = vpop.eup %2408 }
 0x43e   :  { %v770_v54 = vmul.f32 %v2409_v51, %v769_v49 }
 0x440   :  { %v2791_v56 = vadd.f32 %v771_v55, %v770_v54 }
 0x442   :  { %1483 = vst [vmem:[%s2946_s3 + $0x6] sm:$0x3] %v2791_v56  ;;  %842 = vmatmul.mubr.f32.vlgmr.msra.gmra.mrb[8].mxu0 %v2791_v56  ;;  %1809 = vmatmul.mubr.f32.vlgmr.msra.gmra.mrb[8].mxu1 %v2791_v56 }
 0x443   :  { %2199 = vmatpush1.bf16.msra.mxu0 %v2519_v9  ;;  %2230 = vmatpush3.bf16.msra.mxu1 %v2536_v29 }
 0x444   :  { %2201 = vmatprep.subr.bf16.mxu0 %v2521_v10  ;;  %2231 = vmatprep.subr.bf16.mxu1 %v2477_v0 }
 0x445   :  { %1013 = vmatprep.mubr.f32.mxu0 %v2478_v1  ;;  %1843 = vmatprep.mubr.msk.f32.mxu1 %vm2479_vm0, %v2478_v1 }
 0x447   :  { %2203 = vmatpush1.bf16.msra.mxu0 %v2525_v15  ;;  %2233 = vmatpush3.bf16.msra.mxu1 %v2542_v34 }
 0x448   :  { %2205 = vmatprep.subr.bf16.mxu0 %v2528_v16  ;;  %2234 = vmatprep.subr.bf16.mxu1 %v2477_v0 }
 0x44b   :  { %2207 = vmatpush1.bf16.msra.mxu0 %v2531_v21  ;;  %2236 = vmatpush3.bf16.msra.mxu1 %v2552_v43 }
 0x44c   :  { %2209 = vmatprep.subr.bf16.mxu0 %v2534_v23  ;;  %2237 = vmatprep.subr.bf16.mxu1 %v2477_v0 }
 0x44f   :  { %2211 = vmatpush1.bf16.msra.mxu0 %v2539_v32  ;;  %2239 = vmatpush3.bf16.msra.mxu1 %v2562_v52 }
 0x450   :  { %2213 = vmatprep.subr.bf16.mxu0 %v2545_v35  ;;  %2240 = vmatprep.subr.bf16.mxu1 %v2477_v0 }
 0x453   :  { %2215 = vmatpush1.bf16.msra.mxu0 %v2549_v41  ;;  %2242 = vmatpush3.bf16.msra.mxu1 %v2572_v61 }
 0x454   :  { %2217 = vmatprep.subr.bf16.mxu0 %v2555_v44  ;;  %2243 = vmatprep.subr.bf16.mxu1 %v2477_v0 }
 0x457   :  { %2219 = vmatpush1.bf16.msra.mxu0 %v2559_v50  ;;  %2245 = vmatpush3.bf16.msra.mxu1 %v2582_v6 }
 0x458   :  { %2221 = vmatprep.subr.bf16.mxu0 %v2565_v53  ;;  %2246 = vmatprep.subr.bf16.mxu1 %v2477_v0 }
 0x45b   :  { %2223 = vmatpush1.bf16.msra.mxu0 %v2569_v59  ;;  %2248 = vmatpush3.bf16.msra.mxu1 %v2590_v12 }
 0x45c   :  { %2225 = vmatprep.subr.bf16.mxu0 %v2575_v62  ;;  %2249 = vmatprep.subr.bf16.mxu1 %v2477_v0 }
 0x45f   :  { %2227 = vmatpush1.bf16.msra.mxu0 %v2579_v4  ;;  %2251 = vmatpush3.bf16.msra.mxu1 %v2596_v17 }
 0x460   :  { %2253 = vmatprep.subr.bf16.mxu0 %v2517_v5  ;;  %2284 = vmatprep.subr.bf16.mxu1 %v2477_v0 }
 0x515   :  { %v843_v58 = vpop.f32.mrb[8].mxu0  ;;  %v914_v60 = vpop.f32.mrb[8].mxu1 }
 0x516   :  { %v918_v2 = vadd.f32 %v1484_v57, %v843_v58  ;;  %v845_v3 = vpop.f32.mrb[9].mxu0  ;;  %v1810_v7 = vpop.f32.mrb[9].mxu1  ;;  %v935_v24 = vadd.f32 %v2643_v37, %v914_v60  ;;  %v1109_v58 = vrot.slane %v1488_v39, 4 }
 0x517   :  { %v928_v11 = vadd.f32 %v926_v63, %v845_v3 }
 0x518   :  { %v1485_v8 = vmul.f32 -1.442695, %v918_v2 }
 0x519   :  { %v1486_v13 = vmul.f32 -1.442695, %v928_v11 }
 0x51a   :  { %2410 = vpow2.f32 %v1485_v8 }
 0x51b   :  { %2412 = vpow2.f32 %v1486_v13 }
 0x524   :  { %v2411_v14 = vpop.eup %2410 }
 0x525   :  { %v922_v18 = vadd.f32 1.0, %v2411_v14  ;;  %v2413_v19 = vpop.eup %2412 }
 0x526   :  { %v932_v20 = vadd.f32 1.0, %v2413_v19  ;;  %v1496_v19 = vld [vmem:[%s2943_s0 + $0x2a] sm:$0x3f] }
 0x527   :  { %2414 = vrcp.f32 %v922_v18 }
 0x528   :  { %2416 = vrcp.f32 %v932_v20 }
 0x531   :  { %v2415_v25 = vpop.eup %2414 }
 0x532   :  { %v936_v26 = vmul.f32 %v2415_v25, %v935_v24  ;;  %v2417_v28 = vpop.eup %2416  ;;  %v1442_v24 = vrot.slane %v1496_v19, 2 }
 0x533   :  { %v941_v30 = vsub.f32 1.0, %v2417_v28  ;;  %v943_v36 = vmul.f32 %v2417_v28, %v2791_v56 }
 0x534   :  { %v939_v27 = vadd.f32 %v937_v22, %v936_v26 }
 0x536   :  { %2418 = vtanh.f32 %v939_v27 }
 0x540   :  { %v2419_v31 = vpop.eup %2418 }
 0x541   :  { %v942_v33 = vmul.f32 %v2419_v31, %v941_v30 }
 0x543   :  { %v2839_v38 = vadd.f32 %v943_v36, %v942_v33 }
 0x545   :  { %1487 = vst [vmem:[%s2946_s3 + $0x8] sm:$0x3] %v2839_v38  ;;  %1014 = vmatmul.mubr.f32.vlgmr.msra.gmra.mrb[10].mxu0 %v2839_v38  ;;  %1844 = vmatmul.mubr.f32.vlgmr.msra.gmra.mrb[10].mxu1 %v2839_v38 }
 0x546   :  { %2255 = vmatpush1.bf16.msra.mxu0 %v2519_v9  ;;  %2286 = vmatpush3.bf16.msra.mxu1 %v2536_v29 }
 0x547   :  { %2257 = vmatprep.subr.bf16.mxu0 %v2521_v10  ;;  %2287 = vmatprep.subr.bf16.mxu1 %v2477_v0 }
 0x548   :  { %1185 = vmatprep.mubr.f32.mxu0 %v2478_v1  ;;  %1878 = vmatprep.mubr.msk.f32.mxu1 %vm2479_vm0, %v2478_v1 }
 0x54a   :  { %2259 = vmatpush1.bf16.msra.mxu0 %v2525_v15  ;;  %2289 = vmatpush3.bf16.msra.mxu1 %v2542_v34 }
 0x54b   :  { %2261 = vmatprep.subr.bf16.mxu0 %v2528_v16  ;;  %2290 = vmatprep.subr.bf16.mxu1 %v2477_v0 }
 0x54e   :  { %2263 = vmatpush1.bf16.msra.mxu0 %v2531_v21  ;;  %2292 = vmatpush3.bf16.msra.mxu1 %v2552_v43 }
 0x54f   :  { %2265 = vmatprep.subr.bf16.mxu0 %v2534_v23  ;;  %2293 = vmatprep.subr.bf16.mxu1 %v2477_v0 }
 0x552   :  { %2267 = vmatpush1.bf16.msra.mxu0 %v2539_v32  ;;  %2295 = vmatpush3.bf16.msra.mxu1 %v2562_v52 }
 0x553   :  { %2269 = vmatprep.subr.bf16.mxu0 %v2545_v35  ;;  %2296 = vmatprep.subr.bf16.mxu1 %v2477_v0 }
 0x556   :  { %2271 = vmatpush1.bf16.msra.mxu0 %v2549_v41  ;;  %2298 = vmatpush3.bf16.msra.mxu1 %v2572_v61 }
 0x557   :  { %2273 = vmatprep.subr.bf16.mxu0 %v2555_v44  ;;  %2299 = vmatprep.subr.bf16.mxu1 %v2477_v0 }
 0x55a   :  { %2275 = vmatpush1.bf16.msra.mxu0 %v2559_v50  ;;  %2301 = vmatpush3.bf16.msra.mxu1 %v2582_v6 }
 0x55b   :  { %2277 = vmatprep.subr.bf16.mxu0 %v2565_v53  ;;  %2302 = vmatprep.subr.bf16.mxu1 %v2477_v0 }
 0x55e   :  { %2279 = vmatpush1.bf16.msra.mxu0 %v2569_v59  ;;  %2304 = vmatpush3.bf16.msra.mxu1 %v2590_v12 }
 0x55f   :  { %2281 = vmatprep.subr.bf16.mxu0 %v2575_v62  ;;  %2305 = vmatprep.subr.bf16.mxu1 %v2477_v0 }
 0x562   :  { %2283 = vmatpush1.bf16.msra.mxu0 %v2579_v4  ;;  %2307 = vmatpush3.bf16.msra.mxu1 %v2596_v17 }
 0x563   :  { %2309 = vmatprep.subr.bf16.mxu0 %v2517_v5  ;;  %2340 = vmatprep.subr.bf16.mxu1 %v2477_v0 }
 0x618   :  { %v1015_v40 = vpop.f32.mrb[10].mxu0  ;;  %v1086_v42 = vpop.f32.mrb[10].mxu1 }
 0x619   :  { %v1090_v46 = vadd.f32 %v1488_v39, %v1015_v40  ;;  %v1017_v47 = vpop.f32.mrb[11].mxu0  ;;  %v1845_v48 = vpop.f32.mrb[11].mxu1  ;;  %v1107_v60 = vadd.f32 %v2643_v37, %v1086_v42  ;;  %v1453_v40 = vrot.slane %v1496_v19, 4 }
 0x61a   :  { %v1100_v51 = vadd.f32 %v1098_v45, %v1017_v47 }
 0x61b   :  { %v1489_v49 = vmul.f32 -1.442695, %v1090_v46 }
 0x61c   :  { %v1490_v54 = vmul.f32 -1.442695, %v1100_v51 }
 0x61d   :  { %2420 = vpow2.f32 %v1489_v49 }
 0x61e   :  { %2422 = vpow2.f32 %v1490_v54 }
 0x627   :  { %v2421_v55 = vpop.eup %2420 }
 0x628   :  { %v1094_v56 = vadd.f32 1.0, %v2421_v55  ;;  %v2423_v5 = vpop.eup %2422 }
 0x629   :  { %v1104_v57 = vadd.f32 1.0, %v2423_v5 }
 0x62a   :  { %2424 = vrcp.f32 %v1094_v56 }
 0x62b   :  { %2426 = vrcp.f32 %v1104_v57 }
 0x634   :  { %v2425_v63 = vpop.eup %2424 }
 0x635   :  { %v1108_v2 = vmul.f32 %v2425_v63, %v1107_v60  ;;  %v2427_v7 = vpop.eup %2426 }
 0x636   :  { %v1113_v8 = vsub.f32 1.0, %v2427_v7  ;;  %v1115_v14 = vmul.f32 %v2427_v7, %v2839_v38 }
 0x637   :  { %v1111_v3 = vadd.f32 %v1109_v58, %v1108_v2 }
 0x639   :  { %2428 = vtanh.f32 %v1111_v3 }
 0x643   :  { %v2429_v11 = vpop.eup %2428 }
 0x644   :  { %v1114_v13 = vmul.f32 %v2429_v11, %v1113_v8 }
 0x646   :  { %v2887_v18 = vadd.f32 %v1115_v14, %v1114_v13 }
 0x648   :  { %1491 = vst [vmem:[%s2946_s3 + $0xa] sm:$0x3] %v2887_v18  ;;  %1186 = vmatmul.mubr.f32.vlgmr.msra.gmra.mrb[12].mxu0 %v2887_v18  ;;  %1879 = vmatmul.mubr.f32.vlgmr.msra.gmra.mrb[12].mxu1 %v2887_v18 }
 0x649   :  { %2311 = vmatpush1.bf16.msra.mxu0 %v2519_v9  ;;  %2342 = vmatpush3.bf16.msra.mxu1 %v2536_v29 }
 0x64a   :  { %2313 = vmatprep.subr.bf16.mxu0 %v2521_v10  ;;  %2343 = vmatprep.subr.bf16.mxu1 %v2477_v0 }
 0x64b   :  { %1357 = vmatprep.mubr.f32.mxu0 %v2478_v1  ;;  %1913 = vmatprep.mubr.msk.f32.mxu1 %vm2479_vm0, %v2478_v1  ;;  %v1492_v1 = vld [vmem:[%s2943_s0 + $0x24] sm:$0x3f] }
 0x64d   :  { %2315 = vmatpush1.bf16.msra.mxu0 %v2525_v15  ;;  %2345 = vmatpush3.bf16.msra.mxu1 %v2542_v34  ;;  %v1270_v15 = vrot.slane %v1492_v1, 2 }
 0x64e   :  { %2317 = vmatprep.subr.bf16.mxu0 %v2528_v16  ;;  %2346 = vmatprep.subr.bf16.mxu1 %v2477_v0 }
 0x651   :  { %2319 = vmatpush1.bf16.msra.mxu0 %v2531_v21  ;;  %2348 = vmatpush3.bf16.msra.mxu1 %v2552_v43 }
 0x652   :  { %2321 = vmatprep.subr.bf16.mxu0 %v2534_v23  ;;  %2349 = vmatprep.subr.bf16.mxu1 %v2477_v0 }
 0x655   :  { %2323 = vmatpush1.bf16.msra.mxu0 %v2539_v32  ;;  %2351 = vmatpush3.bf16.msra.mxu1 %v2562_v52 }
 0x656   :  { %2325 = vmatprep.subr.bf16.mxu0 %v2545_v35  ;;  %2352 = vmatprep.subr.bf16.mxu1 %v2477_v0 }
 0x659   :  { %2327 = vmatpush1.bf16.msra.mxu0 %v2549_v41  ;;  %2354 = vmatpush3.bf16.msra.mxu1 %v2572_v61 }
 0x65a   :  { %2329 = vmatprep.subr.bf16.mxu0 %v2555_v44  ;;  %2355 = vmatprep.subr.bf16.mxu1 %v2477_v0  ;;  %v1281_v44 = vrot.slane %v1492_v1, 4 }
 0x65d   :  { %2331 = vmatpush1.bf16.msra.mxu0 %v2559_v50  ;;  %2357 = vmatpush3.bf16.msra.mxu1 %v2582_v6 }
 0x65e   :  { %2333 = vmatprep.subr.bf16.mxu0 %v2565_v53  ;;  %2358 = vmatprep.subr.bf16.mxu1 %v2477_v0 }
 0x661   :  { %2335 = vmatpush1.bf16.msra.mxu0 %v2569_v59  ;;  %2360 = vmatpush3.bf16.msra.mxu1 %v2590_v12 }
 0x662   :  { %2337 = vmatprep.subr.bf16.mxu0 %v2575_v62  ;;  %2361 = vmatprep.subr.bf16.mxu1 %v2477_v0 }
 0x665   :  { %2339 = vmatpush1.bf16.msra.mxu0 %v2579_v4  ;;  %2363 = vmatpush3.bf16.msra.mxu1 %v2596_v17 }
 0x71b   :  { %v1187_v9 = vpop.f32.mrb[12].mxu0  ;;  %v1258_v10 = vpop.f32.mrb[12].mxu1 }
 0x71c   :  { %v1262_v16 = vadd.f32 %v1492_v1, %v1187_v9  ;;  %v1189_v21 = vpop.f32.mrb[13].mxu0  ;;  %v1880_v23 = vpop.f32.mrb[13].mxu1  ;;  %v1279_v50 = vadd.f32 %v2643_v37, %v1258_v10 }
 0x71d   :  { %v1272_v32 = vadd.f32 %v1270_v15, %v1189_v21 }
 0x71e   :  { %v1493_v29 = vmul.f32 -1.442695, %v1262_v16 }
 0x71f   :  { %v1494_v34 = vmul.f32 -1.442695, %v1272_v32 }
 0x720   :  { %2430 = vpow2.f32 %v1493_v29 }
 0x721   :  { %2432 = vpow2.f32 %v1494_v34 }
 0x72a   :  { %v2431_v0 = vpop.eup %2430 }
 0x72b   :  { %v1266_v35 = vadd.f32 1.0, %v2431_v0  ;;  %v2433_v41 = vpop.eup %2432 }
 0x72c   :  { %v1276_v43 = vadd.f32 1.0, %v2433_v41 }
 0x72d   :  { %2434 = vrcp.f32 %v1266_v35 }
 0x72e   :  { %2436 = vrcp.f32 %v1276_v43 }
 0x737   :  { %v2435_v52 = vpop.eup %2434 }
 0x738   :  { %v1280_v53 = vmul.f32 %v2435_v52, %v1279_v50  ;;  %v2437_v61 = vpop.eup %2436 }
 0x739   :  { %v1285_v62 = vsub.f32 1.0, %v2437_v61  ;;  %v1287_v12 = vmul.f32 %v2437_v61, %v2887_v18 }
 0x73a   :  { %v1283_v59 = vadd.f32 %v1281_v44, %v1280_v53 }
 0x73c   :  { %2438 = vtanh.f32 %v1283_v59 }
 0x746   :  { %v2439_v4 = vpop.eup %2438 }
 0x747   :  { %v1286_v6 = vmul.f32 %v2439_v4, %v1285_v62 }
 0x749   :  { %v1288_v17 = vadd.f32 %v1287_v12, %v1286_v6 }
 0x74b   :  { %1495 = vst [vmem:[%s2946_s3 + $0xc] sm:$0x3] %v1288_v17  ;;  %1358 = vmatmul.mubr.f32.vlgmr.msra.gmra.mrb[14].mxu0 %v1288_v17  ;;  %1914 = vmatmul.mubr.f32.vlgmr.msra.gmra.mrb[14].mxu1 %v1288_v17 }
 0x81e   :  { %v1359_v20 = vpop.f32.mrb[14].mxu0  ;;  %v1430_v22 = vpop.f32.mrb[14].mxu1 }
 0x81f   :  { %v1434_v25 = vadd.f32 %v1496_v19, %v1359_v20  ;;  %v1361_v26 = vpop.f32.mrb[15].mxu0  ;;  %v1915_v27 = vpop.f32.mrb[15].mxu1  ;;  %v1451_v42 = vadd.f32 %v2643_v37, %v1430_v22 }
 0x820   :  { %v1444_v30 = vadd.f32 %v1442_v24, %v1361_v26 }
 0x821   :  { %v1497_v28 = vmul.f32 -1.442695, %v1434_v25 }
 0x822   :  { %v1498_v31 = vmul.f32 -1.442695, %v1444_v30 }
 0x823   :  { %2440 = vpow2.f32 %v1497_v28 }
 0x824   :  { %2442 = vpow2.f32 %v1498_v31 }
 0x82d   :  { %v2441_v33 = vpop.eup %2440 }
 0x82e   :  { %v1438_v36 = vadd.f32 1.0, %v2441_v33  ;;  %v2443_v38 = vpop.eup %2442 }
 0x82f   :  { %v1448_v39 = vadd.f32 1.0, %v2443_v38 }
 0x830   :  { %2444 = vrcp.f32 %v1438_v36 }
 0x831   :  { %2446 = vrcp.f32 %v1448_v39 }
 0x83a   :  { %v2445_v45 = vpop.eup %2444 }
 0x83b   :  { %v1452_v46 = vmul.f32 %v2445_v45, %v1451_v42  ;;  %v2447_v48 = vpop.eup %2446 }
 0x83c   :  { %v1457_v49 = vsub.f32 1.0, %v2447_v48  ;;  %v1459_v55 = vmul.f32 %v2447_v48, %v1288_v17 }
 0x83d   :  { %v1455_v47 = vadd.f32 %v1453_v40, %v1452_v46 }
 0x83f   :  { %2448 = vtanh.f32 %v1455_v47 }
 0x849   :  { %v2449_v51 = vpop.eup %2448 }
 0x84a   :  { %v1458_v54 = vmul.f32 %v2449_v51, %v1457_v49 }
 0x84c   :  { %v1460_v56 = vadd.f32 %v1459_v55, %v1458_v54 }
 0x84e   :  { %1499 = vst [vmem:[%s2946_s3 + $0xe] sm:$0x3] %v1460_v56  ;;  %1463 = vst [vmem:[#allocation2] sm:$0x3] %v1460_v56 }
 0x84f   :  { %1468 = vsyncpa [#allocation4], 1 }

</bundles_post_ra>
